<compile_context>
chip_gen: v7x
topology: tpu7x:2x2x1
jax: 0.10.0
libtpu: 0.0.40
codegen_flags: <defaults>
</compile_context>

<pallas_src>
import math
import jax
import jax.numpy as jnp
from jax.experimental import pallas as pl
from jax.experimental.pallas import tpu as pltpu


# ----------------------------- in-kernel helpers -----------------------------

def _rmsnorm(x, w, eps=1e-6):
    # fp32 RMSNorm (Llama style).
    var = jnp.mean(x * x, axis=-1, keepdims=True)
    return x * jax.lax.rsqrt(var + eps) * w


# ------------------------------- fused kernel --------------------------------

def make_kernel(num_layers, num_heads, head_dim):
    scale = 1.0 / math.sqrt(head_dim)
    half = head_dim // 2

    def kernel(hidden_ref, cos_ref, sin_ref,
               ln1_ref, wqkv_ref, wo_ref, ln2_ref, wgu_ref, wd_ref,
               out_ref):
        x = hidden_ref[0]                   # [S, D] fp32 hidden state (per-batch block)
        S, D = x.shape

        cos = cos_ref[...]                  # [S, head_dim] fp32
        sin = sin_ref[...]                  # [S, head_dim] fp32, rotate_half sign folded in

        # Causal mask generated in-kernel (no HBM mask DMA); reused across layers/heads.
        row = jax.lax.broadcasted_iota(jnp.int32, (S, S), 0)
        col = jax.lax.broadcasted_iota(jnp.int32, (S, S), 1)
        causal = col <= row

        # All weights are VMEM-resident; static unroll over the (small) layer slice.
        for l in range(num_layers):
            ln1 = ln1_ref[l]                # [1, D]
            ln2 = ln2_ref[l]                # [1, D]
            wqkv = wqkv_ref[l]              # [D, 3D] bf16 (q | k | v fused)
            wo = wo_ref[l]                  # [D, D]  bf16
            wgu = wgu_ref[l]                # [D, 2I] bf16 (gate | up fused)
            wd = wd_ref[l]                  # [I, D]  bf16

            # ---------------- self attention ----------------
            xn = _rmsnorm(x, ln1).astype(jnp.bfloat16)
            qkv = jnp.dot(xn, wqkv, preferred_element_type=jnp.float32)    # [S, 3D]

            attn = jnp.zeros((S, D), jnp.float32)
            for h in range(num_heads):      # head_dim == 128 -> static lane-tile slices
                qs = h * head_dim
                q_h = qkv[:, qs:qs + head_dim]                             # [S, hd]
                k_h = qkv[:, D + qs:D + qs + head_dim]
                v_h = qkv[:, 2 * D + qs:2 * D + qs + head_dim]

                # RoPE via XLU roll; rotate_half sign baked into `sin`.
                q_h = q_h * cos + pltpu.roll(q_h, half, axis=1) * sin
                k_h = k_h * cos + pltpu.roll(k_h, half, axis=1) * sin

                s = jnp.dot(q_h.astype(jnp.bfloat16),
                            k_h.astype(jnp.bfloat16).T,
                            preferred_element_type=jnp.float32) * scale    # [S, S]
                s = jnp.where(causal, s, -jnp.inf)
                s = s - jnp.max(s, axis=-1, keepdims=True)
                p = jnp.exp(s)
                p = p * pl.reciprocal(jnp.sum(p, axis=-1, keepdims=True), approx=True)

                ctx = jnp.dot(p.astype(jnp.bfloat16),
                              v_h.astype(jnp.bfloat16),
                              preferred_element_type=jnp.float32)          # [S, hd]
                # Accumulate the output projection per head (row-sliced Wo) — avoids
                # any lane concatenate / transpose of the context heads.
                attn = attn + jnp.dot(ctx.astype(jnp.bfloat16),
                                      wo[qs:qs + head_dim, :],
                                      preferred_element_type=jnp.float32)  # [S, D]
            h1 = x + attn

            # ---------------- SwiGLU MLP (fused gate|up) ----------------
            xn2 = _rmsnorm(h1, ln2).astype(jnp.bfloat16)
            gu = jnp.dot(xn2, wgu, preferred_element_type=jnp.float32)     # [S, 2I]
            I = gu.shape[-1] // 2
            g = gu[:, :I]
            u = gu[:, I:]
            act = g * jax.nn.sigmoid(g)     # SiLU
            x = h1 + jnp.dot((act * u).astype(jnp.bfloat16), wd,
                             preferred_element_type=jnp.float32)

        out_ref[0] = x

    return kernel


# ------------------------------ module wrapper ---------------------------------

def middle_part_forward(hidden, attn_mask, layer_params, *,
                        num_heads, head_dim, rope_theta=10000.0):
    """Mirrors _MiddlePart.forward: rotary embeddings, causal mask build, then the
    sliced stack of decoder layers — all layers fused into one pallas_call step."""
    B, S, D = hidden.shape
    L = len(layer_params)
    half = head_dim // 2

    # Rotary embedding (positions identical across batch -> pass [S, head_dim]).
    inv_freq = 1.0 / (rope_theta ** (jnp.arange(0, head_dim, 2,
                                                dtype=jnp.float32) / head_dim))
    freqs = jnp.arange(S, dtype=jnp.float32)[:, None] * inv_freq[None, :]
    emb = jnp.concatenate([freqs, freqs], axis=-1)           # [S, head_dim]
    cos = jnp.cos(emb)
    sin = jnp.sin(emb)
    # Fold rotate_half sign into sin: rotate_half(x)*sin == roll(x, hd/2)*sin_rot.
    sin_rot = jnp.concatenate([-sin[:, :half], sin[:, half:]], axis=-1)

    # Module output mask (2-D input -> full additive causal [B,1,S,S], matching the
    # PyTorch module which replaces any 2-D mask with a pure causal mask).  The kernel
    # regenerates the causal mask in-VMEM and never DMAs this tensor.
    if attn_mask.ndim == 2:
        causal = jnp.triu(jnp.full((S, S), float('-inf'), dtype=jnp.float32), k=1)
        attn_mask_out = jnp.broadcast_to(causal[None, None, :, :], (B, 1, S, S))
    else:
        attn_mask_out = attn_mask
        # TODO(synk): arbitrary precomputed 4-D masks are not applied in-kernel
        # (kernel assumes causal masking, matching the exercised 2-D path).

    # Stack per-layer params along a leading layer axis; constant index_maps make the
    # whole (small) weight stack VMEM-resident for every grid step / core.
    stacked = {k: jnp.stack([p[k] for p in layer_params], axis=0)
               for k in layer_params[0]}
    D3 = stacked['wqkv'].shape[-1]          # 3 * hidden
    I2 = stacked['wgu'].shape[-1]           # 2 * intermediate

    kernel = make_kernel(L, num_heads, head_dim)

    def const_spec(shape):
        nd = len(shape)
        return pl.BlockSpec(shape, lambda b, _nd=nd: (0,) * _nd)

    out = pl.pallas_call(
        kernel,
        out_shape=jax.ShapeDtypeStruct((B, S, D), jnp.float32),
        grid=(B,),
        in_specs=[
            pl.BlockSpec((1, S, D), lambda b: (b, 0, 0)),     # hidden (aliased to out)
            const_spec((S, head_dim)),                        # cos
            const_spec((S, head_dim)),                        # sin (sign-folded)
            const_spec((L, 1, D)),                            # ln1
            const_spec((L, D, D3)),                           # wqkv (q|k|v fused)
            const_spec((L, D, D)),                            # wo
            const_spec((L, 1, D)),                            # ln2
            const_spec((L, D, I2)),                           # wgu (gate|up fused)
            const_spec((L, I2 // 2, D)),                      # wd
        ],
        out_specs=pl.BlockSpec((1, S, D), lambda b: (b, 0, 0)),
        input_output_aliases={0: 0},                          # hidden buffer reused as out
        compiler_params=pltpu.CompilerParams(
            dimension_semantics=("parallel",),                # shards B over v7x's 2 TCs
            vmem_limit_bytes=48 * 1024 * 1024),
    )(hidden, cos, sin_rot,
      stacked['ln1'], stacked['wqkv'], stacked['wo'],
      stacked['ln2'], stacked['wgu'], stacked['wd'])

    return out, attn_mask_out


# --------------------------------- params --------------------------------------

def init_layer_params(key, hidden_dim, intermediate_dim, scale=0.05):
    ks = jax.random.split(key, 7)
    n = lambda k, shape: (scale * jax.random.normal(k, shape)).astype(jnp.bfloat16)
    wq = n(ks[0], (hidden_dim, hidden_dim))
    wk = n(ks[1], (hidden_dim, hidden_dim))
    wv = n(ks[2], (hidden_dim, hidden_dim))
    wg = n(ks[4], (hidden_dim, intermediate_dim))
    wu = n(ks[5], (hidden_dim, intermediate_dim))
    return {
        'ln1': jnp.ones((1, hidden_dim), jnp.float32),
        'wqkv': jnp.concatenate([wq, wk, wv], axis=1),        # fused q|k|v
        'wo': n(ks[3], (hidden_dim, hidden_dim)),
        'ln2': jnp.ones((1, hidden_dim), jnp.float32),
        'wgu': jnp.concatenate([wg, wu], axis=1),             # fused gate|up
        'wd': n(ks[6], (intermediate_dim, hidden_dim)),
    }


# ----------------------------------- main ---------------------------------------

if __name__ == "__main__":
    # Small but lane-friendly dims: D, head_dim, 3D, 2I multiples of 128; S multiple of 8.
    B, S, D = 2, 16, 256
    NUM_HEADS, HEAD_DIM = 2, 128
    INTER = 512
    NUM_LAYERS = 2          # == end - start of the _MiddlePart slice
    # TODO(synk): grouped-query attention / KV-cache paths of the HF layer are not
    # modeled (use_cache=False, MHA with num_kv_heads == num_heads).

    root = jax.random.PRNGKey(0)
    k_hidden, k_layers = jax.random.split(root)

    hidden = jax.random.normal(k_hidden, (B, S, D), dtype=jnp.float32)
    attn_mask_2d = jnp.ones((B, S), dtype=jnp.float32)   # 2-D mask -> causal path

    layer_keys = jax.random.split(k_layers, NUM_LAYERS)
    layer_params = [init_layer_params(k, D, INTER) for k in layer_keys]

    out_hidden, out_mask = middle_part_forward(
        hidden, attn_mask_2d, layer_params,
        num_heads=NUM_HEADS, head_dim=HEAD_DIM)

    jax.block_until_ready(out_hidden)
    jax.block_until_ready(out_mask)
    assert out_hidden.shape == (B, S, D)
    assert out_mask.shape == (B, 1, S, S)
    assert bool(jnp.all(jnp.isfinite(out_hidden)))
    print("KERNEL_OK")
</pallas_src>

<mosaic_0001>
module attributes {stable_mosaic.version = 11 : i64} {
  func.func @kernel(%arg0: i32, %arg1: memref<1x16x256xf32, #tpu.memory_space<vmem>>, %arg2: memref<16x128xf32, #tpu.memory_space<vmem>>, %arg3: memref<16x128xf32, #tpu.memory_space<vmem>>, %arg4: memref<2x1x256xf32, #tpu.memory_space<vmem>>, %arg5: memref<2x256x768xbf16, #tpu.memory_space<vmem>>, %arg6: memref<2x256x256xbf16, #tpu.memory_space<vmem>>, %arg7: memref<2x1x256xf32, #tpu.memory_space<vmem>>, %arg8: memref<2x256x1024xbf16, #tpu.memory_space<vmem>>, %arg9: memref<2x512x256xbf16, #tpu.memory_space<vmem>>, %arg10: memref<1x16x256xf32, #tpu.memory_space<vmem>>) attributes {dimension_semantics = [#tpu.dimension_semantics<parallel>], iteration_bounds = array<i64: 2>, scalar_prefetch = 0 : i64, scratch_operands = 0 : i64, tpu.core_type = #tpu.core_type<tc>, window_params = [{transform_indices = @transform_0, window_bounds = array<i64: 1, 16, 256>}, {pipeline_mode = #tpu.pipeline_mode<synchronous>, transform_indices = @transform_1, window_bounds = array<i64: 16, 128>}, {pipeline_mode = #tpu.pipeline_mode<synchronous>, transform_indices = @transform_2, window_bounds = array<i64: 16, 128>}, {pipeline_mode = #tpu.pipeline_mode<synchronous>, transform_indices = @transform_3, window_bounds = array<i64: 2, 1, 256>}, {pipeline_mode = #tpu.pipeline_mode<synchronous>, transform_indices = @transform_4, window_bounds = array<i64: 2, 256, 768>}, {pipeline_mode = #tpu.pipeline_mode<synchronous>, transform_indices = @transform_5, window_bounds = array<i64: 2, 256, 256>}, {pipeline_mode = #tpu.pipeline_mode<synchronous>, transform_indices = @transform_6, window_bounds = array<i64: 2, 1, 256>}, {pipeline_mode = #tpu.pipeline_mode<synchronous>, transform_indices = @transform_7, window_bounds = array<i64: 2, 256, 1024>}, {pipeline_mode = #tpu.pipeline_mode<synchronous>, transform_indices = @transform_8, window_bounds = array<i64: 2, 512, 256>}, {transform_indices = @transform_9, window_bounds = array<i64: 1, 16, 256>}]} {
    %c0 = arith.constant 0 : index
    %c0_0 = arith.constant 0 : index
    %c0_1 = arith.constant 0 : index
    %0 = vector.load %arg1[%c0, %c0_0, %c0_1] : memref<1x16x256xf32, #tpu.memory_space<vmem>>, vector<1x16x256xf32>
    %1 = vector.shape_cast %0 : vector<1x16x256xf32> to vector<16x256xf32>
    %c0_2 = arith.constant 0 : index
    %c0_3 = arith.constant 0 : index
    %2 = vector.load %arg2[%c0_2, %c0_3] : memref<16x128xf32, #tpu.memory_space<vmem>>, vector<16x128xf32>
    %c0_4 = arith.constant 0 : index
    %c0_5 = arith.constant 0 : index
    %3 = vector.load %arg3[%c0_4, %c0_5] : memref<16x128xf32, #tpu.memory_space<vmem>>, vector<16x128xf32>
    %4 = tpu.iota {dimensions = array<i32: 0>} : vector<16x16xi32>
    %5 = tpu.iota {dimensions = array<i32: 1>} : vector<16x16xi32>
    %6 = arith.cmpi sle, %5, %4 : vector<16x16xi32>
    %c0_6 = arith.constant 0 : index
    %c0_7 = arith.constant 0 : index
    %c0_8 = arith.constant 0 : index
    %7 = vector.load %arg4[%c0_6, %c0_7, %c0_8] : memref<2x1x256xf32, #tpu.memory_space<vmem>>, vector<1x1x256xf32>
    %8 = vector.shape_cast %7 : vector<1x1x256xf32> to vector<1x256xf32>
    %c0_9 = arith.constant 0 : index
    %c0_10 = arith.constant 0 : index
    %c0_11 = arith.constant 0 : index
    %9 = vector.load %arg7[%c0_9, %c0_10, %c0_11] : memref<2x1x256xf32, #tpu.memory_space<vmem>>, vector<1x1x256xf32>
    %10 = vector.shape_cast %9 : vector<1x1x256xf32> to vector<1x256xf32>
    %c0_12 = arith.constant 0 : index
    %c0_13 = arith.constant 0 : index
    %c0_14 = arith.constant 0 : index
    %11 = vector.load %arg5[%c0_12, %c0_13, %c0_14] : memref<2x256x768xbf16, #tpu.memory_space<vmem>>, vector<1x256x768xbf16>
    %12 = vector.shape_cast %11 : vector<1x256x768xbf16> to vector<256x768xbf16>
    %c0_15 = arith.constant 0 : index
    %c0_16 = arith.constant 0 : index
    %c0_17 = arith.constant 0 : index
    %13 = vector.load %arg6[%c0_15, %c0_16, %c0_17] : memref<2x256x256xbf16, #tpu.memory_space<vmem>>, vector<1x256x256xbf16>
    %14 = vector.shape_cast %13 : vector<1x256x256xbf16> to vector<256x256xbf16>
    %c0_18 = arith.constant 0 : index
    %c0_19 = arith.constant 0 : index
    %c0_20 = arith.constant 0 : index
    %15 = vector.load %arg8[%c0_18, %c0_19, %c0_20] : memref<2x256x1024xbf16, #tpu.memory_space<vmem>>, vector<1x256x1024xbf16>
    %16 = vector.shape_cast %15 : vector<1x256x1024xbf16> to vector<256x1024xbf16>
    %c0_21 = arith.constant 0 : index
    %c0_22 = arith.constant 0 : index
    %c0_23 = arith.constant 0 : index
    %17 = vector.load %arg9[%c0_21, %c0_22, %c0_23] : memref<2x512x256xbf16, #tpu.memory_space<vmem>>, vector<1x512x256xbf16>
    %18 = vector.shape_cast %17 : vector<1x512x256xbf16> to vector<512x256xbf16>
    %19 = arith.mulf %1, %1 : vector<16x256xf32>
    %cst = arith.constant dense<0.000000e+00> : vector<16xf32>
    %20 = vector.multi_reduction <add>, %19, %cst [1] : vector<16x256xf32> to vector<16xf32>
    %21 = vector.shape_cast %20 : vector<16xf32> to vector<16x1xf32>
    %cst_24 = arith.constant 2.560000e+02 : f32
    %22 = vector.broadcast %cst_24 : f32 to vector<16x1xf32>
    %23 = arith.divf %21, %22 : vector<16x1xf32>
    %cst_25 = arith.constant 9.99999997E-7 : f32
    %24 = vector.broadcast %cst_25 : f32 to vector<16x1xf32>
    %25 = arith.addf %23, %24 : vector<16x1xf32>
    %26 = math.rsqrt %25 : vector<16x1xf32>
    %27 = vector.broadcast %26 : vector<16x1xf32> to vector<16x256xf32>
    %28 = arith.mulf %1, %27 : vector<16x256xf32>
    %29 = vector.broadcast %8 : vector<1x256xf32> to vector<16x256xf32>
    %30 = arith.mulf %28, %29 : vector<16x256xf32>
    %31 = arith.truncf %30 : vector<16x256xf32> to vector<16x256xbf16>
    %cst_26 = arith.constant dense<0.000000e+00> : vector<16x768xf32>
    %32 = tpu.matmul %31, %12, %cst_26 {dimension_numbers = #tpu.dot_dimension_numbers<[1], [0], [0], [1], [0, 0, 1, 1], [], []>} : vector<16x256xbf16>, vector<256x768xbf16>, vector<16x768xf32> -> vector<16x768xf32>
    %cst_27 = arith.constant 0.000000e+00 : f32
    %33 = vector.broadcast %cst_27 : f32 to vector<16x256xf32>
    %34 = vector.extract_strided_slice %32 {offsets = [0, 0], sizes = [16, 128], strides = [1, 1]} : vector<16x768xf32> to vector<16x128xf32>
    %35 = vector.extract_strided_slice %32 {offsets = [0, 256], sizes = [16, 128], strides = [1, 1]} : vector<16x768xf32> to vector<16x128xf32>
    %36 = vector.extract_strided_slice %32 {offsets = [0, 512], sizes = [16, 128], strides = [1, 1]} : vector<16x768xf32> to vector<16x128xf32>
    %37 = arith.mulf %34, %2 : vector<16x128xf32>
    %c64_i32 = arith.constant 64 : i32
    %38 = tpu.dynamic_rotate %34 by %c64_i32 dim 1 : vector<16x128xf32>, i32 -> vector<16x128xf32>
    %39 = arith.mulf %38, %3 : vector<16x128xf32>
    %40 = arith.addf %37, %39 : vector<16x128xf32>
    %41 = arith.mulf %35, %2 : vector<16x128xf32>
    %c64_i32_28 = arith.constant 64 : i32
    %42 = tpu.dynamic_rotate %35 by %c64_i32_28 dim 1 : vector<16x128xf32>, i32 -> vector<16x128xf32>
    %43 = arith.mulf %42, %3 : vector<16x128xf32>
    %44 = arith.addf %41, %43 : vector<16x128xf32>
    %45 = arith.truncf %40 : vector<16x128xf32> to vector<16x128xbf16>
    %46 = arith.truncf %44 : vector<16x128xf32> to vector<16x128xbf16>
    %47 = tpu.transpose %46, [1, 0] : vector<16x128xbf16> -> vector<128x16xbf16>
    %cst_29 = arith.constant dense<0.000000e+00> : vector<16x16xf32>
    %48 = tpu.matmul %45, %47, %cst_29 {dimension_numbers = #tpu.dot_dimension_numbers<[1], [0], [0], [1], [0, 0, 1, 1], [], []>} : vector<16x128xbf16>, vector<128x16xbf16>, vector<16x16xf32> -> vector<16x16xf32>
    %cst_30 = arith.constant 0.0883883461 : f32
    %49 = vector.broadcast %cst_30 : f32 to vector<16x16xf32>
    %50 = arith.mulf %48, %49 : vector<16x16xf32>
    %cst_31 = arith.constant 0xFF800000 : f32
    %51 = vector.broadcast %cst_31 : f32 to vector<16x16xf32>
    %52 = arith.select %6, %50, %51 : vector<16x16xi1>, vector<16x16xf32>
    %cst_32 = arith.constant dense<0xFF800000> : vector<16xf32>
    %53 = vector.multi_reduction <maximumf>, %52, %cst_32 [1] : vector<16x16xf32> to vector<16xf32>
    %54 = vector.shape_cast %53 : vector<16xf32> to vector<16x1xf32>
    %55 = vector.broadcast %54 : vector<16x1xf32> to vector<16x16xf32>
    %56 = arith.subf %52, %55 : vector<16x16xf32>
    %57 = math.exp %56 : vector<16x16xf32>
    %cst_33 = arith.constant dense<0.000000e+00> : vector<16xf32>
    %58 = vector.multi_reduction <add>, %57, %cst_33 [1] : vector<16x16xf32> to vector<16xf32>
    %59 = vector.shape_cast %58 : vector<16xf32> to vector<16x1xf32>
    %60 = tpu.reciprocal %59 {approx = true} : vector<16x1xf32> -> vector<16x1xf32>
    %61 = vector.broadcast %60 : vector<16x1xf32> to vector<16x16xf32>
    %62 = arith.mulf %57, %61 : vector<16x16xf32>
    %63 = arith.truncf %62 : vector<16x16xf32> to vector<16x16xbf16>
    %64 = arith.truncf %36 : vector<16x128xf32> to vector<16x128xbf16>
    %cst_34 = arith.constant dense<0.000000e+00> : vector<16x128xf32>
    %65 = tpu.matmul %63, %64, %cst_34 {dimension_numbers = #tpu.dot_dimension_numbers<[1], [0], [0], [1], [0, 0, 1, 1], [], []>} : vector<16x16xbf16>, vector<16x128xbf16>, vector<16x128xf32> -> vector<16x128xf32>
    %66 = arith.truncf %65 : vector<16x128xf32> to vector<16x128xbf16>
    %67 = vector.extract_strided_slice %14 {offsets = [0, 0], sizes = [128, 256], strides = [1, 1]} : vector<256x256xbf16> to vector<128x256xbf16>
    %cst_35 = arith.constant dense<0.000000e+00> : vector<16x256xf32>
    %68 = tpu.matmul %66, %67, %cst_35 {dimension_numbers = #tpu.dot_dimension_numbers<[1], [0], [0], [1], [0, 0, 1, 1], [], []>} : vector<16x128xbf16>, vector<128x256xbf16>, vector<16x256xf32> -> vector<16x256xf32>
    %69 = arith.addf %33, %68 : vector<16x256xf32>
    %70 = vector.extract_strided_slice %32 {offsets = [0, 128], sizes = [16, 128], strides = [1, 1]} : vector<16x768xf32> to vector<16x128xf32>
    %71 = vector.extract_strided_slice %32 {offsets = [0, 384], sizes = [16, 128], strides = [1, 1]} : vector<16x768xf32> to vector<16x128xf32>
    %72 = vector.extract_strided_slice %32 {offsets = [0, 640], sizes = [16, 128], strides = [1, 1]} : vector<16x768xf32> to vector<16x128xf32>
    %73 = arith.mulf %70, %2 : vector<16x128xf32>
    %c64_i32_36 = arith.constant 64 : i32
    %74 = tpu.dynamic_rotate %70 by %c64_i32_36 dim 1 : vector<16x128xf32>, i32 -> vector<16x128xf32>
    %75 = arith.mulf %74, %3 : vector<16x128xf32>
    %76 = arith.addf %73, %75 : vector<16x128xf32>
    %77 = arith.mulf %71, %2 : vector<16x128xf32>
    %c64_i32_37 = arith.constant 64 : i32
    %78 = tpu.dynamic_rotate %71 by %c64_i32_37 dim 1 : vector<16x128xf32>, i32 -> vector<16x128xf32>
    %79 = arith.mulf %78, %3 : vector<16x128xf32>
    %80 = arith.addf %77, %79 : vector<16x128xf32>
    %81 = arith.truncf %76 : vector<16x128xf32> to vector<16x128xbf16>
    %82 = arith.truncf %80 : vector<16x128xf32> to vector<16x128xbf16>
    %83 = tpu.transpose %82, [1, 0] : vector<16x128xbf16> -> vector<128x16xbf16>
    %cst_38 = arith.constant dense<0.000000e+00> : vector<16x16xf32>
    %84 = tpu.matmul %81, %83, %cst_38 {dimension_numbers = #tpu.dot_dimension_numbers<[1], [0], [0], [1], [0, 0, 1, 1], [], []>} : vector<16x128xbf16>, vector<128x16xbf16>, vector<16x16xf32> -> vector<16x16xf32>
    %cst_39 = arith.constant 0.0883883461 : f32
    %85 = vector.broadcast %cst_39 : f32 to vector<16x16xf32>
    %86 = arith.mulf %84, %85 : vector<16x16xf32>
    %cst_40 = arith.constant 0xFF800000 : f32
    %87 = vector.broadcast %cst_40 : f32 to vector<16x16xf32>
    %88 = arith.select %6, %86, %87 : vector<16x16xi1>, vector<16x16xf32>
    %cst_41 = arith.constant dense<0xFF800000> : vector<16xf32>
    %89 = vector.multi_reduction <maximumf>, %88, %cst_41 [1] : vector<16x16xf32> to vector<16xf32>
    %90 = vector.shape_cast %89 : vector<16xf32> to vector<16x1xf32>
    %91 = vector.broadcast %90 : vector<16x1xf32> to vector<16x16xf32>
    %92 = arith.subf %88, %91 : vector<16x16xf32>
    %93 = math.exp %92 : vector<16x16xf32>
    %cst_42 = arith.constant dense<0.000000e+00> : vector<16xf32>
    %94 = vector.multi_reduction <add>, %93, %cst_42 [1] : vector<16x16xf32> to vector<16xf32>
    %95 = vector.shape_cast %94 : vector<16xf32> to vector<16x1xf32>
    %96 = tpu.reciprocal %95 {approx = true} : vector<16x1xf32> -> vector<16x1xf32>
    %97 = vector.broadcast %96 : vector<16x1xf32> to vector<16x16xf32>
    %98 = arith.mulf %93, %97 : vector<16x16xf32>
    %99 = arith.truncf %98 : vector<16x16xf32> to vector<16x16xbf16>
    %100 = arith.truncf %72 : vector<16x128xf32> to vector<16x128xbf16>
    %cst_43 = arith.constant dense<0.000000e+00> : vector<16x128xf32>
    %101 = tpu.matmul %99, %100, %cst_43 {dimension_numbers = #tpu.dot_dimension_numbers<[1], [0], [0], [1], [0, 0, 1, 1], [], []>} : vector<16x16xbf16>, vector<16x128xbf16>, vector<16x128xf32> -> vector<16x128xf32>
    %102 = arith.truncf %101 : vector<16x128xf32> to vector<16x128xbf16>
    %103 = vector.extract_strided_slice %14 {offsets = [128, 0], sizes = [128, 256], strides = [1, 1]} : vector<256x256xbf16> to vector<128x256xbf16>
    %cst_44 = arith.constant dense<0.000000e+00> : vector<16x256xf32>
    %104 = tpu.matmul %102, %103, %cst_44 {dimension_numbers = #tpu.dot_dimension_numbers<[1], [0], [0], [1], [0, 0, 1, 1], [], []>} : vector<16x128xbf16>, vector<128x256xbf16>, vector<16x256xf32> -> vector<16x256xf32>
    %105 = arith.addf %69, %104 : vector<16x256xf32>
    %106 = arith.addf %1, %105 : vector<16x256xf32>
    %107 = arith.mulf %106, %106 : vector<16x256xf32>
    %cst_45 = arith.constant dense<0.000000e+00> : vector<16xf32>
    %108 = vector.multi_reduction <add>, %107, %cst_45 [1] : vector<16x256xf32> to vector<16xf32>
    %109 = vector.shape_cast %108 : vector<16xf32> to vector<16x1xf32>
    %cst_46 = arith.constant 2.560000e+02 : f32
    %110 = vector.broadcast %cst_46 : f32 to vector<16x1xf32>
    %111 = arith.divf %109, %110 : vector<16x1xf32>
    %cst_47 = arith.constant 9.99999997E-7 : f32
    %112 = vector.broadcast %cst_47 : f32 to vector<16x1xf32>
    %113 = arith.addf %111, %112 : vector<16x1xf32>
    %114 = math.rsqrt %113 : vector<16x1xf32>
    %115 = vector.broadcast %114 : vector<16x1xf32> to vector<16x256xf32>
    %116 = arith.mulf %106, %115 : vector<16x256xf32>
    %117 = vector.broadcast %10 : vector<1x256xf32> to vector<16x256xf32>
    %118 = arith.mulf %116, %117 : vector<16x256xf32>
    %119 = arith.truncf %118 : vector<16x256xf32> to vector<16x256xbf16>
    %cst_48 = arith.constant dense<0.000000e+00> : vector<16x1024xf32>
    %120 = tpu.matmul %119, %16, %cst_48 {dimension_numbers = #tpu.dot_dimension_numbers<[1], [0], [0], [1], [0, 0, 1, 1], [], []>} : vector<16x256xbf16>, vector<256x1024xbf16>, vector<16x1024xf32> -> vector<16x1024xf32>
    %121 = vector.extract_strided_slice %120 {offsets = [0, 0], sizes = [16, 512], strides = [1, 1]} : vector<16x1024xf32> to vector<16x512xf32>
    %122 = vector.extract_strided_slice %120 {offsets = [0, 512], sizes = [16, 512], strides = [1, 1]} : vector<16x1024xf32> to vector<16x512xf32>
    %123 = arith.negf %121 : vector<16x512xf32>
    %124 = math.exp %123 : vector<16x512xf32>
    %cst_49 = arith.constant 1.000000e+00 : f32
    %125 = vector.broadcast %cst_49 : f32 to vector<16x512xf32>
    %126 = arith.addf %125, %124 : vector<16x512xf32>
    %127 = arith.divf %125, %126 : vector<16x512xf32>
    %128 = arith.mulf %121, %127 : vector<16x512xf32>
    %129 = arith.mulf %128, %122 : vector<16x512xf32>
    %130 = arith.truncf %129 : vector<16x512xf32> to vector<16x512xbf16>
    %cst_50 = arith.constant dense<0.000000e+00> : vector<16x256xf32>
    %131 = tpu.matmul %130, %18, %cst_50 {dimension_numbers = #tpu.dot_dimension_numbers<[1], [0], [0], [1], [0, 0, 1, 1], [], []>} : vector<16x512xbf16>, vector<512x256xbf16>, vector<16x256xf32> -> vector<16x256xf32>
    %132 = arith.addf %106, %131 : vector<16x256xf32>
    %c1 = arith.constant 1 : index
    %c0_51 = arith.constant 0 : index
    %c0_52 = arith.constant 0 : index
    %133 = vector.load %arg4[%c1, %c0_51, %c0_52] : memref<2x1x256xf32, #tpu.memory_space<vmem>>, vector<1x1x256xf32>
    %134 = vector.shape_cast %133 : vector<1x1x256xf32> to vector<1x256xf32>
    %c1_53 = arith.constant 1 : index
    %c0_54 = arith.constant 0 : index
    %c0_55 = arith.constant 0 : index
    %135 = vector.load %arg7[%c1_53, %c0_54, %c0_55] : memref<2x1x256xf32, #tpu.memory_space<vmem>>, vector<1x1x256xf32>
    %136 = vector.shape_cast %135 : vector<1x1x256xf32> to vector<1x256xf32>
    %c1_56 = arith.constant 1 : index
    %c0_57 = arith.constant 0 : index
    %c0_58 = arith.constant 0 : index
    %137 = vector.load %arg5[%c1_56, %c0_57, %c0_58] : memref<2x256x768xbf16, #tpu.memory_space<vmem>>, vector<1x256x768xbf16>
    %138 = vector.shape_cast %137 : vector<1x256x768xbf16> to vector<256x768xbf16>
    %c1_59 = arith.constant 1 : index
    %c0_60 = arith.constant 0 : index
    %c0_61 = arith.constant 0 : index
    %139 = vector.load %arg6[%c1_59, %c0_60, %c0_61] : memref<2x256x256xbf16, #tpu.memory_space<vmem>>, vector<1x256x256xbf16>
    %140 = vector.shape_cast %139 : vector<1x256x256xbf16> to vector<256x256xbf16>
    %c1_62 = arith.constant 1 : index
    %c0_63 = arith.constant 0 : index
    %c0_64 = arith.constant 0 : index
    %141 = vector.load %arg8[%c1_62, %c0_63, %c0_64] : memref<2x256x1024xbf16, #tpu.memory_space<vmem>>, vector<1x256x1024xbf16>
    %142 = vector.shape_cast %141 : vector<1x256x1024xbf16> to vector<256x1024xbf16>
    %c1_65 = arith.constant 1 : index
    %c0_66 = arith.constant 0 : index
    %c0_67 = arith.constant 0 : index
    %143 = vector.load %arg9[%c1_65, %c0_66, %c0_67] : memref<2x512x256xbf16, #tpu.memory_space<vmem>>, vector<1x512x256xbf16>
    %144 = vector.shape_cast %143 : vector<1x512x256xbf16> to vector<512x256xbf16>
    %145 = arith.mulf %132, %132 : vector<16x256xf32>
    %cst_68 = arith.constant dense<0.000000e+00> : vector<16xf32>
    %146 = vector.multi_reduction <add>, %145, %cst_68 [1] : vector<16x256xf32> to vector<16xf32>
    %147 = vector.shape_cast %146 : vector<16xf32> to vector<16x1xf32>
    %cst_69 = arith.constant 2.560000e+02 : f32
    %148 = vector.broadcast %cst_69 : f32 to vector<16x1xf32>
    %149 = arith.divf %147, %148 : vector<16x1xf32>
    %cst_70 = arith.constant 9.99999997E-7 : f32
    %150 = vector.broadcast %cst_70 : f32 to vector<16x1xf32>
    %151 = arith.addf %149, %150 : vector<16x1xf32>
    %152 = math.rsqrt %151 : vector<16x1xf32>
    %153 = vector.broadcast %152 : vector<16x1xf32> to vector<16x256xf32>
    %154 = arith.mulf %132, %153 : vector<16x256xf32>
    %155 = vector.broadcast %134 : vector<1x256xf32> to vector<16x256xf32>
    %156 = arith.mulf %154, %155 : vector<16x256xf32>
    %157 = arith.truncf %156 : vector<16x256xf32> to vector<16x256xbf16>
    %cst_71 = arith.constant dense<0.000000e+00> : vector<16x768xf32>
    %158 = tpu.matmul %157, %138, %cst_71 {dimension_numbers = #tpu.dot_dimension_numbers<[1], [0], [0], [1], [0, 0, 1, 1], [], []>} : vector<16x256xbf16>, vector<256x768xbf16>, vector<16x768xf32> -> vector<16x768xf32>
    %cst_72 = arith.constant 0.000000e+00 : f32
    %159 = vector.broadcast %cst_72 : f32 to vector<16x256xf32>
    %160 = vector.extract_strided_slice %158 {offsets = [0, 0], sizes = [16, 128], strides = [1, 1]} : vector<16x768xf32> to vector<16x128xf32>
    %161 = vector.extract_strided_slice %158 {offsets = [0, 256], sizes = [16, 128], strides = [1, 1]} : vector<16x768xf32> to vector<16x128xf32>
    %162 = vector.extract_strided_slice %158 {offsets = [0, 512], sizes = [16, 128], strides = [1, 1]} : vector<16x768xf32> to vector<16x128xf32>
    %163 = arith.mulf %160, %2 : vector<16x128xf32>
    %c64_i32_73 = arith.constant 64 : i32
    %164 = tpu.dynamic_rotate %160 by %c64_i32_73 dim 1 : vector<16x128xf32>, i32 -> vector<16x128xf32>
    %165 = arith.mulf %164, %3 : vector<16x128xf32>
    %166 = arith.addf %163, %165 : vector<16x128xf32>
    %167 = arith.mulf %161, %2 : vector<16x128xf32>
    %c64_i32_74 = arith.constant 64 : i32
    %168 = tpu.dynamic_rotate %161 by %c64_i32_74 dim 1 : vector<16x128xf32>, i32 -> vector<16x128xf32>
    %169 = arith.mulf %168, %3 : vector<16x128xf32>
    %170 = arith.addf %167, %169 : vector<16x128xf32>
    %171 = arith.truncf %166 : vector<16x128xf32> to vector<16x128xbf16>
    %172 = arith.truncf %170 : vector<16x128xf32> to vector<16x128xbf16>
    %173 = tpu.transpose %172, [1, 0] : vector<16x128xbf16> -> vector<128x16xbf16>
    %cst_75 = arith.constant dense<0.000000e+00> : vector<16x16xf32>
    %174 = tpu.matmul %171, %173, %cst_75 {dimension_numbers = #tpu.dot_dimension_numbers<[1], [0], [0], [1], [0, 0, 1, 1], [], []>} : vector<16x128xbf16>, vector<128x16xbf16>, vector<16x16xf32> -> vector<16x16xf32>
    %cst_76 = arith.constant 0.0883883461 : f32
    %175 = vector.broadcast %cst_76 : f32 to vector<16x16xf32>
    %176 = arith.mulf %174, %175 : vector<16x16xf32>
    %cst_77 = arith.constant 0xFF800000 : f32
    %177 = vector.broadcast %cst_77 : f32 to vector<16x16xf32>
    %178 = arith.select %6, %176, %177 : vector<16x16xi1>, vector<16x16xf32>
    %cst_78 = arith.constant dense<0xFF800000> : vector<16xf32>
    %179 = vector.multi_reduction <maximumf>, %178, %cst_78 [1] : vector<16x16xf32> to vector<16xf32>
    %180 = vector.shape_cast %179 : vector<16xf32> to vector<16x1xf32>
    %181 = vector.broadcast %180 : vector<16x1xf32> to vector<16x16xf32>
    %182 = arith.subf %178, %181 : vector<16x16xf32>
    %183 = math.exp %182 : vector<16x16xf32>
    %cst_79 = arith.constant dense<0.000000e+00> : vector<16xf32>
    %184 = vector.multi_reduction <add>, %183, %cst_79 [1] : vector<16x16xf32> to vector<16xf32>
    %185 = vector.shape_cast %184 : vector<16xf32> to vector<16x1xf32>
    %186 = tpu.reciprocal %185 {approx = true} : vector<16x1xf32> -> vector<16x1xf32>
    %187 = vector.broadcast %186 : vector<16x1xf32> to vector<16x16xf32>
    %188 = arith.mulf %183, %187 : vector<16x16xf32>
    %189 = arith.truncf %188 : vector<16x16xf32> to vector<16x16xbf16>
    %190 = arith.truncf %162 : vector<16x128xf32> to vector<16x128xbf16>
    %cst_80 = arith.constant dense<0.000000e+00> : vector<16x128xf32>
    %191 = tpu.matmul %189, %190, %cst_80 {dimension_numbers = #tpu.dot_dimension_numbers<[1], [0], [0], [1], [0, 0, 1, 1], [], []>} : vector<16x16xbf16>, vector<16x128xbf16>, vector<16x128xf32> -> vector<16x128xf32>
    %192 = arith.truncf %191 : vector<16x128xf32> to vector<16x128xbf16>
    %193 = vector.extract_strided_slice %140 {offsets = [0, 0], sizes = [128, 256], strides = [1, 1]} : vector<256x256xbf16> to vector<128x256xbf16>
    %cst_81 = arith.constant dense<0.000000e+00> : vector<16x256xf32>
    %194 = tpu.matmul %192, %193, %cst_81 {dimension_numbers = #tpu.dot_dimension_numbers<[1], [0], [0], [1], [0, 0, 1, 1], [], []>} : vector<16x128xbf16>, vector<128x256xbf16>, vector<16x256xf32> -> vector<16x256xf32>
    %195 = arith.addf %159, %194 : vector<16x256xf32>
    %196 = vector.extract_strided_slice %158 {offsets = [0, 128], sizes = [16, 128], strides = [1, 1]} : vector<16x768xf32> to vector<16x128xf32>
    %197 = vector.extract_strided_slice %158 {offsets = [0, 384], sizes = [16, 128], strides = [1, 1]} : vector<16x768xf32> to vector<16x128xf32>
    %198 = vector.extract_strided_slice %158 {offsets = [0, 640], sizes = [16, 128], strides = [1, 1]} : vector<16x768xf32> to vector<16x128xf32>
    %199 = arith.mulf %196, %2 : vector<16x128xf32>
    %c64_i32_82 = arith.constant 64 : i32
    %200 = tpu.dynamic_rotate %196 by %c64_i32_82 dim 1 : vector<16x128xf32>, i32 -> vector<16x128xf32>
    %201 = arith.mulf %200, %3 : vector<16x128xf32>
    %202 = arith.addf %199, %201 : vector<16x128xf32>
    %203 = arith.mulf %197, %2 : vector<16x128xf32>
    %c64_i32_83 = arith.constant 64 : i32
    %204 = tpu.dynamic_rotate %197 by %c64_i32_83 dim 1 : vector<16x128xf32>, i32 -> vector<16x128xf32>
    %205 = arith.mulf %204, %3 : vector<16x128xf32>
    %206 = arith.addf %203, %205 : vector<16x128xf32>
    %207 = arith.truncf %202 : vector<16x128xf32> to vector<16x128xbf16>
    %208 = arith.truncf %206 : vector<16x128xf32> to vector<16x128xbf16>
    %209 = tpu.transpose %208, [1, 0] : vector<16x128xbf16> -> vector<128x16xbf16>
    %cst_84 = arith.constant dense<0.000000e+00> : vector<16x16xf32>
    %210 = tpu.matmul %207, %209, %cst_84 {dimension_numbers = #tpu.dot_dimension_numbers<[1], [0], [0], [1], [0, 0, 1, 1], [], []>} : vector<16x128xbf16>, vector<128x16xbf16>, vector<16x16xf32> -> vector<16x16xf32>
    %cst_85 = arith.constant 0.0883883461 : f32
    %211 = vector.broadcast %cst_85 : f32 to vector<16x16xf32>
    %212 = arith.mulf %210, %211 : vector<16x16xf32>
    %cst_86 = arith.constant 0xFF800000 : f32
    %213 = vector.broadcast %cst_86 : f32 to vector<16x16xf32>
    %214 = arith.select %6, %212, %213 : vector<16x16xi1>, vector<16x16xf32>
    %cst_87 = arith.constant dense<0xFF800000> : vector<16xf32>
    %215 = vector.multi_reduction <maximumf>, %214, %cst_87 [1] : vector<16x16xf32> to vector<16xf32>
    %216 = vector.shape_cast %215 : vector<16xf32> to vector<16x1xf32>
    %217 = vector.broadcast %216 : vector<16x1xf32> to vector<16x16xf32>
    %218 = arith.subf %214, %217 : vector<16x16xf32>
    %219 = math.exp %218 : vector<16x16xf32>
    %cst_88 = arith.constant dense<0.000000e+00> : vector<16xf32>
    %220 = vector.multi_reduction <add>, %219, %cst_88 [1] : vector<16x16xf32> to vector<16xf32>
    %221 = vector.shape_cast %220 : vector<16xf32> to vector<16x1xf32>
    %222 = tpu.reciprocal %221 {approx = true} : vector<16x1xf32> -> vector<16x1xf32>
    %223 = vector.broadcast %222 : vector<16x1xf32> to vector<16x16xf32>
    %224 = arith.mulf %219, %223 : vector<16x16xf32>
    %225 = arith.truncf %224 : vector<16x16xf32> to vector<16x16xbf16>
    %226 = arith.truncf %198 : vector<16x128xf32> to vector<16x128xbf16>
    %cst_89 = arith.constant dense<0.000000e+00> : vector<16x128xf32>
    %227 = tpu.matmul %225, %226, %cst_89 {dimension_numbers = #tpu.dot_dimension_numbers<[1], [0], [0], [1], [0, 0, 1, 1], [], []>} : vector<16x16xbf16>, vector<16x128xbf16>, vector<16x128xf32> -> vector<16x128xf32>
    %228 = arith.truncf %227 : vector<16x128xf32> to vector<16x128xbf16>
    %229 = vector.extract_strided_slice %140 {offsets = [128, 0], sizes = [128, 256], strides = [1, 1]} : vector<256x256xbf16> to vector<128x256xbf16>
    %cst_90 = arith.constant dense<0.000000e+00> : vector<16x256xf32>
    %230 = tpu.matmul %228, %229, %cst_90 {dimension_numbers = #tpu.dot_dimension_numbers<[1], [0], [0], [1], [0, 0, 1, 1], [], []>} : vector<16x128xbf16>, vector<128x256xbf16>, vector<16x256xf32> -> vector<16x256xf32>
    %231 = arith.addf %195, %230 : vector<16x256xf32>
    %232 = arith.addf %132, %231 : vector<16x256xf32>
    %233 = arith.mulf %232, %232 : vector<16x256xf32>
    %cst_91 = arith.constant dense<0.000000e+00> : vector<16xf32>
    %234 = vector.multi_reduction <add>, %233, %cst_91 [1] : vector<16x256xf32> to vector<16xf32>
    %235 = vector.shape_cast %234 : vector<16xf32> to vector<16x1xf32>
    %cst_92 = arith.constant 2.560000e+02 : f32
    %236 = vector.broadcast %cst_92 : f32 to vector<16x1xf32>
    %237 = arith.divf %235, %236 : vector<16x1xf32>
    %cst_93 = arith.constant 9.99999997E-7 : f32
    %238 = vector.broadcast %cst_93 : f32 to vector<16x1xf32>
    %239 = arith.addf %237, %238 : vector<16x1xf32>
    %240 = math.rsqrt %239 : vector<16x1xf32>
    %241 = vector.broadcast %240 : vector<16x1xf32> to vector<16x256xf32>
    %242 = arith.mulf %232, %241 : vector<16x256xf32>
    %243 = vector.broadcast %136 : vector<1x256xf32> to vector<16x256xf32>
    %244 = arith.mulf %242, %243 : vector<16x256xf32>
    %245 = arith.truncf %244 : vector<16x256xf32> to vector<16x256xbf16>
    %cst_94 = arith.constant dense<0.000000e+00> : vector<16x1024xf32>
    %246 = tpu.matmul %245, %142, %cst_94 {dimension_numbers = #tpu.dot_dimension_numbers<[1], [0], [0], [1], [0, 0, 1, 1], [], []>} : vector<16x256xbf16>, vector<256x1024xbf16>, vector<16x1024xf32> -> vector<16x1024xf32>
    %247 = vector.extract_strided_slice %246 {offsets = [0, 0], sizes = [16, 512], strides = [1, 1]} : vector<16x1024xf32> to vector<16x512xf32>
    %248 = vector.extract_strided_slice %246 {offsets = [0, 512], sizes = [16, 512], strides = [1, 1]} : vector<16x1024xf32> to vector<16x512xf32>
    %249 = arith.negf %247 : vector<16x512xf32>
    %250 = math.exp %249 : vector<16x512xf32>
    %cst_95 = arith.constant 1.000000e+00 : f32
    %251 = vector.broadcast %cst_95 : f32 to vector<16x512xf32>
    %252 = arith.addf %251, %250 : vector<16x512xf32>
    %253 = arith.divf %251, %252 : vector<16x512xf32>
    %254 = arith.mulf %247, %253 : vector<16x512xf32>
    %255 = arith.mulf %254, %248 : vector<16x512xf32>
    %256 = arith.truncf %255 : vector<16x512xf32> to vector<16x512xbf16>
    %cst_96 = arith.constant dense<0.000000e+00> : vector<16x256xf32>
    %257 = tpu.matmul %256, %144, %cst_96 {dimension_numbers = #tpu.dot_dimension_numbers<[1], [0], [0], [1], [0, 0, 1, 1], [], []>} : vector<16x512xbf16>, vector<512x256xbf16>, vector<16x256xf32> -> vector<16x256xf32>
    %258 = arith.addf %232, %257 : vector<16x256xf32>
    %c0_97 = arith.constant 0 : index
    %c0_98 = arith.constant 0 : index
    %c0_99 = arith.constant 0 : index
    %259 = vector.load %arg10[%c0_97, %c0_98, %c0_99] : memref<1x16x256xf32, #tpu.memory_space<vmem>>, vector<1x16x256xf32>
    %260 = vector.shape_cast %259 : vector<1x16x256xf32> to vector<16x256xf32>
    %261 = vector.shape_cast %258 : vector<16x256xf32> to vector<1x16x256xf32>
    tpu.vector_store %arg10[%c0_97, %c0_98, %c0_99], %261 {strides = array<i32>} : memref<1x16x256xf32, #tpu.memory_space<vmem>>, vector<1x16x256xf32>,
    return
  }
  func.func @transform_0(%arg0: i32) -> (i32, i32, i32) {
    %c0_i32 = arith.constant 0 : i32
    %c0_i32_0 = arith.constant 0 : i32
    %c0_i32_1 = arith.constant 0 : i32
    return %arg0, %c0_i32, %c0_i32_0 : i32, i32, i32
  }
  func.func @transform_1(%arg0: i32) -> (i32, i32) {
    %c0_i32 = arith.constant 0 : i32
    %c0_i32_0 = arith.constant 0 : i32
    %c0_i32_1 = arith.constant 0 : i32
    return %c0_i32, %c0_i32_0 : i32, i32
  }
  func.func @transform_2(%arg0: i32) -> (i32, i32) {
    %c0_i32 = arith.constant 0 : i32
    %c0_i32_0 = arith.constant 0 : i32
    %c0_i32_1 = arith.constant 0 : i32
    return %c0_i32, %c0_i32_0 : i32, i32
  }
  func.func @transform_3(%arg0: i32) -> (i32, i32, i32) {
    %c0_i32 = arith.constant 0 : i32
    %c0_i32_0 = arith.constant 0 : i32
    %c0_i32_1 = arith.constant 0 : i32
    %c0_i32_2 = arith.constant 0 : i32
    return %c0_i32, %c0_i32_0, %c0_i32_1 : i32, i32, i32
  }
  func.func @transform_4(%arg0: i32) -> (i32, i32, i32) {
    %c0_i32 = arith.constant 0 : i32
    %c0_i32_0 = arith.constant 0 : i32
    %c0_i32_1 = arith.constant 0 : i32
    %c0_i32_2 = arith.constant 0 : i32
    return %c0_i32, %c0_i32_0, %c0_i32_1 : i32, i32, i32
  }
  func.func @transform_5(%arg0: i32) -> (i32, i32, i32) {
    %c0_i32 = arith.constant 0 : i32
    %c0_i32_0 = arith.constant 0 : i32
    %c0_i32_1 = arith.constant 0 : i32
    %c0_i32_2 = arith.constant 0 : i32
    return %c0_i32, %c0_i32_0, %c0_i32_1 : i32, i32, i32
  }
  func.func @transform_6(%arg0: i32) -> (i32, i32, i32) {
    %c0_i32 = arith.constant 0 : i32
    %c0_i32_0 = arith.constant 0 : i32
    %c0_i32_1 = arith.constant 0 : i32
    %c0_i32_2 = arith.constant 0 : i32
    return %c0_i32, %c0_i32_0, %c0_i32_1 : i32, i32, i32
  }
  func.func @transform_7(%arg0: i32) -> (i32, i32, i32) {
    %c0_i32 = arith.constant 0 : i32
    %c0_i32_0 = arith.constant 0 : i32
    %c0_i32_1 = arith.constant 0 : i32
    %c0_i32_2 = arith.constant 0 : i32
    return %c0_i32, %c0_i32_0, %c0_i32_1 : i32, i32, i32
  }
  func.func @transform_8(%arg0: i32) -> (i32, i32, i32) {
    %c0_i32 = arith.constant 0 : i32
    %c0_i32_0 = arith.constant 0 : i32
    %c0_i32_1 = arith.constant 0 : i32
    %c0_i32_2 = arith.constant 0 : i32
    return %c0_i32, %c0_i32_0, %c0_i32_1 : i32, i32, i32
  }
  func.func @transform_9(%arg0: i32) -> (i32, i32, i32) {
    %c0_i32 = arith.constant 0 : i32
    %c0_i32_0 = arith.constant 0 : i32
    %c0_i32_1 = arith.constant 0 : i32
    return %arg0, %c0_i32, %c0_i32_0 : i32, i32, i32
  }
}

</mosaic_0001>

<bundles_post_ra>
// kernel: tpu_custom_call.1
= control target key start
LH: loop header
LB: loop body
LE: loop exit
PB: predicated region body
PF: predicated region fallthrough
CT: control target
= control target key end

     0   :  { %s8734_s0 = inlined_call_operand.hbm [shape: f32[2,16,256], index: 0, kind: input, shape index: {}, may-alias: {0,9}]   ;;  %s8735_s1 = inlined_call_operand.vmem [shape: f32[16,128], index: 1, kind: input, shape index: {}]   ;;  %s8736_s2 = inlined_call_operand.vmem [shape: f32[16,128], index: 2, kind: input, shape index: {}]   ;;  %s8737_s3 = inlined_call_operand.vmem [shape: f32[2,1,256], index: 3, kind: input, shape index: {}]   ;;  %s8738_s4 = inlined_call_operand.hbm [shape: bf16[2,256,768], index: 4, kind: input, shape index: {}]   ;;  %s8739_s5 = inlined_call_operand.hbm [shape: bf16[2,256,256], index: 5, kind: input, shape index: {}]   ;;  %s8740_s6 = inlined_call_operand.vmem [shape: f32[2,1,256], index: 6, kind: input, shape index: {}]   ;;  %s8741_s7 = inlined_call_operand.hbm [shape: bf16[2,256,1024], index: 7, kind: input, shape index: {}]   ;;  %s8742_s8 = inlined_call_operand.hbm [shape: bf16[2,512,256], index: 8, kind: input, shape index: {}]   ;;  %s8743_s9 = inlined_call_operand.hbm [shape: f32[2,16,256], index: 9, kind: output, shape index: {}, may-alias: {0,9}]  }
   0x1   :  { %8749 = sst [smem:[#allocation18_spill]] %s8738_s4 }
   0x2   :  { %14 = vsyncpa [#allocation3], 0 }
   0x3   :  { %16 = vsyncpa [#allocation3 + $0x1], 0 }
   0x4   :  { %17 = vsyncpa [#allocation6], 0 }
   0x5   :  { %18 = vsyncpa [#allocation9], 0 }
   0x6   :  { %19 = vsyncpa [#allocation4], 0 }
   0x7   :  { %21 = vsyncpa [#allocation4 + $0x1], 0  ;;  %s8047_s30 = smov 0   ;;  %s8049_s10 = smov 0  }
   0x8   :  { %s8051_s11 = smov 0   ;;  %s8053_s12 = smov 0  }
   0x9 LB: > { %8750 = sst [smem:[#allocation16_spill]] %s7963_s30  ;;  %s8068_s13 = sadd.s32 4294967295, %s7975_s12   ;;  %s7975_s12 = sphi %s8053_s12, %s8774_s12   ;;  %s7971_s11 = sphi %s8051_s11, %s8773_s11   ;;  %s7967_s10 = sphi %s8049_s10, %s8772_s10   ;;  %s7963_s30 = sphi %s8047_s30, %s8771_s30  }
   0xa   : > { %s6196_s14 = sadd.s32 4294967294, %s7975_s12   ;;  %p47_p0 = scmp.ne.s32.totalorder %s7967_s10, %s7963_s30 }
   0xb   : > { %p8744_p1 = scmp.eq.s32.totalorder %s8068_s13, 0  ;;  %p245_p3 = scmp.eq.s32.totalorder %s6196_s14, 1 }
   0xc   : > { %p6197_p5 = scmp.ge.s32.totalorder %s7975_s12, 1  ;;  %p252_p7 = scmp.lt.s32.totalorder %s7975_s12, 3 }
   0xd   : > { %p8077_p4 = por %p8744_p1, %p47_p0  ;;  %p8082_p6 = por %p245_p3, %p47_p0 }
   0xe   : > { %p8087_p8 = pnand %p6197_p5, %p252_p7  ;;  %s7977_s18 = smov [#allocation5]  }
   0xf   : > { %s8751_s15 = scalar_select %p8077_p4, 1, 0 }
  0x10   : > { %s8752_s16 = scalar_select %p8082_p6, 1, 0 }
  0x11   : > { %s8754_s17 = scalar_select %p8087_p8, 1, 0 }
  0x12   : > { %8753 = sst [smem:[#allocation17_spill]] %s8752_s16  ;;  %s273_s19 = sshll.u32 %s7977_s18, 4  ;;  %s8091_s19 = int_to_ptr.vmem [resolvable:$true] %s273_s19 }
  0x13   : > { %p6982_p9 = pneg %p8087_p8  ;;  %s7978_s21 = smov [#allocation8]  }
  0x14   : > { %s302_s22 = sshll.u32 %s7978_s21, 4  ;;  %s8756_s4 = sld [smem:[#allocation18_spill]]  ;;  %s8102_s22 = int_to_ptr.vmem [resolvable:$true] %s302_s22 }
  0x15   : > { %p8098_p11 = pnand %p6982_p9, %p8744_p1 }
  0x17   : > { %p8112_p13 = pneg %p8098_p11 }
  0x1a   : > { %s7759_s25 = scalar_lea.hbm %s8756_s4, 24576 }
  0x1b   : > { %p7760_p12 = scmp.ne.s32.totalorder %s8756_s4, %s7759_s25  ;;  %p7766_p5 = scmp.lt.u32.totalorder %s7759_s25, %s8756_s4 }
  0x1d   : > { %p7762_p0 = pnand %p8112_p13, %p7760_p12 }
  0x1f   : > { %p7763_p3 = pneg %p7762_p0 }
  0x21   : > { %p7768_p7 = pnand %p7766_p5, %p7763_p3 }
  0x23   : > { %7771 = shalt.err (!%p7768_p7)
}
  0x24   : > { %s7772_s18 = scalar_lea.vmem %s8091_s19, 24576  ;;  %p7780_p2 = scmp.lt.s32.totalorder %s8091_s19, %s8091_s19 }
  0x25   : > { %p7773_p9 = scmp.ne.s32.totalorder %s8091_s19, %s7772_s18  ;;  %p7781_p6 = scmp.lt.s32.totalorder %s7772_s18, %s7772_s18 }
  0x27   : > { %p7775_p10 = pnand %p7773_p9, %p8112_p13  ;;  %p7782_p12 = por %p7781_p6, %p7780_p2 }
  0x29   : > { %p7776_p1 = pneg %p7775_p10 }
  0x2b   : > { %p7783_p0 = pnand %p7782_p12, %p7776_p1 }
  0x2d   : > { %7786 = shalt.err (!%p7783_p0)
}
  0x2e   : > { %s7979_s21 = smov 384   ;;  %s7980_s23 = smov 24  }
  0x2f   : > { %6985 = dma.hbm_to_vmem [thread:$0]  (!%p8098_p11), %s8756_s4, 24576, %s8091_s19, [#allocation6], %s7979_s21, %s7979_s21, %s7980_s23  }
  0x30   : > { %s7787_s29 = scalar_lea.hbm %s8741_s7, 32768 }
  0x31   : > { %p7788_p2 = scmp.ne.s32.totalorder %s8741_s7, %s7787_s29  ;;  %p7794_p10 = scmp.lt.u32.totalorder %s7787_s29, %s8741_s7 }
  0x33   : > { %p7790_p1 = pnand %p7788_p2, %p8112_p13 }
  0x35   : > { %p7791_p6 = pneg %p7790_p1 }
  0x37   : > { %p7796_p3 = pnand %p7794_p10, %p7791_p6 }
  0x39   : > { %7799 = shalt.err (!%p7796_p3)
}
  0x3a   : > { %s7800_s19 = scalar_lea.vmem %s8102_s22, 32768  ;;  %p7808_p12 = scmp.lt.s32.totalorder %s8102_s22, %s8102_s22 }
  0x3b   : > { %p7801_p5 = scmp.ne.s32.totalorder %s8102_s22, %s7800_s19  ;;  %p7809_p0 = scmp.lt.s32.totalorder %s7800_s19, %s7800_s19 }
  0x3d   : > { %p7803_p7 = pnand %p7801_p5, %p8112_p13  ;;  %p7810_p2 = por %p7809_p0, %p7808_p12 }
  0x3f   : > { %p7804_p9 = pneg %p7803_p7 }
  0x41   : > { %p7811_p1 = pnand %p7810_p2, %p7804_p9 }
  0x43   : > { %7814 = shalt.err (!%p7811_p1)
}
  0x44   : > { %s7981_s16 = smov 512   ;;  %s7982_s30 = smov 32  }
  0x45   : > { %6991 = dma.hbm_to_vmem [thread:$0]  (!%p8098_p11), %s8741_s7, 32768, %s8102_s22, [#allocation9], %s7981_s16, %s7981_s16, %s7982_s30  }
  0x46   : > { %s7983_s24 = smov [#allocation7]   ;;  %s7815_s29 = scalar_lea.hbm %s8739_s5, 8192 }
  0x47   : > { %s286_s25 = sshll.u32 %s7983_s24, 4  ;;  %p7816_p6 = scmp.ne.s32.totalorder %s8739_s5, %s7815_s29  ;;  %s287_s25 = int_to_ptr.vmem [resolvable:$true] %s286_s25 }
  0x48   : > { %p7822_p5 = scmp.lt.u32.totalorder %s7815_s29, %s8739_s5 }
  0x49   : > { %p7818_p10 = pnand %p7816_p6, %p8112_p13 }
  0x4b   : > { %p7819_p3 = pneg %p7818_p10 }
  0x4d   : > { %p7824_p7 = pnand %p7822_p5, %p7819_p3 }
  0x4f   : > { %7827 = shalt.err (!%p7824_p7)
}
  0x50   : > { %s7828_s22 = scalar_lea.vmem %s287_s25, 8192  ;;  %p7836_p2 = scmp.lt.s32.totalorder %s287_s25, %s287_s25 }
  0x51   : > { %p7829_p9 = scmp.ne.s32.totalorder %s287_s25, %s7828_s22  ;;  %p7837_p1 = scmp.lt.s32.totalorder %s7828_s22, %s7828_s22 }
  0x53   : > { %p7831_p12 = pnand %p7829_p9, %p8112_p13  ;;  %p7838_p4 = por %p7837_p1, %p7836_p2 }
  0x55   : > { %p7832_p0 = pneg %p7831_p12 }
  0x57   : > { %p7839_p8 = pnand %p7838_p4, %p7832_p0 }
  0x59   : > { %7842 = shalt.err (!%p7839_p8)
}
  0x5a   : > { %s7984_s16 = smov 128   ;;  %s7985_s30 = smov 8  }
  0x5b   : > { %6988 = dma.hbm_to_vmem [thread:$0]  (!%p8098_p11), %s8739_s5, 8192, %s287_s25, [#allocation6], %s7984_s16, %s7984_s16, %s7985_s30  }
  0x5c   : > { %s7986_s23 = smov [#allocation10]   ;;  %s7843_s29 = scalar_lea.hbm %s8742_s8, 16384 }
  0x5d   : > { %s315_s24 = sshll.u32 %s7986_s23, 4  ;;  %p7844_p4 = scmp.ne.s32.totalorder %s8742_s8, %s7843_s29  ;;  %s316_s24 = int_to_ptr.vmem [resolvable:$true] %s315_s24 }
  0x5e   : > { %p7850_p10 = scmp.lt.u32.totalorder %s7843_s29, %s8742_s8 }
  0x5f   : > { %p7846_p8 = pnand %p7844_p4, %p8112_p13 }
  0x61   : > { %p7847_p6 = pneg %p7846_p8 }
  0x63   : > { %p7852_p3 = pnand %p7850_p10, %p7847_p6 }
  0x65   : > { %7855 = shalt.err (!%p7852_p3)
}
  0x66   : > { %s7856_s25 = scalar_lea.vmem %s316_s24, 16384  ;;  %p7864_p12 = scmp.lt.s32.totalorder %s316_s24, %s316_s24 }
  0x67   : > { %p7857_p5 = scmp.ne.s32.totalorder %s316_s24, %s7856_s25  ;;  %p7865_p0 = scmp.lt.s32.totalorder %s7856_s25, %s7856_s25 }
  0x69   : > { %p7859_p7 = pnand %p7857_p5, %p8112_p13  ;;  %p7866_p2 = por %p7865_p0, %p7864_p12 }
  0x6b   : > { %p7860_p9 = pneg %p7859_p7 }
  0x6d   : > { %p7867_p1 = pnand %p7866_p2, %p7860_p9 }
  0x6f   : > { %7870 = shalt.err (!%p7867_p1)
}
  0x70   : > { %6994 = dma.hbm_to_vmem [thread:$0]  (!%p8098_p11), %s8742_s8, 16384, %s316_s24, [#allocation9], %s7984_s16, %s7984_s16, %s7985_s30  }
  0x71   : > { %s8193_s28 = sadd.s32 1, %s7975_s12   ;;  %s34_s23 = sadd.s32 1, %s7971_s11 }
  0x72   : > { %s31_s20 = ssub.s32 %s7975_s12, %s8193_s28  ;;  %p41_p13 = scmp.ne.s32.totalorder %s7971_s11, %s7967_s10 }
  0x73   : > { %p32_p4 = scmp.eq.s32.totalorder %s31_s20, 0  ;;  %p42_p8 = scmp.eq.s32.totalorder %s7975_s12, 0 }
  0x74   : > { %p8758_p6 = scmp.eq.s32.totalorder %s8068_s13, 1  ;;  %p7007_p3 = scmp.lt.s32.totalorder %s7975_s12, 2 }
  0x75   : > { %s8209_s27 = scalar_select %p32_p4, %s7971_s11, %s34_s23  }
  0x76   : > { %p8203_p10 = por %p8758_p6, %p41_p13  ;;  %p43_p5 = por %p42_p8, %p41_p13 }
  0x77   : > { %s329_s29 = sand.u32 1, %s7971_s11   ;;  %s6880_s16 = sshll.u32 %s7975_s12, 9 }
  0x78   : > { %s6203_s14 = sshll.u32 %s329_s29, 5  ;;  %s8216_s18 = scalar_lea.hbm %s8734_s0, %s6880_s16 }
  0x79   : > { %s333_s19 = scalar_lea.vmem [#allocation2], %s6203_s14  ;;  %p8220_p11 = pnand %p7007_p3, %p43_p5 }
  0x7a   : > { %s340_s22 = sshll.u32 %s333_s19, 4  ;;  %s8224_s4 = scalar_lea.sflag [#allocation3], %s329_s29  ;;  %s8218_s22 = int_to_ptr.vmem [resolvable:$true] %s340_s22 }
  0x7b   : > { %s7871_s21 = scalar_lea.hbm %s8216_s18, 512  ;;  %p7873_p9 = pneg %p8220_p11 }
  0x7c   : > { %p7872_p7 = scmp.ne.s32.totalorder %s8216_s18, %s7871_s21  ;;  %s7876_s14 = scalar_lea.hbm %s8734_s0, 1024 }
  0x7d   : > { %p7877_p2 = scmp.lt.u32.totalorder %s8216_s18, %s8734_s0  ;;  %p7878_p1 = scmp.lt.u32.totalorder %s7876_s14, %s7871_s21 }
  0x7e   : > { %p7874_p12 = pnand %p7873_p9, %p7872_p7  ;;  %p7880_p4 = scmp.lt.u32.totalorder %s7871_s21, %s8216_s18 }
  0x7f   : > { %p7879_p13 = por %p7878_p1, %p7877_p2 }
  0x80   : > { %p7875_p0 = pneg %p7874_p12 }
  0x81   : > { %p7881_p8 = por %p7880_p4, %p7879_p13 }
  0x83   : > { %p7882_p6 = pnand %p7881_p8, %p7875_p0 }
  0x85   : > { %7885 = shalt.err (!%p7882_p6)
}
  0x86   : > { %s7886_s29 = scalar_lea.vmem %s8218_s22, 512  ;;  %s7987_s24 = smov [#allocation2]  }
  0x87   : > { %p7887_p3 = scmp.ne.s32.totalorder %s8218_s22, %s7886_s29  ;;  %s7891_s19 = sshll.u32 %s7987_s24, 4  ;;  %s7892_s19 = int_to_ptr.vmem [resolvable:$false] %s7891_s19 }
  0x88   : > { %s7893_s23 = scalar_lea.vmem %s7892_s19, 1024  ;;  %p7894_p12 = scmp.lt.s32.totalorder %s8218_s22, %s7892_s19 }
  0x89   : > { %p7889_p5 = pnand %p7887_p3, %p7873_p9  ;;  %p7895_p2 = scmp.lt.s32.totalorder %s7893_s23, %s7886_s29 }
  0x8b   : > { %p7890_p7 = pneg %p7889_p5  ;;  %p7896_p1 = por %p7895_p2, %p7894_p12 }
  0x8d   : > { %p7897_p13 = pnand %p7896_p1, %p7890_p7 }
  0x8f   : > { %7900 = shalt.err (!%p7897_p13)
}
  0x90   : > { %s7988_s21 = smov 256   ;;  %s7989_s20 = smov 16  }
  0x91   : > { %6998 = dma.hbm_to_vmem [thread:$0]  (!%p8220_p11), %s8216_s18, 512, %s8218_s22, %s8224_s4, %s7988_s21, %s7988_s21, %s7989_s20  }
  0x92   : > { %p8761_p9 = scmp.ne.s32.totalorder %s8754_s17, 0 }
  0x93   : > { %s8255_s14 = sand.u32 (!%p8761_p9), 1, %s7967_s10   ;;  %p8762_p0 = scmp.ne.s32.totalorder (!%p8761_p9), %s8751_s15, 0 }
  0x94   : > { %352 = sbr.rel (%p8761_p9) target bundleno = 5785 (0x1699), region = 56  ;;  %s6207_s16 = sshll.u32 (!%p8761_p9), %s8255_s14, 5 }
  0x95   : > { %s355_s30 = scalar_lea.sflag (!%p8761_p9), [#allocation3], %s8255_s14  ;;  %s8261_s29 = scalar_lea.vmem (!%p8761_p9), [#allocation2], %s6207_s16 }
  0x9b   : > { %7946 = dma.done.wait (%p8762_p0), %s355_s30, 512  }
  0x9c   : > { %7948 = vsyncadd (%p8762_p0), %s355_s30, 4294966784  ;;  %p8763_p11 = scmp.eq.s32.totalorder %s8068_s13, 0 }
  0x9e   : > { %7950 = dma.done.wait (%p8763_p11), [#allocation6], 32768   ;;  %p8764_p4 = pmov %p8763_p11 }
  0xa0   : > { %7952 = vsyncadd (%p8764_p4), [#allocation6], 4294934528  ;;  %p8765_p8 = pmov %p8764_p4 }
  0xa1   : > { %p8766_p6 = pmov %p8764_p4 }
  0xa2   : > { %7954 = dma.done.wait (%p8765_p8), [#allocation9], 49152  }
  0xa3   : > { %7956 = vsyncadd (%p8766_p6), [#allocation9], 4294918144  ;;  %v410_v0 = vld [vmem:[%s8261_s29] sm:$0xff]  ;;  %v411_v1 = vld [vmem:[%s8261_s29 + $0x8] sm:$0xff]  ;;  %s7991_s18 = smov 64   ;;  %vm7992_vm0 = vmmov 0  }
  0xa4   : > { %v412_v2 = vld [vmem:[%s8261_s29 + $0x10] sm:$0xff]  ;;  %v747_v3 = vmul.f32 %v410_v0, %v410_v0  ;;  %v748_v4 = vmul.f32 %v411_v1, %v411_v1  ;;  %v413_v5 = vld [vmem:[%s8261_s29 + $0x18] sm:$0xff]  ;;  %v7066_v11 = vld [vmem:[#allocation5 + $0xc] ss:$24 sps:$4 sm:$0xff]   ;;  %vm1461_vm2 = vcmask 130048   ;;  %s6881_s17 = sshll.u32 %s8068_s13, 9 }
  0xa5   : > { %v749_v6 = vmul.f32 %v412_v2, %v412_v2  ;;  %v750_v7 = vmul.f32 %v413_v5, %v413_v5  ;;  %v7063_v8 = vld [vmem:[#allocation5 + $0x4] ss:$24 sps:$4 sm:$0xff]   ;;  %v7065_v9 = vld [vmem:[#allocation5] ss:$24 sps:$4 sm:$0xff]   ;;  %v7069_v13 = vld [vmem:[#allocation5 + $0x34] ss:$24 sps:$4 sm:$0xff]   ;;  %1308 = vmatprep.subr.bf16.mxu1 %v7066_v11  ;;  %s8689_s13 = scalar_lea.hbm %s8743_s9, %s6881_s17 }
  0xa6   : > { %v751_v10 = vadd.f32 %v748_v4, %v747_v3  ;;  %v7068_v12 = vld [vmem:[#allocation5 + $0x8] ss:$24 sps:$4 sm:$0xff]   ;;  %1265 = vmatprep.subr.bf16.mxu0 %v7063_v8  ;;  %v7072_v16 = vld [vmem:[#allocation5 + $0x3c] ss:$24 sps:$4 sm:$0xff]   ;;  %v7074_v17 = vld [vmem:[#allocation5 + $0x38] ss:$24 sps:$4 sm:$0xff]  }
  0xa7   : > { %v754_v14 = vadd.f32 %v750_v7, %v749_v6  ;;  %1266 = vmatpush1.bf16.msra.mxu0 %v7065_v9  ;;  %v7071_v15 = vld [vmem:[#allocation5 + $0x30] ss:$24 sps:$4 sm:$0xff]   ;;  %1309 = vmatpush1.bf16.msra.mxu1 %v7068_v12  ;;  %v7075_v18 = vld [vmem:[#allocation5 + $0x64] ss:$24 sps:$4 sm:$0xff]   ;;  %v7077_v20 = vld [vmem:[#allocation5 + $0x60] ss:$24 sps:$4 sm:$0xff]  }
  0xa8   : > { %752 = vadd.xlane.f32.xlu0 %v751_v10  ;;  %1267 = vmatprep.subr.bf16.mxu0 %v7069_v13  ;;  %v7078_v19 = vld [vmem:[#allocation5 + $0x6c] ss:$24 sps:$4 sm:$0xff]   ;;  %v7080_v22 = vld [vmem:[#allocation5 + $0x68] ss:$24 sps:$4 sm:$0xff]   ;;  %v7084_v23 = vld [vmem:[#allocation5 + $0x9c] ss:$24 sps:$4 sm:$0xff]  }
  0xa9   : > { %1310 = vmatprep.subr.bf16.mxu1 %v7072_v16  ;;  %v7081_v21 = vld [vmem:[#allocation5 + $0x94] ss:$24 sps:$4 sm:$0xff]   ;;  %v7083_v24 = vld [vmem:[#allocation5 + $0x90] ss:$24 sps:$4 sm:$0xff]   ;;  %v7087_v25 = vld [vmem:[#allocation5 + $0xc4] ss:$24 sps:$4 sm:$0xff]   ;;  %v418_v16 = vlaneseq }
  0xaa   : > { %v7086_v26 = vld [vmem:[#allocation5 + $0x98] ss:$24 sps:$4 sm:$0xff]   ;;  %v7090_v27 = vld [vmem:[#allocation5 + $0xcc] ss:$24 sps:$4 sm:$0xff]   ;;  %v7092_v30 = vld [vmem:[#allocation5 + $0xc8] ss:$24 sps:$4 sm:$0xff]  }
  0xab   : > { %1268 = vmatpush1.bf16.msra.mxu0 %v7071_v15  ;;  %1311 = vmatpush1.bf16.msra.mxu1 %v7074_v17  ;;  %v7089_v28 = vld [vmem:[#allocation5 + $0xc0] ss:$24 sps:$4 sm:$0xff]   ;;  %v7093_v29 = vld [vmem:[#allocation5 + $0xf4] ss:$24 sps:$4 sm:$0xff]   ;;  %v7095_v32 = vld [vmem:[#allocation5 + $0xf0] ss:$24 sps:$4 sm:$0xff]  }
  0xac   : > { %755 = vadd.xlane.f32.xlu0 %v754_v14  ;;  %1269 = vmatprep.subr.bf16.mxu0 %v7075_v18  ;;  %v7096_v31 = vld [vmem:[#allocation5 + $0xfc] ss:$24 sps:$4 sm:$0xff]   ;;  %v7098_v34 = vld [vmem:[#allocation5 + $0xf8] ss:$24 sps:$4 sm:$0xff]   ;;  %v7102_v35 = vld [vmem:[#allocation5 + $0x12c] ss:$24 sps:$4 sm:$0xff]  }
  0xad   : > { %1312 = vmatprep.subr.bf16.mxu1 %v7078_v19  ;;  %v7099_v33 = vld [vmem:[#allocation5 + $0x124] ss:$24 sps:$4 sm:$0xff]   ;;  %v7101_v36 = vld [vmem:[#allocation5 + $0x120] ss:$24 sps:$4 sm:$0xff]   ;;  %v7105_v37 = vld [vmem:[#allocation5 + $0x154] ss:$24 sps:$4 sm:$0xff]  }
  0xae   : > { %v7104_v38 = vld [vmem:[#allocation5 + $0x128] ss:$24 sps:$4 sm:$0xff]   ;;  %v7108_v39 = vld [vmem:[#allocation5 + $0x15c] ss:$24 sps:$4 sm:$0xff]   ;;  %v7110_v42 = vld [vmem:[#allocation5 + $0x158] ss:$24 sps:$4 sm:$0xff]  }
  0xaf   : > { %1270 = vmatpush1.bf16.msra.mxu0 %v7077_v20  ;;  %1313 = vmatpush1.bf16.msra.mxu1 %v7080_v22  ;;  %v7107_v40 = vld [vmem:[#allocation5 + $0x150] ss:$24 sps:$4 sm:$0xff]   ;;  %v7111_v41 = vld [vmem:[#allocation5 + $0x184] ss:$24 sps:$4 sm:$0xff]   ;;  %v7113_v44 = vld [vmem:[#allocation5 + $0x180] ss:$24 sps:$4 sm:$0xff]  }
  0xb0   : > { %1271 = vmatprep.subr.bf16.mxu0 %v7081_v21  ;;  %1314 = vmatprep.subr.bf16.mxu1 %v7084_v23  ;;  %v7114_v43 = vld [vmem:[#allocation5 + $0x18c] ss:$24 sps:$4 sm:$0xff]   ;;  %v7116_v46 = vld [vmem:[#allocation5 + $0x188] ss:$24 sps:$4 sm:$0xff]   ;;  %v7120_v47 = vld [vmem:[#allocation5 + $0x1bc] ss:$24 sps:$4 sm:$0xff]  }
  0xb1   : > { %v7117_v45 = vld [vmem:[#allocation5 + $0x1b4] ss:$24 sps:$4 sm:$0xff]   ;;  %v7119_v48 = vld [vmem:[#allocation5 + $0x1b0] ss:$24 sps:$4 sm:$0xff]   ;;  %v7123_v49 = vld [vmem:[#allocation5 + $0x1e4] ss:$24 sps:$4 sm:$0xff]  }
  0xb2   : > { %v7122_v50 = vld [vmem:[#allocation5 + $0x1b8] ss:$24 sps:$4 sm:$0xff]   ;;  %v7126_v51 = vld [vmem:[#allocation5 + $0x1ec] ss:$24 sps:$4 sm:$0xff]   ;;  %v7128_v54 = vld [vmem:[#allocation5 + $0x1e8] ss:$24 sps:$4 sm:$0xff]  }
  0xb3   : > { %1272 = vmatpush1.bf16.msra.mxu0 %v7083_v24  ;;  %1315 = vmatpush1.bf16.msra.mxu1 %v7086_v26  ;;  %v7125_v52 = vld [vmem:[#allocation5 + $0x1e0] ss:$24 sps:$4 sm:$0xff]   ;;  %v7129_v53 = vld [vmem:[#allocation5 + $0x214] ss:$24 sps:$4 sm:$0xff]   ;;  %v7131_v56 = vld [vmem:[#allocation5 + $0x210] ss:$24 sps:$4 sm:$0xff]  }
  0xb4   : > { %1273 = vmatprep.subr.bf16.mxu0 %v7087_v25  ;;  %1316 = vmatprep.subr.bf16.mxu1 %v7090_v27  ;;  %v7132_v55 = vld [vmem:[#allocation5 + $0x21c] ss:$24 sps:$4 sm:$0xff]   ;;  %v7134_v57 = vld [vmem:[#allocation5 + $0x218] ss:$24 sps:$4 sm:$0xff]   ;;  %v7138_v59 = vld [vmem:[#allocation5 + $0x24c] ss:$24 sps:$4 sm:$0xff]  }
  0xb5   : > { %v7135_v58 = vld [vmem:[#allocation5 + $0x244] ss:$24 sps:$4 sm:$0xff]   ;;  %v7137_v60 = vld [vmem:[#allocation5 + $0x240] ss:$24 sps:$4 sm:$0xff]   ;;  %v7141_v62 = vld [vmem:[#allocation5 + $0x274] ss:$24 sps:$4 sm:$0xff]  }
  0xb6   : > { %v7140_v61 = vld [vmem:[#allocation5 + $0x248] ss:$24 sps:$4 sm:$0xff]   ;;  %v7144_v63 = vld [vmem:[#allocation5 + $0x27c] ss:$24 sps:$4 sm:$0xff]   ;;  %v7146_v1 = vld [vmem:[#allocation5 + $0x278] ss:$24 sps:$4 sm:$0xff]  }
  0xb7   : > { %1274 = vmatpush1.bf16.msra.mxu0 %v7089_v28  ;;  %1317 = vmatpush1.bf16.msra.mxu1 %v7092_v30  ;;  %v7143_v0 = vld [vmem:[#allocation5 + $0x270] ss:$24 sps:$4 sm:$0xff]   ;;  %v7147_v2 = vld [vmem:[#allocation5 + $0x2a4] ss:$24 sps:$4 sm:$0xff]   ;;  %v7149_v4 = vld [vmem:[#allocation5 + $0x2a0] ss:$24 sps:$4 sm:$0xff]  }
  0xb8   : > { %1275 = vmatprep.subr.bf16.mxu0 %v7093_v29  ;;  %1318 = vmatprep.subr.bf16.mxu1 %v7096_v31  ;;  %v7150_v3 = vld [vmem:[#allocation5 + $0x2ac] ss:$24 sps:$4 sm:$0xff]   ;;  %v7152_v5 = vld [vmem:[#allocation5 + $0x2a8] ss:$24 sps:$4 sm:$0xff]   ;;  %v7156_v7 = vld [vmem:[#allocation5 + $0x2dc] ss:$24 sps:$4 sm:$0xff]  }
  0xb9   : > { %v7153_v6 = vld [vmem:[#allocation5 + $0x2d4] ss:$24 sps:$4 sm:$0xff]   ;;  %v7155_v8 = vld [vmem:[#allocation5 + $0x2d0] ss:$24 sps:$4 sm:$0xff]   ;;  %v8280_v18 = vshrl.u32 %v418_v16, 7  ;;  %v8297_v26 = vld [vmem:[%s8261_s29] sm:$0xff] }
  0xba   : > { %v7158_v9 = vld [vmem:[#allocation5 + $0x2d8] ss:$24 sps:$4 sm:$0xff]   ;;  %v7161_v10 = vld [vmem:[#allocation5 + $0x14] ss:$24 sps:$4 sm:$0xff]   ;;  %v425_v19 = vld [vmem:[%s8737_s3] sm:$0x3] }
  0xbb   : > { %1276 = vmatpush1.bf16.msra.mxu0 %v7095_v32  ;;  %1319 = vmatpush1.bf16.msra.mxu1 %v7098_v34  ;;  %v8286_v20 = vsub.s32 1, %v8280_v18  ;;  %v8289_v21 = vsub.s32 0, %v8280_v18  ;;  %v8292_v23 = vld [vmem:[%s8261_s29 + $0x8] sm:$0xff]  ;;  %v8302_v30 = vld [vmem:[%s8261_s29 + $0x18] sm:$0xff]  ;;  %v8306_v32 = vld [vmem:[%s8261_s29 + $0x10] sm:$0xff]  ;;  %s408_s29 = scalar_lea.vmem [#allocation11], %s6207_s16 }
  0xbc   : > { %1277 = vmatprep.subr.bf16.mxu0 %v7099_v33  ;;  %1320 = vmatprep.subr.bf16.mxu1 %v7102_v35  ;;  %s6085_s15 = sshll.u32 %s408_s29, 4  ;;  %s6072_s25 = scalar_lea.sflag [#allocation4], %s8255_s14  ;;  %s8682_s15 = int_to_ptr.vmem [resolvable:$true] %s6085_s15 }
  0xbd   : > { %v776_v25 = vrot.slane %v425_v19, %v8286_v20  ;;  %v772_v28 = vrot.slane %v425_v19, %v8289_v21  ;;  %s7901_s4 = scalar_lea.vmem %s8682_s15, 512  ;;  %s7994_s24 = smov [#allocation11]  }
  0xbe   : > { %p7902_p3 = scmp.ne.s32.totalorder %s8682_s15, %s7901_s4  ;;  %s7905_s19 = sshll.u32 %s7994_s24, 4  ;;  %s7906_s19 = int_to_ptr.vmem [resolvable:$false] %s7905_s19 }
  0xbf   : > { %1278 = vmatpush1.bf16.msra.mxu0 %v7101_v36  ;;  %1321 = vmatpush1.bf16.msra.mxu1 %v7104_v38  ;;  %s7907_s23 = scalar_lea.vmem %s7906_s19, 1024  ;;  %p7908_p12 = scmp.lt.s32.totalorder %s8682_s15, %s7906_s19 }
  0xc0   : > { %1279 = vmatprep.subr.bf16.mxu0 %v7105_v37  ;;  %1322 = vmatprep.subr.bf16.mxu1 %v7108_v39  ;;  %v7159_v39 = vld [vmem:[#allocation5 + $0x10] ss:$24 sps:$4 sm:$0xff]   ;;  %p7903_p5 = pnand %p7902_p3, %p8203_p10  ;;  %p7909_p2 = scmp.lt.s32.totalorder %s7907_s23, %s7901_s4 }
  0xc2   : > { %p7904_p7 = pneg %p7903_p5  ;;  %p7910_p1 = por %p7909_p2, %p7908_p12 }
  0xc3   : > { %1280 = vmatpush1.bf16.msra.mxu0 %v7107_v40  ;;  %1323 = vmatpush1.bf16.msra.mxu1 %v7110_v42  ;;  %v7162_v42 = vld [vmem:[#allocation5 + $0x40] ss:$24 sps:$4 sm:$0xff]  }
  0xc4   : > { %1281 = vmatprep.subr.bf16.mxu0 %v7111_v41  ;;  %1324 = vmatprep.subr.bf16.mxu1 %v7114_v43  ;;  %v7164_v41 = vld [vmem:[#allocation5 + $0x44] ss:$24 sps:$4 sm:$0xff]   ;;  %v7167_v43 = vld [vmem:[#allocation5 + $0x74] ss:$24 sps:$4 sm:$0xff]   ;;  %p7911_p13 = pnand %p7910_p1, %p7904_p7 }
  0xc7   : > { %1282 = vmatpush1.bf16.msra.mxu0 %v7113_v44  ;;  %1325 = vmatpush1.bf16.msra.mxu1 %v7116_v46  ;;  %v7165_v44 = vld [vmem:[#allocation5 + $0x70] ss:$24 sps:$4 sm:$0xff]   ;;  %v7168_v46 = vld [vmem:[#allocation5 + $0xa0] ss:$24 sps:$4 sm:$0xff]  }
  0xc8   : > { %1283 = vmatprep.subr.bf16.mxu0 %v7117_v45  ;;  %1326 = vmatprep.subr.bf16.mxu1 %v7120_v47  ;;  %v7170_v45 = vld [vmem:[#allocation5 + $0xa4] ss:$24 sps:$4 sm:$0xff]   ;;  %v7173_v47 = vld [vmem:[#allocation5 + $0xd4] ss:$24 sps:$4 sm:$0xff]  }
  0xcb   : > { %1284 = vmatpush1.bf16.msra.mxu0 %v7119_v48  ;;  %1327 = vmatpush1.bf16.msra.mxu1 %v7122_v50  ;;  %v7171_v48 = vld [vmem:[#allocation5 + $0xd0] ss:$24 sps:$4 sm:$0xff]   ;;  %v7174_v50 = vld [vmem:[#allocation5 + $0x100] ss:$24 sps:$4 sm:$0xff]  }
  0xcc   : > { %1285 = vmatprep.subr.bf16.mxu0 %v7123_v49  ;;  %1328 = vmatprep.subr.bf16.mxu1 %v7126_v51  ;;  %v7176_v49 = vld [vmem:[#allocation5 + $0x104] ss:$24 sps:$4 sm:$0xff]   ;;  %v7179_v51 = vld [vmem:[#allocation5 + $0x134] ss:$24 sps:$4 sm:$0xff]  }
  0xcf   : > { %1286 = vmatpush1.bf16.msra.mxu0 %v7125_v52  ;;  %1329 = vmatpush1.bf16.msra.mxu1 %v7128_v54  ;;  %v7177_v52 = vld [vmem:[#allocation5 + $0x130] ss:$24 sps:$4 sm:$0xff]   ;;  %v7180_v54 = vld [vmem:[#allocation5 + $0x160] ss:$24 sps:$4 sm:$0xff]  }
  0xd0   : > { %1287 = vmatprep.subr.bf16.mxu0 %v7129_v53  ;;  %1330 = vmatprep.subr.bf16.mxu1 %v7132_v55  ;;  %v7182_v53 = vld [vmem:[#allocation5 + $0x164] ss:$24 sps:$4 sm:$0xff]   ;;  %v7185_v55 = vld [vmem:[#allocation5 + $0x194] ss:$24 sps:$4 sm:$0xff]  }
  0xd3   : > { %1288 = vmatpush1.bf16.msra.mxu0 %v7131_v56  ;;  %1331 = vmatpush1.bf16.msra.mxu1 %v7134_v57  ;;  %v7183_v56 = vld [vmem:[#allocation5 + $0x190] ss:$24 sps:$4 sm:$0xff]   ;;  %v7188_v57 = vld [vmem:[#allocation5 + $0x1c4] ss:$24 sps:$4 sm:$0xff]  }
  0xd4   : > { %1289 = vmatprep.subr.bf16.mxu0 %v7135_v58  ;;  %1332 = vmatprep.subr.bf16.mxu1 %v7138_v59  ;;  %v7186_v58 = vld [vmem:[#allocation5 + $0x1c0] ss:$24 sps:$4 sm:$0xff]   ;;  %v7191_v59 = vld [vmem:[#allocation5 + $0x1f4] ss:$24 sps:$4 sm:$0xff]  }
  0xd7   : > { %1290 = vmatpush1.bf16.msra.mxu0 %v7137_v60  ;;  %1333 = vmatpush1.bf16.msra.mxu1 %v7140_v61  ;;  %v7189_v60 = vld [vmem:[#allocation5 + $0x1f0] ss:$24 sps:$4 sm:$0xff]   ;;  %v7194_v61 = vld [vmem:[#allocation5 + $0x224] ss:$24 sps:$4 sm:$0xff]  }
  0xd8   : > { %1291 = vmatprep.subr.bf16.mxu0 %v7141_v62  ;;  %1334 = vmatprep.subr.bf16.mxu1 %v7144_v63  ;;  %v7192_v62 = vld [vmem:[#allocation5 + $0x220] ss:$24 sps:$4 sm:$0xff]   ;;  %v7197_v63 = vld [vmem:[#allocation5 + $0x254] ss:$24 sps:$4 sm:$0xff]  }
  0xdb   : > { %1292 = vmatpush1.bf16.msra.mxu0 %v7143_v0  ;;  %1335 = vmatpush1.bf16.msra.mxu1 %v7146_v1  ;;  %v7195_v0 = vld [vmem:[#allocation5 + $0x250] ss:$24 sps:$4 sm:$0xff]   ;;  %v7200_v1 = vld [vmem:[#allocation5 + $0x284] ss:$24 sps:$4 sm:$0xff]  }
  0xdc   : > { %1293 = vmatprep.subr.bf16.mxu0 %v7147_v2  ;;  %1336 = vmatprep.subr.bf16.mxu1 %v7150_v3  ;;  %v7198_v2 = vld [vmem:[#allocation5 + $0x280] ss:$24 sps:$4 sm:$0xff]   ;;  %v7203_v3 = vld [vmem:[#allocation5 + $0x2b4] ss:$24 sps:$4 sm:$0xff]  }
  0xdf   : > { %1294 = vmatpush1.bf16.msra.mxu0 %v7149_v4  ;;  %1337 = vmatpush1.bf16.msra.mxu1 %v7152_v5  ;;  %v7201_v4 = vld [vmem:[#allocation5 + $0x2b0] ss:$24 sps:$4 sm:$0xff]   ;;  %v7206_v5 = vld [vmem:[#allocation5 + $0x2e4] ss:$24 sps:$4 sm:$0xff]  }
  0xe0   : > { %1295 = vmatprep.subr.bf16.mxu0 %v7153_v6  ;;  %1338 = vmatprep.subr.bf16.mxu1 %v7156_v7  ;;  %v7204_v6 = vld [vmem:[#allocation5 + $0x2e0] ss:$24 sps:$4 sm:$0xff]   ;;  %v7990_v7 = vmov 0.0  }
  0xe3   : > { %1296 = vmatpush1.bf16.msra.mxu0 %v7155_v8  ;;  %1339 = vmatpush1.bf16.msra.mxu1 %v7158_v9 }
  0xe4   : > { %1351 = vmatprep.subr.bf16.mxu0 %v7161_v10  ;;  %6898 = vmatprep.subr.bf16.mxu1 %v7990_v7 }
 0x135   : > { %v753_v11 = vpop.xlane.xlu0 %752 }
 0x136   : > { %v758_v12 = vmul.f32 0.00390625, %v753_v11 }
 0x138   : > { %v760_v13 = vadd.f32 1e-06, %v758_v12 }
 0x139   : > { %v756_v14 = vpop.xlane.xlu0 %755 }
 0x13a   : > { %7639 = vrsqrt.f32 %v760_v13  ;;  %v759_v15 = vmul.f32 0.00390625, %v756_v14 }
 0x13c   : > { %v761_v17 = vadd.f32 1e-06, %v759_v15 }
 0x13e   : > { %7641 = vrsqrt.f32 %v761_v17 }
 0x144   : > { %v7640_v22 = vpop.eup %7639 }
 0x145   : > { %v765_v24 = vmul.f32 %v8292_v23, %v7640_v22  ;;  %v764_v27 = vmul.f32 %v8297_v26, %v7640_v22 }
 0x147   : > { %v780_v34 = vmul.f32 %v776_v25, %v765_v24  ;;  %v779_v36 = vmul.f32 %v772_v28, %v764_v27 }
 0x148   : > { %v7642_v29 = vpop.eup %7641 }
 0x149   : > { %v767_v31 = vmul.f32 %v8302_v30, %v7642_v29  ;;  %v766_v33 = vmul.f32 %v8306_v32, %v7642_v29 }
 0x14b   : > { %v782_v35 = vmul.f32 %v776_v25, %v767_v31  ;;  %v781_v37 = vmul.f32 %v772_v28, %v766_v33  ;;  %v8338_v28 = vld [vmem:[%s8736_s2] sm:$0xff]  ;;  %v8348_v33 = vld [vmem:[%s8735_s1 + $0x8] sm:$0xff] }
 0x14c   : > { %v8343_v31 = vld [vmem:[%s8735_s1] sm:$0xff] }
 0x14d   : > { %v784_v38 = vpack.c.bf16 %v782_v35, %v780_v34  ;;  %v8309_v40 = vpack.c.bf16 %v781_v37, %v779_v36  ;;  %v8353_v34 = vld [vmem:[%s8736_s2 + $0x8] sm:$0xff] }
 0x14f   : > { %1297 = vmatprep.mubr.bf16.mxu0 %v784_v38  ;;  %1340 = vmatprep.mubr.bf16.mxu1 %v784_v38 }
 0x150   : > { %1298 = vmatmul.mubr.bf16.vlgmr.msra.gmra.mrb[0].mxu0 %v8309_v40  ;;  %1341 = vmatmul.mubr.bf16.vlgmr.msra.gmra.mrb[0].mxu1 %v8309_v40 }
 0x151   : > { %1352 = vmatpush1.bf16.msra.mxu0 %v7159_v39  ;;  %1383 = vmatprep.mubr.bf16.mxu0 %v784_v38 }
 0x152   : > { %1353 = vmatprep.subr.bf16.mxu0 %v7164_v41  ;;  %6900 = vmatprep.mubr.msk.bf16.mxu1 %vm7992_vm0, %v7990_v7 }
 0x155   : > { %1354 = vmatpush1.bf16.msra.mxu0 %v7162_v42 }
 0x156   : > { %1355 = vmatprep.subr.bf16.mxu0 %v7167_v43 }
 0x159   : > { %1356 = vmatpush1.bf16.msra.mxu0 %v7165_v44 }
 0x15a   : > { %1357 = vmatprep.subr.bf16.mxu0 %v7170_v45 }
 0x15d   : > { %1358 = vmatpush1.bf16.msra.mxu0 %v7168_v46 }
 0x15e   : > { %1359 = vmatprep.subr.bf16.mxu0 %v7173_v47 }
 0x161   : > { %1360 = vmatpush1.bf16.msra.mxu0 %v7171_v48 }
 0x162   : > { %1361 = vmatprep.subr.bf16.mxu0 %v7176_v49 }
 0x165   : > { %1362 = vmatpush1.bf16.msra.mxu0 %v7174_v50 }
 0x166   : > { %1363 = vmatprep.subr.bf16.mxu0 %v7179_v51 }
 0x169   : > { %1364 = vmatpush1.bf16.msra.mxu0 %v7177_v52  ;;  %v8368_v52 = vand.u32 127, %v418_v16 }
 0x16a   : > { %1365 = vmatprep.subr.bf16.mxu0 %v7182_v53  ;;  %v8371_v53 = vadd.s32 8, %v8280_v18 }
 0x16b   : > { %vm423_vm1 = vcmp.le.s32.totalorder %v8368_v52, %v8280_v18 }
 0x16c   : > { %vm424_vm3 = vcmp.le.s32.totalorder %v8368_v52, %v8371_v53  ;;  %v7495_v52 = vld [vmem:[#allocation7 + $0x180] ss:$8 sps:$4 sm:$0xff]   ;;  %v7497_v53 = vld [vmem:[#allocation7 + $0x184] ss:$8 sps:$4 sm:$0xff]  }
 0x16d   : > { %1366 = vmatpush1.bf16.msra.mxu0 %v7180_v54 }
 0x16e   : > { %1367 = vmatprep.subr.bf16.mxu0 %v7185_v55 }
 0x171   : > { %1368 = vmatpush1.bf16.msra.mxu0 %v7183_v56 }
 0x172   : > { %1369 = vmatprep.subr.bf16.mxu0 %v7188_v57 }
 0x175   : > { %1370 = vmatpush1.bf16.msra.mxu0 %v7186_v58 }
 0x176   : > { %1371 = vmatprep.subr.bf16.mxu0 %v7191_v59 }
 0x179   : > { %1372 = vmatpush1.bf16.msra.mxu0 %v7189_v60 }
 0x17a   : > { %1373 = vmatprep.subr.bf16.mxu0 %v7194_v61 }
 0x17d   : > { %1374 = vmatpush1.bf16.msra.mxu0 %v7192_v62 }
 0x17e   : > { %1375 = vmatprep.subr.bf16.mxu0 %v7197_v63 }
 0x181   : > { %1376 = vmatpush1.bf16.msra.mxu0 %v7195_v0 }
 0x182   : > { %1377 = vmatprep.subr.bf16.mxu0 %v7200_v1 }
 0x185   : > { %1378 = vmatpush1.bf16.msra.mxu0 %v7198_v2 }
 0x186   : > { %1379 = vmatprep.subr.bf16.mxu0 %v7203_v3 }
 0x189   : > { %1380 = vmatpush1.bf16.msra.mxu0 %v7201_v4 }
 0x18a   : > { %1381 = vmatprep.subr.bf16.mxu0 %v7206_v5 }
 0x18d   : > { %1382 = vmatpush1.bf16.msra.mxu0 %v7204_v6 }
 0x190   : > { %1384 = vmatmul.mubr.bf16.vlgmr.msra.gmra.mrb[4].mxu0 %v8309_v40 }
 0x223   : > { %v1299_v8 = vpop.f32.mrb[0].mxu0  ;;  %v1342_v9 = vpop.f32.mrb[0].mxu1 }
 0x224   : > { %1406 = vrot.lane.b32.xlu1 %v1342_v9, %s7991_s18  ;;  %v8316_v10 = vpop.f32.mrb[1].mxu1  ;;  %1396 = vrot.lane.b32.xlu0 %v1299_v8, %s7991_s18  ;;  %v8319_v11 = vpop.f32.mrb[1].mxu0  ;;  %v1404_v38 = vmul.f32 %v1342_v9, %v8343_v31  ;;  %v1394_v45 = vmul.f32 %v1299_v8, %v8343_v31 }
 0x225   : > { %v1303_v12 = vpop.f32.mrb[2].mxu0  ;;  %v1346_v13 = vpop.f32.mrb[2].mxu1  ;;  %v1541_v9 = vmul.f32 %v8316_v10, %v8343_v31 }
 0x226   : > { %v8323_v14 = vpop.f32.mrb[3].mxu0  ;;  %v8325_v15 = vpop.f32.mrb[3].mxu1  ;;  %v1405_v39 = vmul.f32 %v1346_v13, %v8348_v33  ;;  %v1395_v46 = vmul.f32 %v1303_v12, %v8348_v33 }
 0x228   : > { %1408 = vrot.lane.b32.xlu1 %v1346_v13, %s7991_s18 }
 0x22c   : > { %1398 = vrot.lane.b32.xlu1 %v1303_v12, %s7991_s18  ;;  %v1542_v12 = vmul.f32 %v8325_v15, %v8348_v33 }
 0x263   : > { %v1385_v17 = vpop.f32.mrb[4].mxu0 }
 0x264   : > { %v8329_v19 = vpop.f32.mrb[5].mxu0 }
 0x265   : > { %v1389_v22 = vpop.f32.mrb[6].mxu0 }
 0x266   : > { %v1485_v24 = vpack.c.bf16 %v1389_v22, %v1385_v17  ;;  %v8331_v25 = vpop.f32.mrb[7].mxu0 }
 0x267   : > { %v1621_v27 = vpack.c.bf16 %v8331_v25, %v8329_v19 }
 0x296   : > { %v1407_v29 = vpop.permute.xlu1 %1406  ;;  %v1397_v36 = vpop.permute.xlu0 %1396 }
 0x297   : > { %v1410_v35 = vmul.f32 %v1407_v29, %v8338_v28  ;;  %v1400_v42 = vmul.f32 %v1397_v36, %v8338_v28 }
 0x299   : > { %v1412_v41 = vadd.f32 %v1410_v35, %v1404_v38  ;;  %v1402_v49 = vadd.f32 %v1400_v42, %v1394_v45  ;;  %v1532_v42 = vmul.f32 %v8323_v14, %v8348_v33 }
 0x29a   : > { %v1409_v37 = vpop.permute.xlu1 %1408 }
 0x29b   : > { %v1411_v40 = vmul.f32 %v1409_v37, %v8353_v34 }
 0x29d   : > { %v1413_v43 = vadd.f32 %v1411_v40, %v1405_v39 }
 0x29e   : > { %v1399_v44 = vpop.permute.xlu1 %1398 }
 0x29f   : > { %v1415_v47 = vpack.c.bf16 %v1413_v43, %v1412_v41  ;;  %v1401_v48 = vmul.f32 %v1399_v44, %v8353_v34  ;;  %v1531_v41 = vmul.f32 %v8319_v11, %v8343_v31 }
 0x2a1   : > { %v1403_v50 = vadd.f32 %v1401_v48, %v1395_v46  ;;  %6899 = vmatpush3.bf16.xpose.msra.mxu1 %v1415_v47 }
 0x2a2   : > { %6904 = vmatprep.subr.bf16.mxu1 %v7990_v7 }
 0x2a3   : > { %v1414_v51 = vpack.c.bf16 %v1403_v50, %v1402_v49 }
 0x2a8   : > { %6901 = vmatmul.mubr.bf16.vlgmr.msra.gmra.mrb[4].mxu1 %v1414_v51 }
 0x2a9   : > { %6905 = vmatpush3.bf16.msra.mxu1 %v1485_v24  ;;  %6906 = vmatprep.mubr.msk.bf16.mxu1 %vm7992_vm0, %v7990_v7 }
 0x2aa   : > { %6910 = vmatprep.subr.bf16.mxu1 %v7990_v7 }
 0x37b   : > { %v1450_v54 = vpop.f32.mrb[4].mxu1 }
 0x37c   : > { %v1457_v55 = vmul.f32 0.088388346, %v1450_v54  ;;  %v6902_v56 = vpop.f32.mrb[5].mxu1 }
 0x37d   : > { %v1453_v57 = vpop.f32.mrb[6].mxu1 }
 0x37e   : > { %v1458_v58 = vmul.f32 0.088388346, %v1453_v57  ;;  %v6903_v59 = vpop.f32.mrb[7].mxu1  ;;  %v1459_v16 = vsel %vm423_vm1, %v1457_v55, -inf }
 0x37f   : > { %v1462_v60 = vsel %vm1461_vm2, %v1459_v16, -inf }
 0x380   : > { %1463 = vmax.xlane.f32.xlu1 %v1462_v60  ;;  %v1460_v61 = vsel %vm424_vm3, %v1458_v58, -inf }
 0x381   : > { %v1465_v62 = vsel %vm1461_vm2, %v1460_v61, -inf }
 0x382   : > { %1466 = vmax.xlane.f32.xlu0 %v1465_v62 }
 0x391   : > { %1543 = vrot.lane.b32.xlu1 %v8316_v10, %s7991_s18 }
 0x395   : > { %1533 = vrot.lane.b32.xlu1 %v8319_v11, %s7991_s18 }
 0x398   : > { %1545 = vrot.lane.b32.xlu0 %v8325_v15, %s7991_s18 }
 0x40d   : > { %v1464_v63 = vpop.xlane.xlu1 %1463 }
 0x40e   : > { %v1468_v0 = vsub.f32 %v1459_v16, %v1464_v63 }
 0x40f   : > { %v1467_v1 = vpop.xlane.xlu0 %1466 }
 0x410   : > { %v1470_v2 = vmul.f32 1.442695, %v1468_v0  ;;  %v1469_v3 = vsub.f32 %v1460_v61, %v1467_v1 }
 0x411   : > { %v1544_v4 = vpop.permute.xlu1 %1543 }
 0x412   : > { %7643 = vpow2.f32 %v1470_v2  ;;  %v1472_v5 = vmul.f32 1.442695, %v1469_v3  ;;  %v1547_v6 = vmul.f32 %v1544_v4, %v8338_v28 }
 0x413   : > { %v1546_v8 = vpop.permute.xlu0 %1545 }
 0x414   : > { %7645 = vpow2.f32 %v1472_v5  ;;  %v1548_v13 = vmul.f32 %v1546_v8, %v8353_v34  ;;  %v1549_v17 = vadd.f32 %v1547_v6, %v1541_v9  ;;  %v7209_v5 = vld [vmem:[#allocation7 + $0x4] ss:$8 sps:$4 sm:$0xff]   ;;  %v7993_v6 = vmov 0   ;;  %v7231_v8 = vld [vmem:[#allocation7 + $0x80] ss:$8 sps:$4 sm:$0xff]  }
 0x415   : > { %v1534_v10 = vpop.permute.xlu1 %1533  ;;  %1779 = vmatprep.mubr.bf16.mxu0 %v7993_v6  ;;  %v7233_v9 = vld [vmem:[#allocation7 + $0x84] ss:$8 sps:$4 sm:$0xff]  }
 0x416   : > { %v1550_v22 = vadd.f32 %v1548_v13, %v1542_v12  ;;  %v1537_v39 = vmul.f32 %v1534_v10, %v8338_v28  ;;  %v7236_v12 = vld [vmem:[#allocation7 + $0x94] ss:$8 sps:$4 sm:$0xff]   ;;  %1747 = vmatprep.subr.bf16.mxu0 %v7233_v9  ;;  %v7234_v13 = vld [vmem:[#allocation7 + $0x90] ss:$8 sps:$4 sm:$0xff]   ;;  %v567_v9 = vld [vmem:[#allocation8 + $0x60] sm:$0xff] }
 0x417   : > { %1748 = vmatpush1.bf16.msra.mxu0 %v7231_v8  ;;  %v7246_v10 = vld [vmem:[#allocation7 + $0xd0] ss:$8 sps:$4 sm:$0xff]   ;;  %v563_v8 = vld [vmem:[#allocation8 + $0x40] sm:$0xff] }
 0x418   : > { %v1552_v24 = vpack.c.bf16 %v1550_v22, %v1549_v17  ;;  %v1539_v44 = vadd.f32 %v1537_v39, %v1531_v41  ;;  %1749 = vmatprep.subr.bf16.mxu0 %v7236_v12  ;;  %v7239_v17 = vld [vmem:[#allocation7 + $0xa4] ss:$8 sps:$4 sm:$0xff]   ;;  %v7237_v22 = vld [vmem:[#allocation7 + $0xa0] ss:$8 sps:$4 sm:$0xff]  }
 0x41b   : > { %1750 = vmatpush1.bf16.msra.mxu0 %v7234_v13 }
 0x41c   : > { %v7644_v29 = vpop.eup %7643  ;;  %1751 = vmatprep.subr.bf16.mxu0 %v7239_v17  ;;  %v6352_v17 = vcombine.high %v563_v8, %v567_v9 }
 0x41d   : > { %v1474_v35 = vsel %vm1461_vm2, %v7644_v29, 0.0 }
 0x41e   : > { %v7646_v36 = vpop.eup %7645  ;;  %1475 = vadd.xlane.f32.xlu1 %v1474_v35  ;;  %v7245_v35 = vld [vmem:[#allocation7 + $0xc4] ss:$8 sps:$4 sm:$0xff]  }
 0x41f   : > { %v1477_v37 = vsel %vm1461_vm2, %v7646_v36, 0.0  ;;  %1752 = vmatpush1.bf16.msra.mxu0 %v7237_v22  ;;  %v564_v22 = vld [vmem:[#allocation8 + $0x48] sm:$0xff] }
 0x422   : > { %1478 = vadd.xlane.f32.xlu1 %v1477_v37  ;;  %v7248_v37 = vld [vmem:[#allocation7 + $0xd4] ss:$8 sps:$4 sm:$0xff]  }
 0x433   : > { %1535 = vrot.lane.b32.xlu1 %v8323_v14, %s7991_s18 }
 0x4ab   : > { %v1476_v38 = vpop.xlane.xlu1 %1475 }
 0x4ac   : > { %7647 = vrcp.f32 %v1476_v38  ;;  %v7251_v38 = vld [vmem:[#allocation7 + $0xe4] ss:$8 sps:$4 sm:$0xff]  }
 0x4af   : > { %v1479_v15 = vpop.xlane.xlu1 %1478 }
 0x4b0   : > { %7649 = vrcp.f32 %v1479_v15  ;;  %v7249_v15 = vld [vmem:[#allocation7 + $0xe0] ss:$8 sps:$4 sm:$0xff]  }
 0x4b3   : > { %v1536_v40 = vpop.permute.xlu1 %1535 }
 0x4b4   : > { %v1538_v43 = vmul.f32 %v1536_v40, %v8353_v34 }
 0x4b6   : > { %v1540_v45 = vadd.f32 %v1538_v43, %v1532_v42  ;;  %v7648_v46 = vpop.eup %7647 }
 0x4b7   : > { %v1482_v49 = vmul.f32 %v7648_v46, %v7644_v29  ;;  %v7240_v29 = vld [vmem:[#allocation7 + $0xb0] ss:$8 sps:$4 sm:$0xff]  }
 0x4b8   : > { %v1551_v47 = vpack.c.bf16 %v1540_v45, %v1539_v44  ;;  %v7207_v45 = vld [vmem:[#allocation7] ss:$8 sps:$4 sm:$0xff]  }
 0x4ba   : > { %v7650_v48 = vpop.eup %7649 }
 0x4bb   : > { %v1483_v50 = vmul.f32 %v7650_v48, %v7646_v36  ;;  %v7243_v36 = vld [vmem:[#allocation7 + $0xc0] ss:$8 sps:$4 sm:$0xff]   ;;  %v7210_v48 = vld [vmem:[#allocation7 + $0x10] ss:$8 sps:$4 sm:$0xff]  }
 0x4bd   : > { %v1484_v51 = vpack.c.bf16 %v1483_v50, %v1482_v49  ;;  %v7215_v49 = vld [vmem:[#allocation7 + $0x24] ss:$8 sps:$4 sm:$0xff]   ;;  %v7213_v50 = vld [vmem:[#allocation7 + $0x20] ss:$8 sps:$4 sm:$0xff]  }
 0x4bf   : > { %6907 = vmatmul.mubr.msk.bf16.vlgmr.msra.gmra.mrb[8].mxu1 %vm1461_vm2, %v1484_v51  ;;  %v7218_v51 = vld [vmem:[#allocation7 + $0x34] ss:$8 sps:$4 sm:$0xff]  }
 0x4c0   : > { %6911 = vmatpush3.bf16.xpose.msra.mxu1 %v1552_v24  ;;  %6912 = vmatprep.mubr.msk.bf16.mxu1 %vm7992_vm0, %v7990_v7  ;;  %v7242_v24 = vld [vmem:[#allocation7 + $0xb4] ss:$8 sps:$4 sm:$0xff]  }
 0x4c1   : > { %6916 = vmatprep.subr.bf16.mxu1 %v7990_v7  ;;  %1753 = vmatprep.subr.bf16.mxu0 %v7242_v24  ;;  %v568_v24 = vld [vmem:[#allocation8 + $0x68] sm:$0xff] }
 0x4c2   : > { %1754 = vmatpush1.bf16.msra.mxu0 %v7240_v29  ;;  %v571_v29 = vld [vmem:[#allocation8 + $0x80] sm:$0xff] }
 0x4c3   : > { %1755 = vmatprep.subr.bf16.mxu0 %v7245_v35  ;;  %v6354_v35 = vcombine.high %v564_v22, %v568_v24 }
 0x4c6   : > { %1756 = vmatpush1.bf16.msra.mxu0 %v7243_v36  ;;  %v575_v36 = vld [vmem:[#allocation8 + $0xa0] sm:$0xff] }
 0x4c7   : > { %6913 = vmatmul.mubr.bf16.vlgmr.msra.gmra.mrb[12].mxu1 %v1551_v47  ;;  %1757 = vmatprep.subr.bf16.mxu0 %v7248_v37  ;;  %v7212_v47 = vld [vmem:[#allocation7 + $0x14] ss:$8 sps:$4 sm:$0xff]   ;;  %v572_v37 = vld [vmem:[#allocation8 + $0x88] sm:$0xff] }
 0x4c8   : > { %6917 = vmatpush3.bf16.msra.mxu1 %v1621_v27  ;;  %6918 = vmatprep.mubr.msk.bf16.mxu1 %vm7992_vm0, %v7990_v7 }
 0x4c9   : > { %1870 = vmatprep.subr.bf16.mxu1 %v7209_v5  ;;  %v560_v5 = vld [vmem:[#allocation8 + $0x28] sm:$0xff] }
 0x4ca   : > { %1758 = vmatpush1.bf16.msra.mxu0 %v7246_v10  ;;  %v576_v10 = vld [vmem:[#allocation8 + $0xa8] sm:$0xff] }
 0x4cb   : > { %1759 = vmatprep.subr.bf16.mxu0 %v7251_v38  ;;  %v6351_v38 = vcombine.low %v563_v8, %v567_v9  ;;  %v615_v8 = vld [vmem:[#allocation8 + $0x1e0] sm:$0xff]  ;;  %v612_v9 = vld [vmem:[#allocation8 + $0x1c8] sm:$0xff] }
 0x4ce   : > { %1760 = vmatpush1.bf16.msra.mxu0 %v7249_v15  ;;  %v6353_v15 = vcombine.low %v564_v22, %v568_v24 }
 0x592   : > { %v8416_v11 = vpop.f32.mrb[8].mxu1 }
 0x593   : > { %v6908_v14 = vpop.f32.mrb[9].mxu1 }
 0x594   : > { %v8418_v28 = vpop.f32.mrb[10].mxu1  ;;  %v7216_v14 = vld [vmem:[#allocation7 + $0x30] ss:$8 sps:$4 sm:$0xff]  }
 0x595   : > { %v1530_v31 = vpack.c.bf16 %v8418_v28, %v8416_v11  ;;  %v6909_v33 = vpop.f32.mrb[11].mxu1  ;;  %v555_v11 = vld [vmem:[#allocation8] sm:$0xff] }
 0x596   : > { %v7221_v33 = vld [vmem:[#allocation7 + $0x44] ss:$8 sps:$4 sm:$0xff]  }
 0x597   : > { %v559_v28 = vld [vmem:[#allocation8 + $0x20] sm:$0xff] }
 0x59a   : > { %v1587_v34 = vpop.f32.mrb[12].mxu1 }
 0x59b   : > { %v1594_v54 = vmul.f32 0.088388346, %v1587_v34  ;;  %v6914_v55 = vpop.f32.mrb[13].mxu1  ;;  %v7219_v34 = vld [vmem:[#allocation7 + $0x40] ss:$8 sps:$4 sm:$0xff]  }
 0x59c   : > { %v1590_v56 = vpop.f32.mrb[14].mxu1  ;;  %v7222_v55 = vld [vmem:[#allocation7 + $0x50] ss:$8 sps:$4 sm:$0xff]  }
 0x59d   : > { %v1595_v57 = vmul.f32 0.088388346, %v1590_v56  ;;  %v6915_v58 = vpop.f32.mrb[15].mxu1  ;;  %v1596_v19 = vsel %vm423_vm1, %v1594_v54, -inf  ;;  %v7224_v54 = vld [vmem:[#allocation7 + $0x54] ss:$8 sps:$4 sm:$0xff]  }
 0x59e   : > { %v1598_v25 = vsel %vm1461_vm2, %v1596_v19, -inf  ;;  %v7227_v56 = vld [vmem:[#allocation7 + $0x64] ss:$8 sps:$4 sm:$0xff]   ;;  %v7230_v58 = vld [vmem:[#allocation7 + $0x74] ss:$8 sps:$4 sm:$0xff]  }
 0x59f   : > { %1599 = vmax.xlane.f32.xlu1 %v1598_v25  ;;  %v1597_v27 = vsel %vm424_vm3, %v1595_v57, -inf  ;;  %v7225_v57 = vld [vmem:[#allocation7 + $0x60] ss:$8 sps:$4 sm:$0xff]   ;;  %v7254_v25 = vld [vmem:[#allocation7 + $0xf4] ss:$8 sps:$4 sm:$0xff]  }
 0x5a0   : > { %v1601_v59 = vsel %vm1461_vm2, %v1597_v27, -inf  ;;  %1761 = vmatprep.subr.bf16.mxu0 %v7254_v25 }
 0x5a1   : > { %1602 = vmax.xlane.f32.xlu0 %v1601_v59 }
 0x62c   : > { %v1600_v16 = vpop.xlane.xlu1 %1599 }
 0x62d   : > { %v1604_v60 = vsub.f32 %v1596_v19, %v1600_v16  ;;  %v7228_v19 = vld [vmem:[#allocation7 + $0x70] ss:$8 sps:$4 sm:$0xff]  }
 0x62e   : > { %v1603_v61 = vpop.xlane.xlu0 %1602 }
 0x62f   : > { %v1606_v62 = vmul.f32 1.442695, %v1604_v60  ;;  %v1605_v63 = vsub.f32 %v1597_v27, %v1603_v61  ;;  %v7252_v27 = vld [vmem:[#allocation7 + $0xf0] ss:$8 sps:$4 sm:$0xff]  }
 0x630   : > { %1762 = vmatpush1.bf16.msra.mxu0 %v7252_v27 }
 0x631   : > { %7651 = vpow2.f32 %v1606_v62  ;;  %v1608_v0 = vmul.f32 1.442695, %v1605_v63 }
 0x633   : > { %7653 = vpow2.f32 %v1608_v0 }
 0x63b   : > { %v7652_v1 = vpop.eup %7651 }
 0x63c   : > { %v1610_v2 = vsel %vm1461_vm2, %v7652_v1, 0.0 }
 0x63d   : > { %v7654_v3 = vpop.eup %7653  ;;  %1611 = vadd.xlane.f32.xlu0 %v1610_v2 }
 0x63e   : > { %v1613_v4 = vsel %vm1461_vm2, %v7654_v3, 0.0 }
 0x63f   : > { %1614 = vadd.xlane.f32.xlu1 %v1613_v4  ;;  %v6344_v4 = vcombine.high %v555_v11, %v559_v28 }
 0x641   : > { %2594 = vmatprep.subr.bf16.mxu0 %v6344_v4 }
 0x6ca   : > { %v1612_v39 = vpop.xlane.xlu0 %1611 }
 0x6cb   : > { %7655 = vrcp.f32 %v1612_v39  ;;  %v6360_v39 = vcombine.high %v571_v29, %v575_v36 }
 0x6cc   : > { %v1615_v40 = vpop.xlane.xlu1 %1614 }
 0x6cd   : > { %7657 = vrcp.f32 %v1615_v40  ;;  %v6362_v40 = vcombine.high %v572_v37, %v576_v10 }
 0x6d5   : > { %v7656_v41 = vpop.eup %7655 }
 0x6d6   : > { %v1618_v43 = vmul.f32 %v7656_v41, %v7652_v1  ;;  %v579_v41 = vld [vmem:[#allocation8 + $0xc0] sm:$0xff] }
 0x6d7   : > { %v7658_v42 = vpop.eup %7657 }
 0x6d8   : > { %v1619_v44 = vmul.f32 %v7658_v42, %v7654_v3  ;;  %v6343_v3 = vcombine.low %v555_v11, %v559_v28  ;;  %v583_v42 = vld [vmem:[#allocation8 + $0xe0] sm:$0xff]  ;;  %v608_v11 = vld [vmem:[#allocation8 + $0x1a8] sm:$0xff] }
 0x6da   : > { %v1620_v46 = vpack.c.bf16 %v1619_v44, %v1618_v43  ;;  %v580_v43 = vld [vmem:[#allocation8 + $0xc8] sm:$0xff] }
 0x6db   : > { %v584_v44 = vld [vmem:[#allocation8 + $0xe8] sm:$0xff] }
 0x6dc   : > { %6919 = vmatmul.mubr.msk.bf16.vlgmr.msra.gmra.mrb[16].mxu1 %vm1461_vm2, %v1620_v46  ;;  %v6361_v46 = vcombine.low %v572_v37, %v576_v10  ;;  %v624_v37 = vld [vmem:[#allocation8 + $0x228] sm:$0xff] }
 0x6dd   : > { %1871 = vmatpush1.bf16.msra.mxu1 %v7207_v45  ;;  %1902 = vmatprep.mubr.bf16.mxu1 %v7993_v6  ;;  %v6359_v45 = vcombine.low %v571_v29, %v575_v36  ;;  %v619_v29 = vld [vmem:[#allocation8 + $0x200] sm:$0xff]  ;;  %v620_v36 = vld [vmem:[#allocation8 + $0x208] sm:$0xff] }
 0x6de   : > { %1872 = vmatprep.subr.bf16.mxu1 %v7212_v47  ;;  %v6368_v47 = vcombine.high %v579_v41, %v583_v42 }
 0x6e1   : > { %1873 = vmatpush1.bf16.msra.mxu1 %v7210_v48  ;;  %v6370_v48 = vcombine.high %v580_v43, %v584_v44 }
 0x6e2   : > { %1874 = vmatprep.subr.bf16.mxu1 %v7215_v49  ;;  %v587_v49 = vld [vmem:[#allocation8 + $0x100] sm:$0xff] }
 0x6e5   : > { %1875 = vmatpush1.bf16.msra.mxu1 %v7213_v50  ;;  %v591_v50 = vld [vmem:[#allocation8 + $0x120] sm:$0xff] }
 0x6e6   : > { %1876 = vmatprep.subr.bf16.mxu1 %v7218_v51  ;;  %v588_v51 = vld [vmem:[#allocation8 + $0x108] sm:$0xff]  ;;  %v6375_v25 = vcombine.low %v587_v49, %v591_v50 }
 0x6e9   : > { %1877 = vmatpush1.bf16.msra.mxu1 %v7216_v14  ;;  %v592_v14 = vld [vmem:[#allocation8 + $0x128] sm:$0xff] }
 0x6ea   : > { %1878 = vmatprep.subr.bf16.mxu1 %v7221_v33  ;;  %v6367_v33 = vcombine.low %v579_v41, %v583_v42  ;;  %v6377_v27 = vcombine.low %v588_v51, %v592_v14  ;;  %v631_v41 = vld [vmem:[#allocation8 + $0x260] sm:$0xff]  ;;  %v628_v42 = vld [vmem:[#allocation8 + $0x248] sm:$0xff] }
 0x6ed   : > { %1879 = vmatpush1.bf16.msra.mxu1 %v7219_v34  ;;  %v6369_v34 = vcombine.low %v580_v43, %v584_v44  ;;  %v632_v43 = vld [vmem:[#allocation8 + $0x268] sm:$0xff] }
 0x6ee   : > { %1880 = vmatprep.subr.bf16.mxu1 %v7224_v54  ;;  %v6376_v54 = vcombine.high %v587_v49, %v591_v50  ;;  %v639_v49 = vld [vmem:[#allocation8 + $0x2a0] sm:$0xff]  ;;  %v636_v50 = vld [vmem:[#allocation8 + $0x288] sm:$0xff] }
 0x6f1   : > { %1881 = vmatpush1.bf16.msra.mxu1 %v7222_v55  ;;  %v6378_v55 = vcombine.high %v588_v51, %v592_v14  ;;  %v640_v51 = vld [vmem:[#allocation8 + $0x2a8] sm:$0xff] }
 0x6f2   : > { %1882 = vmatprep.subr.bf16.mxu1 %v7227_v56  ;;  %v595_v56 = vld [vmem:[#allocation8 + $0x140] sm:$0xff] }
 0x6f5   : > { %1883 = vmatpush1.bf16.msra.mxu1 %v7225_v57  ;;  %v599_v57 = vld [vmem:[#allocation8 + $0x160] sm:$0xff] }
 0x6f6   : > { %1884 = vmatprep.subr.bf16.mxu1 %v7230_v58  ;;  %v596_v58 = vld [vmem:[#allocation8 + $0x148] sm:$0xff]  ;;  %v6383_v28 = vcombine.low %v595_v56, %v599_v57 }
 0x6f9   : > { %1885 = vmatpush1.bf16.msra.mxu1 %v7228_v19  ;;  %v600_v19 = vld [vmem:[#allocation8 + $0x168] sm:$0xff] }
 0x6fc   : > { %1903 = vmatmul.mubr.bf16.vlgmr.msra.gmra.mrb[20].mxu1 %v1530_v31  ;;  %v556_v31 = vld [vmem:[#allocation8 + $0x8] sm:$0xff] }
 0x6fd   : > { %v6345_v12 = vcombine.low %v556_v31, %v560_v5  ;;  %v6346_v13 = vcombine.high %v556_v31, %v560_v5  ;;  %v6385_v31 = vcombine.low %v596_v58, %v600_v19  ;;  %v611_v5 = vld [vmem:[#allocation8 + $0x1c0] sm:$0xff] }
 0x6fe   : > { %v6400_v22 = vcombine.high %v611_v5, %v615_v8  ;;  %v6399_v10 = vcombine.low %v611_v5, %v615_v8  ;;  %v648_v5 = vld [vmem:[#allocation8 + $0x2e8] sm:$0xff] }
 0x6ff   : > { %2637 = vmatprep.subr.bf16.mxu1 %v6346_v13 }
 0x700   : > { %2638 = vmatpush1.bf16.msra.mxu1 %v6345_v12  ;;  %v616_v12 = vld [vmem:[#allocation8 + $0x1e8] sm:$0xff] }
 0x701   : > { %2639 = vmatprep.subr.bf16.mxu1 %v6354_v35  ;;  %v6402_v24 = vcombine.high %v612_v9, %v616_v12  ;;  %v623_v35 = vld [vmem:[#allocation8 + $0x220] sm:$0xff] }
 0x702   : > { %v6407_v44 = vcombine.low %v619_v29, %v623_v35 }
 0x704   : > { %2640 = vmatpush1.bf16.msra.mxu1 %v6353_v15  ;;  %v6408_v15 = vcombine.high %v619_v29, %v623_v35  ;;  %v656_v29 = vld [vmem:[#allocation8 + $0x328] sm:$0xff]  ;;  %v659_v35 = vld [vmem:[#allocation8 + $0x340] sm:$0xff] }
 0x705   : > { %2641 = vmatprep.subr.bf16.mxu1 %v6362_v40  ;;  %v627_v40 = vld [vmem:[#allocation8 + $0x240] sm:$0xff] }
 0x706   : > { %v6415_v14 = vcombine.low %v627_v40, %v631_v41 }
 0x708   : > { %2642 = vmatpush1.bf16.msra.mxu1 %v6361_v46  ;;  %v6416_v46 = vcombine.high %v627_v40, %v631_v41  ;;  %v667_v40 = vld [vmem:[#allocation8 + $0x380] sm:$0xff] }
 0x709   : > { %2643 = vmatprep.subr.bf16.mxu1 %v6370_v48  ;;  %v635_v48 = vld [vmem:[#allocation8 + $0x280] sm:$0xff] }
 0x70c   : > { %2644 = vmatpush1.bf16.msra.mxu1 %v6369_v34  ;;  %v6424_v34 = vcombine.high %v635_v48, %v639_v49 }
 0x70d   : > { %2645 = vmatprep.subr.bf16.mxu1 %v6378_v55  ;;  %v6423_v55 = vcombine.low %v635_v48, %v639_v49  ;;  %v675_v49 = vld [vmem:[#allocation8 + $0x3c0] sm:$0xff] }
 0x710   : > { %2646 = vmatpush1.bf16.msra.mxu1 %v6377_v27 }
 0x7af   : > { %v1659_v59 = vpop.f32.mrb[16].mxu1 }
 0x7b0   : > { %v6920_v16 = vpop.f32.mrb[17].mxu1 }
 0x7b1   : > { %v1662_v60 = vpop.f32.mrb[18].mxu1  ;;  %v6386_v16 = vcombine.high %v596_v58, %v600_v19 }
 0x7b2   : > { %v1666_v61 = vpack.c.bf16 %v1662_v60, %v1659_v59  ;;  %v6921_v62 = vpop.f32.mrb[19].mxu1  ;;  %v6384_v59 = vcombine.high %v595_v56, %v599_v57  ;;  %v603_v60 = vld [vmem:[#allocation8 + $0x180] sm:$0xff]  ;;  %v6425_v56 = vcombine.low %v636_v50, %v640_v51 }
 0x7b3   : > { %v604_v62 = vld [vmem:[#allocation8 + $0x188] sm:$0xff]  ;;  %2647 = vmatprep.subr.bf16.mxu1 %v6386_v16 }
 0x7b4   : > { %1780 = vmatmul.mubr.bf16.vlgmr.msra.gmra.mrb[8].mxu0 %v1666_v61  ;;  %v607_v61 = vld [vmem:[#allocation8 + $0x1a0] sm:$0xff]  ;;  %v6394_v4 = vcombine.high %v604_v62, %v608_v11  ;;  %2648 = vmatpush1.bf16.msra.mxu1 %v6385_v31 }
 0x7b5   : > { %2595 = vmatpush1.bf16.msra.mxu0 %v6343_v3  ;;  %v6392_v3 = vcombine.high %v603_v60, %v607_v61  ;;  %v6391_v13 = vcombine.low %v603_v60, %v607_v61  ;;  %v647_v31 = vld [vmem:[#allocation8 + $0x2e0] sm:$0xff] }
 0x7b6   : > { %2596 = vmatprep.subr.bf16.mxu0 %v6352_v17  ;;  %v6393_v17 = vcombine.low %v604_v62, %v608_v11  ;;  %2649 = vmatprep.subr.bf16.mxu1 %v6394_v4 }
 0x7b8   : > { %2650 = vmatpush1.bf16.msra.mxu1 %v6393_v17  ;;  %v652_v17 = vld [vmem:[#allocation8 + $0x308] sm:$0xff] }
 0x7b9   : > { %2597 = vmatpush1.bf16.msra.mxu0 %v6351_v38  ;;  %v6401_v38 = vcombine.low %v612_v9, %v616_v12  ;;  %2651 = vmatprep.subr.bf16.mxu1 %v6402_v24  ;;  %v651_v12 = vld [vmem:[#allocation8 + $0x300] sm:$0xff] }
 0x7ba   : > { %2598 = vmatprep.subr.bf16.mxu0 %v6360_v39  ;;  %v6410_v39 = vcombine.high %v620_v36, %v624_v37 }
 0x7bc   : > { %2652 = vmatpush1.bf16.msra.mxu1 %v6401_v38 }
 0x7bd   : > { %2599 = vmatpush1.bf16.msra.mxu0 %v6359_v45  ;;  %v6409_v45 = vcombine.low %v620_v36, %v624_v37  ;;  %2653 = vmatprep.subr.bf16.mxu1 %v6410_v39  ;;  %v663_v36 = vld [vmem:[#allocation8 + $0x360] sm:$0xff]  ;;  %v6441_v37 = vcombine.low %v652_v17, %v656_v29  ;;  %v664_v39 = vld [vmem:[#allocation8 + $0x368] sm:$0xff] }
 0x7be   : > { %2600 = vmatprep.subr.bf16.mxu0 %v6368_v47  ;;  %v6418_v47 = vcombine.high %v628_v42, %v632_v43  ;;  %v6448_v38 = vcombine.high %v659_v35, %v663_v36 }
 0x7c0   : > { %2654 = vmatpush1.bf16.msra.mxu1 %v6409_v45  ;;  %v6447_v45 = vcombine.low %v659_v35, %v663_v36  ;;  %v565_v35 = vld [vmem:[#allocation8 + $0x50] sm:$0xff] }
 0x7c1   : > { %2601 = vmatpush1.bf16.msra.mxu0 %v6367_v33  ;;  %v6417_v33 = vcombine.low %v628_v42, %v632_v43  ;;  %2655 = vmatprep.subr.bf16.mxu1 %v6418_v47  ;;  %v671_v42 = vld [vmem:[#allocation8 + $0x3a0] sm:$0xff]  ;;  %v668_v43 = vld [vmem:[#allocation8 + $0x388] sm:$0xff]  ;;  %v569_v36 = vld [vmem:[#allocation8 + $0x70] sm:$0xff] }
 0x7c2   : > { %2602 = vmatprep.subr.bf16.mxu0 %v6376_v54  ;;  %v6426_v54 = vcombine.high %v636_v50, %v640_v51  ;;  %v6456_v47 = vcombine.high %v667_v40, %v671_v42  ;;  %v679_v50 = vld [vmem:[#allocation8 + $0x3e0] sm:$0xff]  ;;  %v676_v51 = vld [vmem:[#allocation8 + $0x3c8] sm:$0xff] }
 0x7c4   : > { %2656 = vmatpush1.bf16.msra.mxu1 %v6417_v33  ;;  %v6455_v33 = vcombine.low %v667_v40, %v671_v42  ;;  %v6356_v40 = vcombine.high %v565_v35, %v569_v36  ;;  %v577_v42 = vld [vmem:[#allocation8 + $0xb0] sm:$0xff] }
 0x7c5   : > { %2603 = vmatpush1.bf16.msra.mxu0 %v6375_v25  ;;  %2657 = vmatprep.subr.bf16.mxu1 %v6426_v54  ;;  %v6464_v54 = vcombine.high %v675_v49, %v679_v50 }
 0x7c6   : > { %2604 = vmatprep.subr.bf16.mxu0 %v6384_v59 }
 0x7c8   : > { %2658 = vmatpush1.bf16.msra.mxu1 %v6425_v56  ;;  %v6463_v56 = vcombine.low %v675_v49, %v679_v50  ;;  %v581_v49 = vld [vmem:[#allocation8 + $0xd0] sm:$0xff] }
 0x7c9   : > { %2605 = vmatpush1.bf16.msra.mxu0 %v6383_v28  ;;  %v585_v50 = vld [vmem:[#allocation8 + $0xf0] sm:$0xff] }
 0x7ca   : > { %2606 = vmatprep.subr.bf16.mxu0 %v6392_v3  ;;  %v644_v3 = vld [vmem:[#allocation8 + $0x2c8] sm:$0xff] }
 0x7cb   : > { %v6433_v8 = vcombine.low %v644_v3, %v648_v5  ;;  %v6434_v9 = vcombine.high %v644_v3, %v648_v5 }
 0x7cd   : > { %2607 = vmatpush1.bf16.msra.mxu0 %v6391_v13  ;;  %2659 = vmatprep.subr.bf16.mxu1 %v6434_v9  ;;  %v655_v13 = vld [vmem:[#allocation8 + $0x320] sm:$0xff] }
 0x7ce   : > { %2608 = vmatprep.subr.bf16.mxu0 %v6400_v22  ;;  %2660 = vmatpush1.bf16.msra.mxu1 %v6433_v8  ;;  %v6439_v22 = vcombine.low %v651_v12, %v655_v13  ;;  %v6440_v24 = vcombine.high %v651_v12, %v655_v13 }
 0x7cf   : > { %v8438_v63 = vpop.f32.mrb[20].mxu1 }
 0x7d0   : > { %v8440_v0 = vpop.f32.mrb[21].mxu1 }
 0x7d1   : > { %v8442_v1 = vpop.f32.mrb[22].mxu1  ;;  %2609 = vmatpush1.bf16.msra.mxu0 %v6399_v10  ;;  %v6442_v10 = vcombine.high %v652_v17, %v656_v29 }
 0x7d2   : > { %v8444_v2 = vpop.f32.mrb[23].mxu1  ;;  %2610 = vmatprep.subr.bf16.mxu0 %v6408_v15  ;;  %v660_v15 = vld [vmem:[#allocation8 + $0x348] sm:$0xff] }
 0x7d3   : > { %v6450_v41 = vcombine.high %v660_v15, %v664_v39  ;;  %2661 = vmatprep.subr.bf16.mxu1 %v6442_v10  ;;  %v570_v10 = vld [vmem:[#allocation8 + $0x78] sm:$0xff] }
 0x7d4   : > { %2662 = vmatpush1.bf16.msra.mxu1 %v6441_v37  ;;  %v566_v37 = vld [vmem:[#allocation8 + $0x58] sm:$0xff] }
 0x7d5   : > { %2611 = vmatpush1.bf16.msra.mxu0 %v6407_v44  ;;  %v672_v44 = vld [vmem:[#allocation8 + $0x3a8] sm:$0xff]  ;;  %2663 = vmatprep.subr.bf16.mxu1 %v6450_v41  ;;  %v6358_v41 = vcombine.high %v566_v37, %v570_v10 }
 0x7d6   : > { %2612 = vmatprep.subr.bf16.mxu0 %v6416_v46  ;;  %v6449_v46 = vcombine.low %v660_v15, %v664_v39  ;;  %v6458_v48 = vcombine.high %v668_v43, %v672_v44  ;;  %v573_v39 = vld [vmem:[#allocation8 + $0x90] sm:$0xff] }
 0x7d8   : > { %2664 = vmatpush1.bf16.msra.mxu1 %v6449_v46  ;;  %v6357_v46 = vcombine.low %v566_v37, %v570_v10  ;;  %v621_v10 = vld [vmem:[#allocation8 + $0x210] sm:$0xff] }
 0x7d9   : > { %2613 = vmatpush1.bf16.msra.mxu0 %v6415_v14  ;;  %v680_v14 = vld [vmem:[#allocation8 + $0x3e8] sm:$0xff]  ;;  %2665 = vmatprep.subr.bf16.mxu1 %v6458_v48 }
 0x7da   : > { %2614 = vmatprep.subr.bf16.mxu0 %v6424_v34  ;;  %v6457_v34 = vcombine.low %v668_v43, %v672_v44  ;;  %v574_v43 = vld [vmem:[#allocation8 + $0x98] sm:$0xff] }
 0x7db   : > { %v578_v44 = vld [vmem:[#allocation8 + $0xb8] sm:$0xff] }
 0x7dc   : > { %2666 = vmatpush1.bf16.msra.mxu1 %v6457_v34  ;;  %v6366_v48 = vcombine.high %v574_v43, %v578_v44  ;;  %v6365_v34 = vcombine.low %v574_v43, %v578_v44 }
 0x7dd   : > { %2615 = vmatpush1.bf16.msra.mxu0 %v6423_v55  ;;  %v6466_v55 = vcombine.high %v676_v51, %v680_v14 }
 0x7df   : > { %2667 = vmatprep.subr.bf16.mxu1 %v6466_v55 }
 0x887   : > { %v1781_v57 = vpop.f32.mrb[8].mxu0 }
 0x888   : > { %v1905_v58 = vadd.f32 %v8438_v63, %v1781_v57  ;;  %v1783_v19 = vpop.f32.mrb[9].mxu0  ;;  %v6465_v57 = vcombine.low %v676_v51, %v680_v14  ;;  %v582_v51 = vld [vmem:[#allocation8 + $0xd8] sm:$0xff] }
 0x889   : > { %v1907_v25 = vadd.f32 %v8440_v0, %v1783_v19  ;;  %v1785_v27 = vpop.f32.mrb[10].mxu0  ;;  %v561_v19 = vld [vmem:[#allocation8 + $0x30] sm:$0xff]  ;;  %v586_v14 = vld [vmem:[#allocation8 + $0xf8] sm:$0xff] }
 0x88a   : > { %v8449_v59 = vadd.f32 %v8297_v26, %v1905_v58  ;;  %v1909_v16 = vadd.f32 %v8442_v1, %v1785_v27  ;;  %v1787_v60 = vpop.f32.mrb[11].mxu0  ;;  %v557_v58 = vld [vmem:[#allocation8 + $0x10] sm:$0xff]  ;;  %2668 = vmatpush1.bf16.msra.mxu1 %v6465_v57  ;;  %v6374_v55 = vcombine.high %v582_v51, %v586_v14 }
 0x88b   : > { %v8453_v61 = vadd.f32 %v8292_v23, %v1907_v25  ;;  %v1911_v62 = vadd.f32 %v8444_v2, %v1787_v60  ;;  %v558_v25 = vld [vmem:[#allocation8 + $0x18] sm:$0xff]  ;;  %v6348_v27 = vcombine.high %v557_v58, %v561_v19  ;;  %v6347_v60 = vcombine.low %v557_v58, %v561_v19  ;;  %v593_v57 = vld [vmem:[#allocation8 + $0x130] sm:$0xff] }
 0x88c   : > { %v8457_v11 = vadd.f32 %v8306_v32, %v1909_v16  ;;  %v1917_v63 = vmul.f32 %v8449_v59, %v8449_v59  ;;  %v643_v32 = vld [vmem:[#allocation8 + $0x2c0] sm:$0xff]  ;;  %v562_v16 = vld [vmem:[#allocation8 + $0x38] sm:$0xff] }
 0x88d   : > { %v8462_v0 = vadd.f32 %v8302_v30, %v1911_v62  ;;  %v1918_v26 = vmul.f32 %v8453_v61, %v8453_v61  ;;  %v6432_v4 = vcombine.high %v643_v32, %v647_v31  ;;  %v6431_v30 = vcombine.low %v643_v32, %v647_v31  ;;  %v426_v31 = vld [vmem:[%s8740_s6] sm:$0x3]  ;;  %v590_v58 = vld [vmem:[#allocation8 + $0x118] sm:$0xff] }
 0x88e   : > { %v1919_v1 = vmul.f32 %v8457_v11, %v8457_v11  ;;  %v6349_v62 = vcombine.low %v558_v25, %v562_v16  ;;  %v1945_v5 = vrot.slane %v426_v31, %v8286_v20  ;;  %v1941_v8 = vrot.slane %v426_v31, %v8289_v21  ;;  %v594_v19 = vld [vmem:[#allocation8 + $0x138] sm:$0xff]  ;;  %v605_v31 = vld [vmem:[#allocation8 + $0x190] sm:$0xff] }
 0x88f   : > { %v1921_v28 = vadd.f32 %v1918_v26, %v1917_v63  ;;  %v1920_v23 = vmul.f32 %v8462_v0, %v8462_v0  ;;  %2616 = vmatprep.subr.bf16.mxu0 %v6432_v4  ;;  %v6350_v63 = vcombine.high %v558_v25, %v562_v16  ;;  %v6371_v25 = vcombine.low %v581_v49, %v585_v50 }
 0x890   : > { %2617 = vmatpush1.bf16.msra.mxu0 %v6431_v30 }
 0x891   : > { %1922 = vadd.xlane.f32.xlu0 %v1921_v28  ;;  %v1924_v2 = vadd.f32 %v1920_v23, %v1919_v1  ;;  %2618 = vmatprep.subr.bf16.mxu0 %v6440_v24 }
 0x892   : > { %2723 = vmatprep.subr.bf16.mxu1 %v6350_v63  ;;  %v601_v63 = vld [vmem:[#allocation8 + $0x170] sm:$0xff] }
 0x893   : > { %1925 = vadd.xlane.f32.xlu1 %v1924_v2 }
 0x894   : > { %2619 = vmatpush1.bf16.msra.mxu0 %v6439_v22 }
 0x895   : > { %2620 = vmatprep.subr.bf16.mxu0 %v6448_v38 }
 0x898   : > { %2621 = vmatpush1.bf16.msra.mxu0 %v6447_v45  ;;  %v6355_v45 = vcombine.low %v565_v35, %v569_v36 }
 0x899   : > { %2622 = vmatprep.subr.bf16.mxu0 %v6456_v47  ;;  %v6364_v47 = vcombine.high %v573_v39, %v577_v42 }
 0x89c   : > { %2623 = vmatpush1.bf16.msra.mxu0 %v6455_v33  ;;  %v6363_v33 = vcombine.low %v573_v39, %v577_v42  ;;  %v622_v39 = vld [vmem:[#allocation8 + $0x218] sm:$0xff] }
 0x89d   : > { %2624 = vmatprep.subr.bf16.mxu0 %v6464_v54  ;;  %v6372_v54 = vcombine.high %v581_v49, %v585_v50 }
 0x8a0   : > { %2625 = vmatpush1.bf16.msra.mxu0 %v6463_v56  ;;  %v589_v56 = vld [vmem:[#allocation8 + $0x110] sm:$0xff] }
 0x8a1   : > { %2680 = vmatprep.subr.bf16.mxu0 %v6348_v27  ;;  %v6373_v27 = vcombine.low %v582_v51, %v586_v14  ;;  %v6380_v16 = vcombine.high %v589_v56, %v593_v57 }
 0x91e   : > { %v1923_v26 = vpop.xlane.xlu0 %1922 }
 0x91f   : > { %v1927_v1 = vmul.f32 0.00390625, %v1923_v26  ;;  %v598_v26 = vld [vmem:[#allocation8 + $0x158] sm:$0xff] }
 0x920   : > { %v1926_v28 = vpop.xlane.xlu1 %1925 }
 0x921   : > { %v1929_v23 = vadd.f32 1e-06, %v1927_v1  ;;  %v1928_v2 = vmul.f32 0.00390625, %v1926_v28  ;;  %v602_v1 = vld [vmem:[#allocation8 + $0x178] sm:$0xff]  ;;  %v6379_v28 = vcombine.low %v589_v56, %v593_v57 }
 0x923   : > { %7659 = vrsqrt.f32 %v1929_v23  ;;  %v1930_v32 = vadd.f32 1e-06, %v1928_v2  ;;  %v6381_v23 = vcombine.low %v590_v58, %v594_v19 }
 0x925   : > { %7661 = vrsqrt.f32 %v1930_v32  ;;  %v6390_v32 = vcombine.high %v598_v26, %v602_v1 }
 0x92d   : > { %v7660_v3 = vpop.eup %7659 }
 0x92e   : > { %v1934_v4 = vmul.f32 %v7660_v3, %v8453_v61  ;;  %v1933_v30 = vmul.f32 %v7660_v3, %v8449_v59  ;;  %v609_v3 = vld [vmem:[#allocation8 + $0x1b0] sm:$0xff] }
 0x92f   : > { %v7662_v9 = vpop.eup %7661 }
 0x930   : > { %v1936_v12 = vmul.f32 %v7662_v9, %v8462_v0  ;;  %v1935_v13 = vmul.f32 %v7662_v9, %v8457_v11  ;;  %v1949_v17 = vmul.f32 %v1945_v5, %v1934_v4  ;;  %v1948_v24 = vmul.f32 %v1941_v8, %v1933_v30  ;;  %v606_v4 = vld [vmem:[#allocation8 + $0x198] sm:$0xff] }
 0x931   : > { %v6396_v9 = vcombine.high %v605_v31, %v609_v3 }
 0x932   : > { %v1951_v22 = vmul.f32 %v1945_v5, %v1936_v12  ;;  %v1950_v29 = vmul.f32 %v1941_v8, %v1935_v13  ;;  %v610_v5 = vld [vmem:[#allocation8 + $0x1b8] sm:$0xff]  ;;  %v6389_v8 = vcombine.low %v598_v26, %v602_v1  ;;  %v613_v13 = vld [vmem:[#allocation8 + $0x1d0] sm:$0xff] }
 0x933   : > { %v6398_v12 = vcombine.high %v606_v4, %v610_v5  ;;  %v6397_v35 = vcombine.low %v606_v4, %v610_v5 }
 0x934   : > { %v1953_v38 = vpack.c.bf16 %v1951_v22, %v1949_v17  ;;  %v8479_v15 = vpack.c.bf16 %v1950_v29, %v1948_v24  ;;  %v617_v17 = vld [vmem:[#allocation8 + $0x1f0] sm:$0xff]  ;;  %v614_v22 = vld [vmem:[#allocation8 + $0x1d8] sm:$0xff]  ;;  %v6395_v29 = vcombine.low %v605_v31, %v609_v3 }
 0x935   : > { %v618_v24 = vld [vmem:[#allocation8 + $0x1f8] sm:$0xff]  ;;  %v6404_v36 = vcombine.high %v613_v13, %v617_v17 }
 0x936   : > { %2626 = vmatprep.mubr.bf16.mxu0 %v1953_v38  ;;  %2669 = vmatprep.mubr.bf16.mxu1 %v1953_v38  ;;  %v6406_v37 = vcombine.high %v614_v22, %v618_v24  ;;  %v6405_v42 = vcombine.low %v614_v22, %v618_v24 }
 0x937   : > { %2627 = vmatmul.mubr.bf16.vlgmr.msra.gmra.mrb[12].mxu0 %v8479_v15  ;;  %2670 = vmatmul.mubr.bf16.vlgmr.msra.gmra.mrb[24].mxu1 %v8479_v15 }
 0x938   : > { %2681 = vmatpush1.bf16.msra.mxu0 %v6347_v60  ;;  %2724 = vmatpush1.bf16.msra.mxu1 %v6349_v62  ;;  %v6382_v60 = vcombine.high %v590_v58, %v594_v19  ;;  %v597_v62 = vld [vmem:[#allocation8 + $0x150] sm:$0xff] }
 0x939   : > { %2712 = vmatprep.mubr.bf16.mxu0 %v1953_v38  ;;  %2755 = vmatprep.mubr.bf16.mxu1 %v1953_v38  ;;  %v6388_v2 = vcombine.high %v597_v62, %v601_v63  ;;  %v6387_v30 = vcombine.low %v597_v62, %v601_v63  ;;  %v625_v38 = vld [vmem:[#allocation8 + $0x230] sm:$0xff] }
 0x93a   : > { %2682 = vmatprep.subr.bf16.mxu0 %v6356_v40  ;;  %2725 = vmatprep.subr.bf16.mxu1 %v6358_v41  ;;  %v626_v40 = vld [vmem:[#allocation8 + $0x238] sm:$0xff]  ;;  %v6403_v41 = vcombine.low %v613_v13, %v617_v17  ;;  %v6412_v43 = vcombine.high %v621_v10, %v625_v38  ;;  %v6411_v49 = vcombine.low %v621_v10, %v625_v38 }
 0x93b   : > { %v6414_v44 = vcombine.high %v622_v39, %v626_v40  ;;  %v6413_v50 = vcombine.low %v622_v39, %v626_v40 }
 0x93c   : > { %2683 = vmatpush1.bf16.msra.mxu0 %v6355_v45  ;;  %2726 = vmatpush1.bf16.msra.mxu1 %v6357_v46  ;;  %v629_v45 = vld [vmem:[#allocation8 + $0x250] sm:$0xff] }
 0x93d   : > { %2684 = vmatprep.subr.bf16.mxu0 %v6364_v47  ;;  %2727 = vmatprep.subr.bf16.mxu1 %v6366_v48  ;;  %v633_v46 = vld [vmem:[#allocation8 + $0x270] sm:$0xff]  ;;  %v630_v47 = vld [vmem:[#allocation8 + $0x258] sm:$0xff] }
 0x93e   : > { %v634_v48 = vld [vmem:[#allocation8 + $0x278] sm:$0xff]  ;;  %v6420_v51 = vcombine.high %v629_v45, %v633_v46  ;;  %v6419_v56 = vcombine.low %v629_v45, %v633_v46 }
 0x93f   : > { %v6422_v14 = vcombine.high %v630_v47, %v634_v48  ;;  %v6421_v57 = vcombine.low %v630_v47, %v634_v48 }
 0x940   : > { %2685 = vmatpush1.bf16.msra.mxu0 %v6363_v33  ;;  %2728 = vmatpush1.bf16.msra.mxu1 %v6365_v34  ;;  %v637_v33 = vld [vmem:[#allocation8 + $0x290] sm:$0xff] }
 0x941   : > { %2686 = vmatprep.subr.bf16.mxu0 %v6372_v54  ;;  %2729 = vmatprep.subr.bf16.mxu1 %v6374_v55  ;;  %v641_v34 = vld [vmem:[#allocation8 + $0x2b0] sm:$0xff]  ;;  %v638_v54 = vld [vmem:[#allocation8 + $0x298] sm:$0xff] }
 0x942   : > { %v642_v55 = vld [vmem:[#allocation8 + $0x2b8] sm:$0xff]  ;;  %v6428_v58 = vcombine.high %v637_v33, %v641_v34  ;;  %v6427_v62 = vcombine.low %v637_v33, %v641_v34 }
 0x943   : > { %v6430_v19 = vcombine.high %v638_v54, %v642_v55  ;;  %v6429_v63 = vcombine.low %v638_v54, %v642_v55  ;;  %v7260_v33 = vld [vmem:[#allocation10 + $0x14] ss:$8 sps:$4 sm:$0xff]   ;;  %v7258_v34 = vld [vmem:[#allocation10 + $0x10] ss:$8 sps:$4 sm:$0xff]   ;;  %v7263_v54 = vld [vmem:[#allocation10 + $0x24] ss:$8 sps:$4 sm:$0xff]  }
 0x944   : > { %2687 = vmatpush1.bf16.msra.mxu0 %v6371_v25  ;;  %2730 = vmatpush1.bf16.msra.mxu1 %v6373_v27  ;;  %v645_v25 = vld [vmem:[#allocation8 + $0x2d0] sm:$0xff]  ;;  %v7261_v55 = vld [vmem:[#allocation10 + $0x20] ss:$8 sps:$4 sm:$0xff]  }
 0x945   : > { %2688 = vmatprep.subr.bf16.mxu0 %v6380_v16  ;;  %2731 = vmatprep.subr.bf16.mxu1 %v6382_v60  ;;  %v649_v27 = vld [vmem:[#allocation8 + $0x2f0] sm:$0xff]  ;;  %v646_v16 = vld [vmem:[#allocation8 + $0x2d8] sm:$0xff] }
 0x946   : > { %v650_v60 = vld [vmem:[#allocation8 + $0x2f8] sm:$0xff]  ;;  %v6436_v26 = vcombine.high %v645_v25, %v649_v27  ;;  %v6435_v31 = vcombine.low %v645_v25, %v649_v27  ;;  %v7275_v27 = vld [vmem:[#allocation10 + $0x64] ss:$8 sps:$4 sm:$0xff]  }
 0x947   : > { %v6438_v1 = vcombine.high %v646_v16, %v650_v60  ;;  %v6437_v3 = vcombine.low %v646_v16, %v650_v60  ;;  %v7270_v25 = vld [vmem:[#allocation10 + $0x50] ss:$8 sps:$4 sm:$0xff]   ;;  %v7273_v16 = vld [vmem:[#allocation10 + $0x60] ss:$8 sps:$4 sm:$0xff]   ;;  %v7278_v60 = vld [vmem:[#allocation10 + $0x74] ss:$8 sps:$4 sm:$0xff]  }
 0x948   : > { %2689 = vmatpush1.bf16.msra.mxu0 %v6379_v28  ;;  %2732 = vmatpush1.bf16.msra.mxu1 %v6381_v23  ;;  %v653_v28 = vld [vmem:[#allocation8 + $0x310] sm:$0xff] }
 0x949   : > { %2690 = vmatprep.subr.bf16.mxu0 %v6388_v2  ;;  %2733 = vmatprep.subr.bf16.mxu1 %v6390_v32  ;;  %v657_v23 = vld [vmem:[#allocation8 + $0x330] sm:$0xff]  ;;  %v654_v2 = vld [vmem:[#allocation8 + $0x318] sm:$0xff] }
 0x94a   : > { %v658_v32 = vld [vmem:[#allocation8 + $0x338] sm:$0xff]  ;;  %v6444_v4 = vcombine.high %v653_v28, %v657_v23  ;;  %v6443_v13 = vcombine.low %v653_v28, %v657_v23  ;;  %v7287_v23 = vld [vmem:[#allocation10 + $0xa4] ss:$8 sps:$4 sm:$0xff]  }
 0x94b   : > { %v6446_v5 = vcombine.high %v654_v2, %v658_v32  ;;  %v6445_v17 = vcombine.low %v654_v2, %v658_v32  ;;  %v7282_v28 = vld [vmem:[#allocation10 + $0x90] ss:$8 sps:$4 sm:$0xff]   ;;  %v7285_v2 = vld [vmem:[#allocation10 + $0xa0] ss:$8 sps:$4 sm:$0xff]   ;;  %v7290_v32 = vld [vmem:[#allocation10 + $0xb4] ss:$8 sps:$4 sm:$0xff]  }
 0x94c   : > { %2691 = vmatpush1.bf16.msra.mxu0 %v6387_v30  ;;  %2734 = vmatpush1.bf16.msra.mxu1 %v6389_v8  ;;  %v661_v30 = vld [vmem:[#allocation8 + $0x350] sm:$0xff] }
 0x94d   : > { %2692 = vmatprep.subr.bf16.mxu0 %v6396_v9  ;;  %2735 = vmatprep.subr.bf16.mxu1 %v6398_v12  ;;  %v665_v8 = vld [vmem:[#allocation8 + $0x370] sm:$0xff]  ;;  %v662_v9 = vld [vmem:[#allocation8 + $0x358] sm:$0xff] }
 0x94e   : > { %v666_v12 = vld [vmem:[#allocation8 + $0x378] sm:$0xff]  ;;  %v6452_v22 = vcombine.high %v661_v30, %v665_v8  ;;  %v6451_v10 = vcombine.low %v661_v30, %v665_v8  ;;  %v7297_v8 = vld [vmem:[#allocation10 + $0xe0] ss:$8 sps:$4 sm:$0xff]  }
 0x94f   : > { %v6454_v24 = vcombine.high %v662_v9, %v666_v12  ;;  %v6453_v38 = vcombine.low %v662_v9, %v666_v12  ;;  %v7294_v30 = vld [vmem:[#allocation10 + $0xd0] ss:$8 sps:$4 sm:$0xff]   ;;  %v7299_v9 = vld [vmem:[#allocation10 + $0xe4] ss:$8 sps:$4 sm:$0xff]   ;;  %v7302_v12 = vld [vmem:[#allocation10 + $0xf4] ss:$8 sps:$4 sm:$0xff]  }
 0x950   : > { %2693 = vmatpush1.bf16.msra.mxu0 %v6395_v29  ;;  %2736 = vmatpush1.bf16.msra.mxu1 %v6397_v35  ;;  %v669_v29 = vld [vmem:[#allocation8 + $0x390] sm:$0xff] }
 0x951   : > { %2694 = vmatprep.subr.bf16.mxu0 %v6404_v36  ;;  %2737 = vmatprep.subr.bf16.mxu1 %v6406_v37  ;;  %v673_v35 = vld [vmem:[#allocation8 + $0x3b0] sm:$0xff]  ;;  %v670_v36 = vld [vmem:[#allocation8 + $0x398] sm:$0xff] }
 0x952   : > { %v674_v37 = vld [vmem:[#allocation8 + $0x3b8] sm:$0xff]  ;;  %v6460_v39 = vcombine.high %v669_v29, %v673_v35  ;;  %v6459_v45 = vcombine.low %v669_v29, %v673_v35 }
 0x953   : > { %v6462_v40 = vcombine.high %v670_v36, %v674_v37  ;;  %v6461_v46 = vcombine.low %v670_v36, %v674_v37 }
 0x954   : > { %2695 = vmatpush1.bf16.msra.mxu0 %v6403_v41  ;;  %2738 = vmatpush1.bf16.msra.mxu1 %v6405_v42  ;;  %v677_v41 = vld [vmem:[#allocation8 + $0x3d0] sm:$0xff] }
 0x955   : > { %2696 = vmatprep.subr.bf16.mxu0 %v6412_v43  ;;  %2739 = vmatprep.subr.bf16.mxu1 %v6414_v44  ;;  %v681_v42 = vld [vmem:[#allocation8 + $0x3f0] sm:$0xff]  ;;  %v678_v43 = vld [vmem:[#allocation8 + $0x3d8] sm:$0xff] }
 0x956   : > { %v682_v44 = vld [vmem:[#allocation8 + $0x3f8] sm:$0xff]  ;;  %v6468_v47 = vcombine.high %v677_v41, %v681_v42 }
 0x957   : > { %v6470_v48 = vcombine.high %v678_v43, %v682_v44 }
 0x958   : > { %2697 = vmatpush1.bf16.msra.mxu0 %v6411_v49  ;;  %2740 = vmatpush1.bf16.msra.mxu1 %v6413_v50  ;;  %v6467_v49 = vcombine.low %v677_v41, %v681_v42  ;;  %v6469_v50 = vcombine.low %v678_v43, %v682_v44 }
 0x959   : > { %2698 = vmatprep.subr.bf16.mxu0 %v6420_v51  ;;  %2741 = vmatprep.subr.bf16.mxu1 %v6422_v14  ;;  %v7257_v51 = vld [vmem:[#allocation10 + $0x4] ss:$8 sps:$4 sm:$0xff]   ;;  %v7255_v14 = vld [vmem:[#allocation10] ss:$8 sps:$4 sm:$0xff]  }
 0x95c   : > { %2699 = vmatpush1.bf16.msra.mxu0 %v6419_v56  ;;  %2742 = vmatpush1.bf16.msra.mxu1 %v6421_v57  ;;  %v7266_v56 = vld [vmem:[#allocation10 + $0x34] ss:$8 sps:$4 sm:$0xff]   ;;  %v7264_v57 = vld [vmem:[#allocation10 + $0x30] ss:$8 sps:$4 sm:$0xff]  }
 0x95d   : > { %2700 = vmatprep.subr.bf16.mxu0 %v6428_v58  ;;  %2743 = vmatprep.subr.bf16.mxu1 %v6430_v19  ;;  %v7269_v58 = vld [vmem:[#allocation10 + $0x44] ss:$8 sps:$4 sm:$0xff]   ;;  %v7267_v19 = vld [vmem:[#allocation10 + $0x40] ss:$8 sps:$4 sm:$0xff]  }
 0x960   : > { %2701 = vmatpush1.bf16.msra.mxu0 %v6427_v62  ;;  %2744 = vmatpush1.bf16.msra.mxu1 %v6429_v63  ;;  %v7276_v62 = vld [vmem:[#allocation10 + $0x70] ss:$8 sps:$4 sm:$0xff]   ;;  %v7281_v63 = vld [vmem:[#allocation10 + $0x84] ss:$8 sps:$4 sm:$0xff]  }
 0x961   : > { %2702 = vmatprep.subr.bf16.mxu0 %v6436_v26  ;;  %2745 = vmatprep.subr.bf16.mxu1 %v6438_v1  ;;  %v7279_v26 = vld [vmem:[#allocation10 + $0x80] ss:$8 sps:$4 sm:$0xff]   ;;  %v7284_v1 = vld [vmem:[#allocation10 + $0x94] ss:$8 sps:$4 sm:$0xff]  }
 0x964   : > { %2703 = vmatpush1.bf16.msra.mxu0 %v6435_v31  ;;  %2746 = vmatpush1.bf16.msra.mxu1 %v6437_v3  ;;  %v7288_v31 = vld [vmem:[#allocation10 + $0xb0] ss:$8 sps:$4 sm:$0xff]   ;;  %v7293_v3 = vld [vmem:[#allocation10 + $0xc4] ss:$8 sps:$4 sm:$0xff]  }
 0x965   : > { %2704 = vmatprep.subr.bf16.mxu0 %v6444_v4  ;;  %2747 = vmatprep.subr.bf16.mxu1 %v6446_v5  ;;  %v7291_v4 = vld [vmem:[#allocation10 + $0xc0] ss:$8 sps:$4 sm:$0xff]   ;;  %v7296_v5 = vld [vmem:[#allocation10 + $0xd4] ss:$8 sps:$4 sm:$0xff]  }
 0x968   : > { %2705 = vmatpush1.bf16.msra.mxu0 %v6443_v13  ;;  %2748 = vmatpush1.bf16.msra.mxu1 %v6445_v17  ;;  %v7300_v13 = vld [vmem:[#allocation10 + $0xf0] ss:$8 sps:$4 sm:$0xff]   ;;  %v7305_v17 = vld [vmem:[#allocation10 + $0x104] ss:$8 sps:$4 sm:$0xff]  }
 0x969   : > { %2706 = vmatprep.subr.bf16.mxu0 %v6452_v22  ;;  %2749 = vmatprep.subr.bf16.mxu1 %v6454_v24 }
 0x96c   : > { %2707 = vmatpush1.bf16.msra.mxu0 %v6451_v10  ;;  %2750 = vmatpush1.bf16.msra.mxu1 %v6453_v38 }
 0x96d   : > { %2708 = vmatprep.subr.bf16.mxu0 %v6460_v39  ;;  %2751 = vmatprep.subr.bf16.mxu1 %v6462_v40 }
 0x970   : > { %2709 = vmatpush1.bf16.msra.mxu0 %v6459_v45  ;;  %2752 = vmatpush1.bf16.msra.mxu1 %v6461_v46 }
 0x971   : > { %2710 = vmatprep.subr.bf16.mxu0 %v6468_v47  ;;  %2753 = vmatprep.subr.bf16.mxu1 %v6470_v48 }
 0x974   : > { %2711 = vmatpush1.bf16.msra.mxu0 %v6467_v49  ;;  %2754 = vmatpush1.bf16.msra.mxu1 %v6469_v50 }
 0x975   : > { %3154 = vmatprep.subr.bf16.mxu0 %v7257_v51 }
 0x977   : > { %2713 = vmatmul.mubr.bf16.vlgmr.msra.gmra.mrb[16].mxu0 %v8479_v15  ;;  %2756 = vmatmul.mubr.bf16.vlgmr.msra.gmra.mrb[28].mxu1 %v8479_v15  ;;  %v7272_v15 = vld [vmem:[#allocation10 + $0x54] ss:$8 sps:$4 sm:$0xff]  }
 0x978   : > { %3155 = vmatpush1.bf16.msra.mxu0 %v7255_v14 }
 0x979   : > { %3156 = vmatprep.subr.bf16.mxu0 %v7260_v33 }
 0x97c   : > { %3157 = vmatpush1.bf16.msra.mxu0 %v7258_v34 }
 0x97d   : > { %3158 = vmatprep.subr.bf16.mxu0 %v7263_v54 }
 0x980   : > { %3159 = vmatpush1.bf16.msra.mxu0 %v7261_v55 }
 0x981   : > { %3160 = vmatprep.subr.bf16.mxu0 %v7266_v56 }
 0x984   : > { %3161 = vmatpush1.bf16.msra.mxu0 %v7264_v57 }
 0x985   : > { %3162 = vmatprep.subr.bf16.mxu0 %v7269_v58 }
 0x988   : > { %3163 = vmatpush1.bf16.msra.mxu0 %v7267_v19 }
 0x989   : > { %3164 = vmatprep.subr.bf16.mxu0 %v7272_v15 }
 0x98c   : > { %3165 = vmatpush1.bf16.msra.mxu0 %v7270_v25 }
 0x98d   : > { %3166 = vmatprep.subr.bf16.mxu0 %v7275_v27 }
 0x990   : > { %3167 = vmatpush1.bf16.msra.mxu0 %v7273_v16 }
 0x991   : > { %3168 = vmatprep.subr.bf16.mxu0 %v7278_v60 }
 0x994   : > { %3169 = vmatpush1.bf16.msra.mxu0 %v7276_v62 }
 0x995   : > { %3170 = vmatprep.subr.bf16.mxu0 %v7281_v63 }
 0x998   : > { %3171 = vmatpush1.bf16.msra.mxu0 %v7279_v26 }
 0x999   : > { %3172 = vmatprep.subr.bf16.mxu0 %v7284_v1 }
 0x99c   : > { %3173 = vmatpush1.bf16.msra.mxu0 %v7282_v28 }
 0x99d   : > { %3174 = vmatprep.subr.bf16.mxu0 %v7287_v23 }
 0x9a0   : > { %3175 = vmatpush1.bf16.msra.mxu0 %v7285_v2 }
 0x9a1   : > { %3176 = vmatprep.subr.bf16.mxu0 %v7290_v32 }
 0x9a4   : > { %3177 = vmatpush1.bf16.msra.mxu0 %v7288_v31 }
 0x9a5   : > { %3178 = vmatprep.subr.bf16.mxu0 %v7293_v3 }
 0x9a8   : > { %3179 = vmatpush1.bf16.msra.mxu0 %v7291_v4 }
 0x9a9   : > { %3180 = vmatprep.subr.bf16.mxu0 %v7296_v5 }
 0x9ac   : > { %3181 = vmatpush1.bf16.msra.mxu0 %v7294_v30 }
 0x9ad   : > { %3182 = vmatprep.subr.bf16.mxu0 %v7299_v9 }
 0x9b0   : > { %3183 = vmatpush1.bf16.msra.mxu0 %v7297_v8 }
 0x9b1   : > { %3184 = vmatprep.subr.bf16.mxu0 %v7302_v12 }
 0x9b4   : > { %3185 = vmatpush1.bf16.msra.mxu0 %v7300_v13 }
 0x9b5   : > { %3197 = vmatprep.subr.bf16.mxu0 %v7305_v17 }
 0xa0a   : > { %v2628_v22 = vpop.f32.mrb[12].mxu0  ;;  %v2671_v24 = vpop.f32.mrb[24].mxu1 }
 0xa0b   : > { %v2630_v29 = vpop.f32.mrb[13].mxu0  ;;  %v2673_v35 = vpop.f32.mrb[25].mxu1  ;;  %v6471_v39 = vmul.f32 -1.442695, %v2628_v22  ;;  %v6473_v40 = vmul.f32 -1.442695, %v2671_v24 }
 0xa0c   : > { %v2632_v36 = vpop.f32.mrb[14].mxu0  ;;  %v2675_v37 = vpop.f32.mrb[26].mxu1  ;;  %v6472_v41 = vmul.f32 -1.442695, %v2630_v29  ;;  %v6474_v42 = vmul.f32 -1.442695, %v2673_v35 }
 0xa0d   : > { %v2634_v10 = vpop.f32.mrb[15].mxu0  ;;  %v2677_v38 = vpop.f32.mrb[27].mxu1  ;;  %7663 = vpow2.f32 %v6471_v39  ;;  %v6475_v43 = vmul.f32 -1.442695, %v2632_v36  ;;  %v6477_v44 = vmul.f32 -1.442695, %v2675_v37 }
 0xa0e   : > { %7665 = vpow2.f32 %v6473_v40  ;;  %v6476_v45 = vmul.f32 -1.442695, %v2634_v10  ;;  %v6478_v46 = vmul.f32 -1.442695, %v2677_v38 }
 0xa0f   : > { %7667 = vpow2.f32 %v6472_v41 }
 0xa10   : > { %7669 = vpow2.f32 %v6474_v42 }
 0xa11   : > { %7671 = vpow2.f32 %v6475_v43 }
 0xa12   : > { %7673 = vpow2.f32 %v6477_v44 }
 0xa13   : > { %7675 = vpow2.f32 %v6476_v45 }
 0xa14   : > { %7677 = vpow2.f32 %v6478_v46 }
 0xa17   : > { %v7664_v47 = vpop.eup %7663 }
 0xa18   : > { %v7666_v48 = vpop.eup %7665  ;;  %v2790_v51 = vadd.f32 1.0, %v7664_v47 }
 0xa19   : > { %v7668_v49 = vpop.eup %7667  ;;  %v2792_v33 = vadd.f32 1.0, %v7666_v48  ;;  %v7303_v48 = vld [vmem:[#allocation10 + $0x100] ss:$8 sps:$4 sm:$0xff]  }
 0xa1a   : > { %v7670_v50 = vpop.eup %7669  ;;  %v2791_v54 = vadd.f32 1.0, %v7668_v49  ;;  %7679 = vrcp.f32 %v2790_v51  ;;  %v7311_v49 = vld [vmem:[#allocation10 + $0x124] ss:$8 sps:$4 sm:$0xff]   ;;  %v7314_v51 = vld [vmem:[#allocation10 + $0x134] ss:$8 sps:$4 sm:$0xff]  }
 0xa1b   : > { %v7672_v14 = vpop.eup %7671  ;;  %v2793_v56 = vadd.f32 1.0, %v7670_v50  ;;  %7681 = vrcp.f32 %v2792_v33  ;;  %v7309_v50 = vld [vmem:[#allocation10 + $0x120] ss:$8 sps:$4 sm:$0xff]   ;;  %v7317_v33 = vld [vmem:[#allocation10 + $0x144] ss:$8 sps:$4 sm:$0xff]  }
 0xa1c   : > { %v7674_v34 = vpop.eup %7673  ;;  %v2794_v58 = vadd.f32 1.0, %v7672_v14  ;;  %7683 = vrcp.f32 %v2791_v54  ;;  %v7312_v14 = vld [vmem:[#allocation10 + $0x130] ss:$8 sps:$4 sm:$0xff]   ;;  %v7320_v54 = vld [vmem:[#allocation10 + $0x154] ss:$8 sps:$4 sm:$0xff]  }
 0xa1d   : > { %v7676_v55 = vpop.eup %7675  ;;  %v2796_v19 = vadd.f32 1.0, %v7674_v34  ;;  %7685 = vrcp.f32 %v2793_v56  ;;  %v7315_v34 = vld [vmem:[#allocation10 + $0x140] ss:$8 sps:$4 sm:$0xff]   ;;  %v7323_v56 = vld [vmem:[#allocation10 + $0x164] ss:$8 sps:$4 sm:$0xff]  }
 0xa1e   : > { %v7678_v57 = vpop.eup %7677  ;;  %v2795_v15 = vadd.f32 1.0, %v7676_v55  ;;  %7687 = vrcp.f32 %v2794_v58  ;;  %v7318_v55 = vld [vmem:[#allocation10 + $0x150] ss:$8 sps:$4 sm:$0xff]   ;;  %v7326_v58 = vld [vmem:[#allocation10 + $0x174] ss:$8 sps:$4 sm:$0xff]  }
 0xa1f   : > { %v2797_v25 = vadd.f32 1.0, %v7678_v57  ;;  %7689 = vrcp.f32 %v2796_v19  ;;  %v7321_v57 = vld [vmem:[#allocation10 + $0x160] ss:$8 sps:$4 sm:$0xff]   ;;  %v7324_v19 = vld [vmem:[#allocation10 + $0x170] ss:$8 sps:$4 sm:$0xff]  }
 0xa20   : > { %7691 = vrcp.f32 %v2795_v15  ;;  %v7329_v15 = vld [vmem:[#allocation10 + $0x184] ss:$8 sps:$4 sm:$0xff]  }
 0xa21   : > { %7693 = vrcp.f32 %v2797_v25  ;;  %v7327_v25 = vld [vmem:[#allocation10 + $0x180] ss:$8 sps:$4 sm:$0xff]  }
 0xa24   : > { %v7680_v27 = vpop.eup %7679 }
 0xa25   : > { %v7682_v16 = vpop.eup %7681  ;;  %v2814_v23 = vmul.f32 %v7680_v27, %v2628_v22  ;;  %v7332_v27 = vld [vmem:[#allocation10 + $0x194] ss:$8 sps:$4 sm:$0xff]  }
 0xa26   : > { %v7684_v60 = vpop.eup %7683  ;;  %v2816_v2 = vmul.f32 %v7682_v16, %v2671_v24  ;;  %v7330_v16 = vld [vmem:[#allocation10 + $0x190] ss:$8 sps:$4 sm:$0xff]  }
 0xa27   : > { %v7686_v62 = vpop.eup %7685  ;;  %v2815_v32 = vmul.f32 %v7684_v60, %v2630_v29  ;;  %v7335_v60 = vld [vmem:[#allocation10 + $0x1a4] ss:$8 sps:$4 sm:$0xff]  }
 0xa28   : > { %v7688_v63 = vpop.eup %7687  ;;  %v2817_v31 = vmul.f32 %v7686_v62, %v2673_v35  ;;  %v7333_v62 = vld [vmem:[#allocation10 + $0x1a0] ss:$8 sps:$4 sm:$0xff]  }
 0xa29   : > { %v7690_v26 = vpop.eup %7689  ;;  %v2818_v5 = vmul.f32 %v7688_v63, %v2632_v36  ;;  %v7338_v63 = vld [vmem:[#allocation10 + $0x1b4] ss:$8 sps:$4 sm:$0xff]  }
 0xa2a   : > { %v7692_v1 = vpop.eup %7691  ;;  %v2820_v30 = vmul.f32 %v7690_v26, %v2675_v37  ;;  %v7336_v26 = vld [vmem:[#allocation10 + $0x1b0] ss:$8 sps:$4 sm:$0xff]  }
 0xa2b   : > { %v7694_v28 = vpop.eup %7693  ;;  %v2819_v17 = vmul.f32 %v7692_v1, %v2634_v10  ;;  %v7308_v10 = vld [vmem:[#allocation10 + $0x114] ss:$8 sps:$4 sm:$0xff]   ;;  %v7341_v1 = vld [vmem:[#allocation10 + $0x1c4] ss:$8 sps:$4 sm:$0xff]  }
 0xa2c   : > { %v2821_v39 = vmul.f32 %v7694_v28, %v2677_v38  ;;  %v7306_v38 = vld [vmem:[#allocation10 + $0x110] ss:$8 sps:$4 sm:$0xff]   ;;  %v7339_v28 = vld [vmem:[#allocation10 + $0x1c0] ss:$8 sps:$4 sm:$0xff]  }
 0xa4a   : > { %v2714_v3 = vpop.f32.mrb[16].mxu0  ;;  %v2757_v4 = vpop.f32.mrb[28].mxu1 }
 0xa4b   : > { %v2822_v8 = vmul.f32 %v2814_v23, %v2714_v3  ;;  %v8485_v9 = vmul.f32 %v2816_v2, %v2757_v4  ;;  %v2716_v12 = vpop.f32.mrb[17].mxu0  ;;  %v2759_v13 = vpop.f32.mrb[29].mxu1  ;;  %v7344_v23 = vld [vmem:[#allocation10 + $0x1d4] ss:$8 sps:$4 sm:$0xff]   ;;  %v7342_v2 = vld [vmem:[#allocation10 + $0x1d0] ss:$8 sps:$4 sm:$0xff]  }
 0xa4c   : > { %v2823_v40 = vmul.f32 %v2815_v32, %v2716_v12  ;;  %v2825_v41 = vmul.f32 %v2817_v31, %v2759_v13  ;;  %v2718_v42 = vpop.f32.mrb[18].mxu0  ;;  %v2761_v43 = vpop.f32.mrb[30].mxu1  ;;  %v7347_v32 = vld [vmem:[#allocation10 + $0x1e4] ss:$8 sps:$4 sm:$0xff]   ;;  %v7345_v31 = vld [vmem:[#allocation10 + $0x1e0] ss:$8 sps:$4 sm:$0xff]  }
 0xa4d   : > { %v2826_v44 = vmul.f32 %v2818_v5, %v2718_v42  ;;  %v8487_v22 = vmul.f32 %v2820_v30, %v2761_v43  ;;  %v2720_v24 = vpop.f32.mrb[19].mxu0  ;;  %v2763_v29 = vpop.f32.mrb[31].mxu1  ;;  %v7350_v3 = vld [vmem:[#allocation10 + $0x1f4] ss:$8 sps:$4 sm:$0xff]   ;;  %v7348_v4 = vld [vmem:[#allocation10 + $0x1f0] ss:$8 sps:$4 sm:$0xff]  }
 0xa4e   : > { %v2827_v35 = vmul.f32 %v2819_v17, %v2720_v24  ;;  %v2829_v45 = vmul.f32 %v2821_v39, %v2763_v29  ;;  %v7351_v5 = vld [vmem:[#allocation5 + $0x300] ss:$24 sps:$4 sm:$0xff]   ;;  %v7353_v30 = vld [vmem:[#allocation5 + $0x304] ss:$24 sps:$4 sm:$0xff]   ;;  %v7356_v12 = vld [vmem:[#allocation5 + $0x314] ss:$24 sps:$4 sm:$0xff]  }
 0xa4f   : > { %v2830_v36 = vpack.c.bf16 %v2826_v44, %v2822_v8  ;;  %v2832_v37 = vpack.c.bf16 %v8487_v22, %v8485_v9  ;;  %v7354_v8 = vld [vmem:[#allocation5 + $0x310] ss:$24 sps:$4 sm:$0xff]   ;;  %v7359_v13 = vld [vmem:[#allocation5 + $0x334] ss:$24 sps:$4 sm:$0xff]   ;;  %4089 = vmatprep.subr.bf16.mxu1 %v7353_v30  ;;  %v7362_v17 = vld [vmem:[#allocation5 + $0x344] ss:$24 sps:$4 sm:$0xff]  }
 0xa50   : > { %v2831_v46 = vpack.c.bf16 %v2827_v35, %v2823_v40  ;;  %v2833_v47 = vpack.c.bf16 %v2829_v45, %v2825_v41  ;;  %4090 = vmatpush1.bf16.msra.mxu1 %v7351_v5  ;;  %v7357_v39 = vld [vmem:[#allocation5 + $0x330] ss:$24 sps:$4 sm:$0xff]   ;;  %v7360_v40 = vld [vmem:[#allocation5 + $0x340] ss:$24 sps:$4 sm:$0xff]   ;;  %v7365_v41 = vld [vmem:[#allocation5 + $0x364] ss:$24 sps:$4 sm:$0xff]  }
 0xa51   : > { %4091 = vmatprep.subr.bf16.mxu1 %v7359_v13  ;;  %v7368_v42 = vld [vmem:[#allocation5 + $0x374] ss:$24 sps:$4 sm:$0xff]   ;;  %v7363_v43 = vld [vmem:[#allocation5 + $0x360] ss:$24 sps:$4 sm:$0xff]   ;;  %v7366_v9 = vld [vmem:[#allocation5 + $0x370] ss:$24 sps:$4 sm:$0xff]  }
 0xa52   : > { %3186 = vmatprep.mubr.bf16.mxu0 %v2831_v46  ;;  %v7371_v44 = vld [vmem:[#allocation5 + $0x394] ss:$24 sps:$4 sm:$0xff]   ;;  %v7374_v22 = vld [vmem:[#allocation5 + $0x3a4] ss:$24 sps:$4 sm:$0xff]   ;;  %v7369_v24 = vld [vmem:[#allocation5 + $0x390] ss:$24 sps:$4 sm:$0xff]  }
 0xa53   : > { %3187 = vmatmul.mubr.bf16.vlgmr.msra.gmra.mrb[20].mxu0 %v2830_v36  ;;  %v7372_v29 = vld [vmem:[#allocation5 + $0x3a0] ss:$24 sps:$4 sm:$0xff]   ;;  %v7377_v35 = vld [vmem:[#allocation5 + $0x3c4] ss:$24 sps:$4 sm:$0xff]   ;;  %v7380_v45 = vld [vmem:[#allocation5 + $0x3d4] ss:$24 sps:$4 sm:$0xff]  }
 0xa54   : > { %3198 = vmatpush1.bf16.msra.mxu0 %v7303_v48  ;;  %3229 = vmatprep.mubr.bf16.mxu0 %v2833_v47  ;;  %v7375_v36 = vld [vmem:[#allocation5 + $0x3c0] ss:$24 sps:$4 sm:$0xff]   ;;  %v7383_v46 = vld [vmem:[#allocation5 + $0x3f4] ss:$24 sps:$4 sm:$0xff]   ;;  %v7386_v47 = vld [vmem:[#allocation5 + $0x404] ss:$24 sps:$4 sm:$0xff]  }
 0xa55   : > { %3199 = vmatprep.subr.bf16.mxu0 %v7308_v10  ;;  %4092 = vmatpush1.bf16.msra.mxu1 %v7357_v39  ;;  %v7381_v48 = vld [vmem:[#allocation5 + $0x3f0] ss:$24 sps:$4 sm:$0xff]   ;;  %v7384_v10 = vld [vmem:[#allocation5 + $0x400] ss:$24 sps:$4 sm:$0xff]   ;;  %v7416_v5 = vld [vmem:[#allocation5 + $0x4f4] ss:$24 sps:$4 sm:$0xff]  }
 0xa56   : > { %4093 = vmatprep.subr.bf16.mxu1 %v7365_v41  ;;  %v7414_v30 = vld [vmem:[#allocation5 + $0x4f0] ss:$24 sps:$4 sm:$0xff]   ;;  %v7420_v13 = vld [vmem:[#allocation5 + $0x520] ss:$24 sps:$4 sm:$0xff]   ;;  %v7425_v39 = vld [vmem:[#allocation5 + $0x544] ss:$24 sps:$4 sm:$0xff]  }
 0xa57   : > { %v7428_v41 = vld [vmem:[#allocation5 + $0x554] ss:$24 sps:$4 sm:$0xff]  }
 0xa58   : > { %3200 = vmatpush1.bf16.msra.mxu0 %v7306_v38  ;;  %v7389_v38 = vld [vmem:[#allocation5 + $0x424] ss:$24 sps:$4 sm:$0xff]  }
 0xa59   : > { %3201 = vmatprep.subr.bf16.mxu0 %v7311_v49  ;;  %4094 = vmatpush1.bf16.msra.mxu1 %v7363_v43  ;;  %v7392_v49 = vld [vmem:[#allocation5 + $0x434] ss:$24 sps:$4 sm:$0xff]   ;;  %v7434_v43 = vld [vmem:[#allocation5 + $0x584] ss:$24 sps:$4 sm:$0xff]  }
 0xa5a   : > { %4095 = vmatprep.subr.bf16.mxu1 %v7371_v44  ;;  %v7432_v44 = vld [vmem:[#allocation5 + $0x580] ss:$24 sps:$4 sm:$0xff]  }
 0xa5c   : > { %3202 = vmatpush1.bf16.msra.mxu0 %v7309_v50  ;;  %v7387_v50 = vld [vmem:[#allocation5 + $0x420] ss:$24 sps:$4 sm:$0xff]  }
 0xa5d   : > { %3203 = vmatprep.subr.bf16.mxu0 %v7314_v51  ;;  %4096 = vmatpush1.bf16.msra.mxu1 %v7369_v24  ;;  %v7390_v51 = vld [vmem:[#allocation5 + $0x430] ss:$24 sps:$4 sm:$0xff]   ;;  %v7440_v24 = vld [vmem:[#allocation5 + $0x5b4] ss:$24 sps:$4 sm:$0xff]  }
 0xa5e   : > { %4097 = vmatprep.subr.bf16.mxu1 %v7377_v35  ;;  %v7438_v35 = vld [vmem:[#allocation5 + $0x5b0] ss:$24 sps:$4 sm:$0xff]  }
 0xa60   : > { %3204 = vmatpush1.bf16.msra.mxu0 %v7312_v14  ;;  %v7395_v14 = vld [vmem:[#allocation5 + $0x454] ss:$24 sps:$4 sm:$0xff]  }
 0xa61   : > { %3205 = vmatprep.subr.bf16.mxu0 %v7317_v33  ;;  %4098 = vmatpush1.bf16.msra.mxu1 %v7375_v36  ;;  %v7398_v33 = vld [vmem:[#allocation5 + $0x464] ss:$24 sps:$4 sm:$0xff]  }
 0xa62   : > { %4099 = vmatprep.subr.bf16.mxu1 %v7383_v46  ;;  %v7446_v36 = vld [vmem:[#allocation5 + $0x5e4] ss:$24 sps:$4 sm:$0xff]   ;;  %v7444_v46 = vld [vmem:[#allocation5 + $0x5e0] ss:$24 sps:$4 sm:$0xff]  }
 0xa64   : > { %3206 = vmatpush1.bf16.msra.mxu0 %v7315_v34  ;;  %v7393_v34 = vld [vmem:[#allocation5 + $0x450] ss:$24 sps:$4 sm:$0xff]  }
 0xa65   : > { %3207 = vmatprep.subr.bf16.mxu0 %v7320_v54  ;;  %4100 = vmatpush1.bf16.msra.mxu1 %v7381_v48  ;;  %v7396_v54 = vld [vmem:[#allocation5 + $0x460] ss:$24 sps:$4 sm:$0xff]  }
 0xa66   : > { %4101 = vmatprep.subr.bf16.mxu1 %v7389_v38 }
 0xa68   : > { %3208 = vmatpush1.bf16.msra.mxu0 %v7318_v55  ;;  %v7401_v55 = vld [vmem:[#allocation5 + $0x484] ss:$24 sps:$4 sm:$0xff]  }
 0xa69   : > { %3209 = vmatprep.subr.bf16.mxu0 %v7323_v56  ;;  %4102 = vmatpush1.bf16.msra.mxu1 %v7387_v50  ;;  %v7404_v56 = vld [vmem:[#allocation5 + $0x494] ss:$24 sps:$4 sm:$0xff]  }
 0xa6a   : > { %4103 = vmatprep.subr.bf16.mxu1 %v7395_v14  ;;  %v6543_v14 = vld [vmem:[%s8737_s3 + $0x2] sm:$0x3] }
 0xa6c   : > { %3210 = vmatpush1.bf16.msra.mxu0 %v7321_v57  ;;  %v7399_v57 = vld [vmem:[#allocation5 + $0x480] ss:$24 sps:$4 sm:$0xff]  }
 0xa6d   : > { %3211 = vmatprep.subr.bf16.mxu0 %v7326_v58  ;;  %4104 = vmatpush1.bf16.msra.mxu1 %v7393_v34  ;;  %v7402_v58 = vld [vmem:[#allocation5 + $0x490] ss:$24 sps:$4 sm:$0xff]  }
 0xa6e   : > { %4105 = vmatprep.subr.bf16.mxu1 %v7401_v55  ;;  %v3600_v55 = vrot.slane %v6543_v14, %v8286_v20 }
 0xa70   : > { %3212 = vmatpush1.bf16.msra.mxu0 %v7324_v19  ;;  %v7407_v19 = vld [vmem:[#allocation5 + $0x4b4] ss:$24 sps:$4 sm:$0xff]  }
 0xa71   : > { %3213 = vmatprep.subr.bf16.mxu0 %v7329_v15  ;;  %v7410_v15 = vld [vmem:[#allocation5 + $0x4c4] ss:$24 sps:$4 sm:$0xff]   ;;  %4106 = vmatpush1.bf16.msra.mxu1 %v7399_v57 }
 0xa72   : > { %4107 = vmatprep.subr.bf16.mxu1 %v7407_v19 }
 0xa74   : > { %3214 = vmatpush1.bf16.msra.mxu0 %v7327_v25  ;;  %v7405_v25 = vld [vmem:[#allocation5 + $0x4b0] ss:$24 sps:$4 sm:$0xff]  }
 0xa75   : > { %3215 = vmatprep.subr.bf16.mxu0 %v7332_v27  ;;  %v7408_v27 = vld [vmem:[#allocation5 + $0x4c0] ss:$24 sps:$4 sm:$0xff]   ;;  %4108 = vmatpush1.bf16.msra.mxu1 %v7405_v25 }
 0xa78   : > { %3216 = vmatpush1.bf16.msra.mxu0 %v7330_v16  ;;  %v7413_v16 = vld [vmem:[#allocation5 + $0x4e4] ss:$24 sps:$4 sm:$0xff]  }
 0xa79   : > { %3217 = vmatprep.subr.bf16.mxu0 %v7335_v60  ;;  %v7411_v60 = vld [vmem:[#allocation5 + $0x4e0] ss:$24 sps:$4 sm:$0xff]   ;;  %4109 = vmatprep.subr.bf16.mxu1 %v7413_v16 }
 0xa7a   : > { %4110 = vmatpush1.bf16.msra.mxu1 %v7411_v60 }
 0xa7c   : > { %3218 = vmatpush1.bf16.msra.mxu0 %v7333_v62 }
 0xa7d   : > { %3219 = vmatprep.subr.bf16.mxu0 %v7338_v63 }
 0xa80   : > { %3220 = vmatpush1.bf16.msra.mxu0 %v7336_v26 }
 0xa81   : > { %3221 = vmatprep.subr.bf16.mxu0 %v7341_v1 }
 0xa84   : > { %3222 = vmatpush1.bf16.msra.mxu0 %v7339_v28 }
 0xa85   : > { %3223 = vmatprep.subr.bf16.mxu0 %v7344_v23 }
 0xa88   : > { %3224 = vmatpush1.bf16.msra.mxu0 %v7342_v2 }
 0xa89   : > { %3225 = vmatprep.subr.bf16.mxu0 %v7347_v32 }
 0xa8c   : > { %3226 = vmatpush1.bf16.msra.mxu0 %v7345_v31 }
 0xa8d   : > { %3227 = vmatprep.subr.bf16.mxu0 %v7350_v3 }
 0xa90   : > { %3228 = vmatpush1.bf16.msra.mxu0 %v7348_v4 }
 0xa91   : > { %4175 = vmatprep.subr.bf16.mxu0 %v7356_v12  ;;  %v7422_v12 = vld [vmem:[#allocation5 + $0x524] ss:$24 sps:$4 sm:$0xff]  }
 0xa93   : > { %3230 = vmatmul.mubr.bf16.vlgmr.msra.gmra.mrb[20].mxu0 %v2832_v37  ;;  %v7378_v37 = vld [vmem:[#allocation5 + $0x3d0] ss:$24 sps:$4 sm:$0xff]  }
 0xa94   : > { %4176 = vmatpush1.bf16.msra.mxu0 %v7354_v8  ;;  %v7419_v8 = vld [vmem:[#allocation5 + $0x514] ss:$24 sps:$4 sm:$0xff]  }
 0xa95   : > { %4177 = vmatprep.subr.bf16.mxu0 %v7362_v17  ;;  %4111 = vmatprep.subr.bf16.mxu1 %v7419_v8  ;;  %v7423_v17 = vld [vmem:[#allocation5 + $0x540] ss:$24 sps:$4 sm:$0xff]   ;;  %v7467_v8 = vld [vmem:[#allocation5 + $0x42c] ss:$24 sps:$4 sm:$0xff]  }
 0xa98   : > { %4178 = vmatpush1.bf16.msra.mxu0 %v7360_v40  ;;  %v7426_v40 = vld [vmem:[#allocation5 + $0x550] ss:$24 sps:$4 sm:$0xff]  }
 0xa99   : > { %4179 = vmatprep.subr.bf16.mxu0 %v7368_v42  ;;  %v7431_v42 = vld [vmem:[#allocation5 + $0x574] ss:$24 sps:$4 sm:$0xff]  }
 0xa9c   : > { %4180 = vmatpush1.bf16.msra.mxu0 %v7366_v9  ;;  %v7429_v9 = vld [vmem:[#allocation5 + $0x570] ss:$24 sps:$4 sm:$0xff]  }
 0xa9d   : > { %4181 = vmatprep.subr.bf16.mxu0 %v7374_v22  ;;  %v7437_v22 = vld [vmem:[#allocation5 + $0x5a4] ss:$24 sps:$4 sm:$0xff]  }
 0xaa0   : > { %4182 = vmatpush1.bf16.msra.mxu0 %v7372_v29  ;;  %v7435_v29 = vld [vmem:[#allocation5 + $0x5a0] ss:$24 sps:$4 sm:$0xff]  }
 0xaa1   : > { %4183 = vmatprep.subr.bf16.mxu0 %v7380_v45  ;;  %v7443_v45 = vld [vmem:[#allocation5 + $0x5d4] ss:$24 sps:$4 sm:$0xff]  }
 0xaa4   : > { %4184 = vmatpush1.bf16.msra.mxu0 %v7378_v37  ;;  %v7441_v37 = vld [vmem:[#allocation5 + $0x5d0] ss:$24 sps:$4 sm:$0xff]  }
 0xaa5   : > { %4185 = vmatprep.subr.bf16.mxu0 %v7386_v47  ;;  %v7449_v47 = vld [vmem:[#allocation5 + $0x30c] ss:$24 sps:$4 sm:$0xff]  }
 0xaa8   : > { %4186 = vmatpush1.bf16.msra.mxu0 %v7384_v10 }
 0xaa9   : > { %4187 = vmatprep.subr.bf16.mxu0 %v7392_v49 }
 0xaac   : > { %4188 = vmatpush1.bf16.msra.mxu0 %v7390_v51 }
 0xaad   : > { %4189 = vmatprep.subr.bf16.mxu0 %v7398_v33 }
 0xab0   : > { %4190 = vmatpush1.bf16.msra.mxu0 %v7396_v54  ;;  %v3596_v54 = vrot.slane %v6543_v14, %v8289_v21 }
 0xab1   : > { %4191 = vmatprep.subr.bf16.mxu0 %v7404_v56 }
 0xab4   : > { %4192 = vmatpush1.bf16.msra.mxu0 %v7402_v58 }
 0xab5   : > { %4193 = vmatprep.subr.bf16.mxu0 %v7410_v15 }
 0xab8   : > { %4194 = vmatpush1.bf16.msra.mxu0 %v7408_v27 }
 0xab9   : > { %4195 = vmatprep.subr.bf16.mxu0 %v7416_v5  ;;  %v7464_v5 = vld [vmem:[#allocation5 + $0x3fc] ss:$24 sps:$4 sm:$0xff]  }
 0xabc   : > { %4196 = vmatpush1.bf16.msra.mxu0 %v7414_v30  ;;  %v7462_v30 = vld [vmem:[#allocation5 + $0x3f8] ss:$24 sps:$4 sm:$0xff]  }
 0xabd   : > { %4197 = vmatprep.subr.bf16.mxu0 %v7422_v12  ;;  %v7470_v12 = vld [vmem:[#allocation5 + $0x45c] ss:$24 sps:$4 sm:$0xff]  }
 0xac0   : > { %4198 = vmatpush1.bf16.msra.mxu0 %v7420_v13  ;;  %v7468_v13 = vld [vmem:[#allocation5 + $0x458] ss:$24 sps:$4 sm:$0xff]  }
 0xac1   : > { %4199 = vmatprep.subr.bf16.mxu0 %v7428_v41  ;;  %v7474_v41 = vld [vmem:[#allocation5 + $0x4b8] ss:$24 sps:$4 sm:$0xff]  }
 0xac4   : > { %4200 = vmatpush1.bf16.msra.mxu0 %v7426_v40  ;;  %v7476_v40 = vld [vmem:[#allocation5 + $0x4bc] ss:$24 sps:$4 sm:$0xff]  }
 0xac5   : > { %4201 = vmatprep.subr.bf16.mxu0 %v7434_v43  ;;  %v7477_v43 = vld [vmem:[#allocation5 + $0x4e8] ss:$24 sps:$4 sm:$0xff]  }
 0xac8   : > { %4202 = vmatpush1.bf16.msra.mxu0 %v7432_v44  ;;  %v7480_v44 = vld [vmem:[#allocation5 + $0x518] ss:$24 sps:$4 sm:$0xff]  }
 0xac9   : > { %4203 = vmatprep.subr.bf16.mxu0 %v7440_v24  ;;  %v7483_v24 = vld [vmem:[#allocation5 + $0x548] ss:$24 sps:$4 sm:$0xff]  }
 0xacc   : > { %4204 = vmatpush1.bf16.msra.mxu0 %v7438_v35  ;;  %v7486_v35 = vld [vmem:[#allocation5 + $0x578] ss:$24 sps:$4 sm:$0xff]  }
 0xacd   : > { %4205 = vmatprep.subr.bf16.mxu0 %v7446_v36  ;;  %v7489_v36 = vld [vmem:[#allocation5 + $0x5a8] ss:$24 sps:$4 sm:$0xff]  }
 0xad0   : > { %4206 = vmatpush1.bf16.msra.mxu0 %v7444_v46  ;;  %v7492_v46 = vld [vmem:[#allocation5 + $0x5d8] ss:$24 sps:$4 sm:$0xff]  }
 0xad1   : > { %4570 = vmatprep.subr.bf16.mxu0 %v7497_v53  ;;  %v3392_v53 = vld [vmem:[#allocation8 + $0x468] sm:$0xff] }
 0xb66   : > { %v3231_v62 = vpop.f32.mrb[20].mxu0 }
 0xb67   : > { %v8495_v63 = vadd.f32 %v3231_v62, %v8449_v59  ;;  %v3233_v26 = vpop.f32.mrb[21].mxu0  ;;  %v7447_v62 = vld [vmem:[#allocation5 + $0x308] ss:$24 sps:$4 sm:$0xff]  }
 0xb68   : > { %v8498_v1 = vadd.f32 %v3233_v26, %v8453_v61  ;;  %v3235_v28 = vpop.f32.mrb[22].mxu0 }
 0xb69   : > { %v8501_v23 = vadd.f32 %v3235_v28, %v8457_v11  ;;  %v3237_v2 = vpop.f32.mrb[23].mxu0  ;;  %v3572_v32 = vmul.f32 %v8495_v63, %v8495_v63  ;;  %v7452_v28 = vld [vmem:[#allocation5 + $0x33c] ss:$24 sps:$4 sm:$0xff]  }
 0xb6a   : > { %v8506_v31 = vadd.f32 %v3237_v2, %v8462_v0  ;;  %v3573_v3 = vmul.f32 %v8498_v1, %v8498_v1  ;;  %v7417_v0 = vld [vmem:[#allocation5 + $0x510] ss:$24 sps:$4 sm:$0xff]  }
 0xb6b   : > { %v3574_v59 = vmul.f32 %v8501_v23, %v8501_v23  ;;  %4112 = vmatpush1.bf16.msra.mxu1 %v7417_v0  ;;  %v7450_v2 = vld [vmem:[#allocation5 + $0x338] ss:$24 sps:$4 sm:$0xff]   ;;  %v7465_v0 = vld [vmem:[#allocation5 + $0x428] ss:$24 sps:$4 sm:$0xff]  }
 0xb6c   : > { %v3576_v4 = vadd.f32 %v3573_v3, %v3572_v32  ;;  %v3575_v61 = vmul.f32 %v8506_v31, %v8506_v31  ;;  %4113 = vmatprep.subr.bf16.mxu1 %v7425_v39  ;;  %v7455_v32 = vld [vmem:[#allocation5 + $0x36c] ss:$24 sps:$4 sm:$0xff]   ;;  %v7453_v3 = vld [vmem:[#allocation5 + $0x368] ss:$24 sps:$4 sm:$0xff]  }
 0xb6d   : > { %v7471_v39 = vld [vmem:[#allocation5 + $0x488] ss:$24 sps:$4 sm:$0xff]  }
 0xb6e   : > { %3577 = vadd.xlane.f32.xlu0 %v3576_v4  ;;  %v3579_v11 = vadd.f32 %v3575_v61, %v3574_v59  ;;  %v7458_v59 = vld [vmem:[#allocation5 + $0x39c] ss:$24 sps:$4 sm:$0xff]   ;;  %v7456_v4 = vld [vmem:[#allocation5 + $0x398] ss:$24 sps:$4 sm:$0xff]   ;;  %v7461_v61 = vld [vmem:[#allocation5 + $0x3cc] ss:$24 sps:$4 sm:$0xff]  }
 0xb6f   : > { %4114 = vmatpush1.bf16.msra.mxu1 %v7423_v17  ;;  %v7473_v17 = vld [vmem:[#allocation5 + $0x48c] ss:$24 sps:$4 sm:$0xff]  }
 0xb70   : > { %3580 = vadd.xlane.f32.xlu1 %v3579_v11  ;;  %4115 = vmatprep.subr.bf16.mxu1 %v7431_v42  ;;  %v7459_v11 = vld [vmem:[#allocation5 + $0x3c8] ss:$24 sps:$4 sm:$0xff]   ;;  %v7479_v42 = vld [vmem:[#allocation5 + $0x4ec] ss:$24 sps:$4 sm:$0xff]  }
 0xb73   : > { %4116 = vmatpush1.bf16.msra.mxu1 %v7429_v9  ;;  %v7482_v9 = vld [vmem:[#allocation5 + $0x51c] ss:$24 sps:$4 sm:$0xff]  }
 0xb74   : > { %4117 = vmatprep.subr.bf16.mxu1 %v7437_v22  ;;  %v7485_v22 = vld [vmem:[#allocation5 + $0x54c] ss:$24 sps:$4 sm:$0xff]  }
 0xb77   : > { %4118 = vmatpush1.bf16.msra.mxu1 %v7435_v29  ;;  %v7488_v29 = vld [vmem:[#allocation5 + $0x57c] ss:$24 sps:$4 sm:$0xff]  }
 0xb78   : > { %4119 = vmatprep.subr.bf16.mxu1 %v7443_v45  ;;  %v7491_v45 = vld [vmem:[#allocation5 + $0x5ac] ss:$24 sps:$4 sm:$0xff]  }
 0xb7b   : > { %4120 = vmatpush1.bf16.msra.mxu1 %v7441_v37  ;;  %v7494_v37 = vld [vmem:[#allocation5 + $0x5dc] ss:$24 sps:$4 sm:$0xff]  }
 0xb7c   : > { %4132 = vmatprep.subr.bf16.mxu1 %v7449_v47 }
 0xbfb   : > { %v3578_v48 = vpop.xlane.xlu0 %3577 }
 0xbfc   : > { %v3582_v10 = vmul.f32 0.00390625, %v3578_v48 }
 0xbfd   : > { %v3581_v38 = vpop.xlane.xlu1 %3580 }
 0xbfe   : > { %v3584_v49 = vadd.f32 1e-06, %v3582_v10  ;;  %v3583_v50 = vmul.f32 0.00390625, %v3581_v38 }
 0xc00   : > { %7695 = vrsqrt.f32 %v3584_v49  ;;  %v3585_v51 = vadd.f32 1e-06, %v3583_v50 }
 0xc02   : > { %7697 = vrsqrt.f32 %v3585_v51 }
 0xc0a   : > { %v7696_v33 = vpop.eup %7695 }
 0xc0b   : > { %v3589_v34 = vmul.f32 %v7696_v33, %v8498_v1  ;;  %v3588_v56 = vmul.f32 %v7696_v33, %v8495_v63 }
 0xc0c   : > { %v7698_v57 = vpop.eup %7697 }
 0xc0d   : > { %v3591_v58 = vmul.f32 %v7698_v57, %v8506_v31  ;;  %v3590_v19 = vmul.f32 %v7698_v57, %v8501_v23  ;;  %v3604_v15 = vmul.f32 %v3600_v55, %v3589_v34  ;;  %v3603_v27 = vmul.f32 %v3596_v54, %v3588_v56 }
 0xc0f   : > { %v3606_v25 = vmul.f32 %v3600_v55, %v3591_v58  ;;  %v3605_v16 = vmul.f32 %v3596_v54, %v3590_v19  ;;  %v8549_v19 = vld [vmem:[%s8736_s2] sm:$0xff] }
 0xc11   : > { %v3608_v60 = vpack.c.bf16 %v3606_v25, %v3604_v15  ;;  %v8523_v26 = vpack.c.bf16 %v3605_v16, %v3603_v27  ;;  %v8555_v27 = vld [vmem:[%s8735_s1] sm:$0xff] }
 0xc13   : > { %4121 = vmatprep.mubr.bf16.mxu1 %v3608_v60  ;;  %4207 = vmatprep.mubr.bf16.mxu0 %v3608_v60 }
 0xc14   : > { %4122 = vmatmul.mubr.bf16.vlgmr.msra.gmra.mrb[32].mxu1 %v8523_v26  ;;  %4208 = vmatmul.mubr.bf16.vlgmr.msra.gmra.mrb[24].mxu0 %v8523_v26 }
 0xc15   : > { %4133 = vmatpush1.bf16.msra.mxu1 %v7447_v62  ;;  %4164 = vmatprep.mubr.bf16.mxu1 %v3608_v60  ;;  %v8561_v60 = vld [vmem:[%s8735_s1 + $0x8] sm:$0xff] }
 0xc16   : > { %4134 = vmatprep.subr.bf16.mxu1 %v7452_v28  ;;  %4602 = vmatprep.mubr.bf16.mxu0 %v7993_v6 }
 0xc17   : > { %4571 = vmatpush1.bf16.msra.mxu0 %v7495_v52  ;;  %v3388_v52 = vld [vmem:[#allocation8 + $0x448] sm:$0xff] }
 0xc19   : > { %4135 = vmatpush1.bf16.msra.mxu1 %v7450_v2 }
 0xc1a   : > { %4136 = vmatprep.subr.bf16.mxu1 %v7455_v32 }
 0xc1d   : > { %4137 = vmatpush1.bf16.msra.mxu1 %v7453_v3 }
 0xc1e   : > { %4138 = vmatprep.subr.bf16.mxu1 %v7458_v59 }
 0xc21   : > { %4139 = vmatpush1.bf16.msra.mxu1 %v7456_v4 }
 0xc22   : > { %4140 = vmatprep.subr.bf16.mxu1 %v7461_v61 }
 0xc25   : > { %4141 = vmatpush1.bf16.msra.mxu1 %v7459_v11 }
 0xc26   : > { %4142 = vmatprep.subr.bf16.mxu1 %v7464_v5 }
 0xc29   : > { %4143 = vmatpush1.bf16.msra.mxu1 %v7462_v30 }
 0xc2a   : > { %4144 = vmatprep.subr.bf16.mxu1 %v7467_v8 }
 0xc2d   : > { %4145 = vmatpush1.bf16.msra.mxu1 %v7465_v0 }
 0xc2e   : > { %4146 = vmatprep.subr.bf16.mxu1 %v7470_v12 }
 0xc31   : > { %4147 = vmatpush1.bf16.msra.mxu1 %v7468_v13 }
 0xc32   : > { %4148 = vmatprep.subr.bf16.mxu1 %v7473_v17 }
 0xc35   : > { %4149 = vmatpush1.bf16.msra.mxu1 %v7471_v39 }
 0xc36   : > { %4150 = vmatprep.subr.bf16.mxu1 %v7476_v40 }
 0xc39   : > { %4151 = vmatpush1.bf16.msra.mxu1 %v7474_v41 }
 0xc3a   : > { %4152 = vmatprep.subr.bf16.mxu1 %v7479_v42 }
 0xc3d   : > { %4153 = vmatpush1.bf16.msra.mxu1 %v7477_v43 }
 0xc3e   : > { %4154 = vmatprep.subr.bf16.mxu1 %v7482_v9 }
 0xc41   : > { %4155 = vmatpush1.bf16.msra.mxu1 %v7480_v44 }
 0xc42   : > { %4156 = vmatprep.subr.bf16.mxu1 %v7485_v22 }
 0xc45   : > { %4157 = vmatpush1.bf16.msra.mxu1 %v7483_v24 }
 0xc46   : > { %4158 = vmatprep.subr.bf16.mxu1 %v7488_v29 }
 0xc49   : > { %4159 = vmatpush1.bf16.msra.mxu1 %v7486_v35 }
 0xc4a   : > { %4160 = vmatprep.subr.bf16.mxu1 %v7491_v45 }
 0xc4d   : > { %4161 = vmatpush1.bf16.msra.mxu1 %v7489_v36 }
 0xc4e   : > { %4162 = vmatprep.subr.bf16.mxu1 %v7494_v37 }
 0xc51   : > { %4163 = vmatpush1.bf16.msra.mxu1 %v7492_v46 }
 0xc52   : > { %6922 = vmatprep.subr.bf16.mxu1 %v7990_v7 }
 0xc54   : > { %4165 = vmatmul.mubr.bf16.vlgmr.msra.gmra.mrb[36].mxu1 %v8523_v26  ;;  %v8567_v26 = vld [vmem:[%s8736_s2 + $0x8] sm:$0xff] }
 0xc55   : > { %6924 = vmatprep.mubr.msk.bf16.mxu1 %vm7992_vm0, %v7990_v7 }
 0xce7   : > { %v4123_v47 = vpop.f32.mrb[32].mxu1  ;;  %v4209_v48 = vpop.f32.mrb[24].mxu0 }
 0xce8   : > { %v8532_v10 = vpop.f32.mrb[33].mxu1  ;;  %v8534_v38 = vpop.f32.mrb[25].mxu0  ;;  %v4218_v61 = vmul.f32 %v8555_v27, %v4123_v47 }
 0xce9   : > { %v4127_v49 = vpop.f32.mrb[34].mxu1  ;;  %v4213_v50 = vpop.f32.mrb[26].mxu0 }
 0xcea   : > { %v4308_v51 = vpack.c.bf16 %v4213_v50, %v4209_v48  ;;  %v8536_v14 = vpop.f32.mrb[35].mxu1  ;;  %v8538_v33 = vpop.f32.mrb[27].mxu0  ;;  %v4219_v11 = vmul.f32 %v8561_v60, %v4127_v49 }
 0xceb   : > { %v4444_v34 = vpack.c.bf16 %v8538_v33, %v8534_v38 }
 0xd27   : > { %v4166_v54 = vpop.f32.mrb[36].mxu1 }
 0xd28   : > { %4230 = vrot.lane.b32.xlu0 %v4166_v54, %s7991_s18  ;;  %v4168_v55 = vpop.f32.mrb[37].mxu1  ;;  %v4228_v16 = vmul.f32 %v8555_v27, %v4166_v54 }
 0xd29   : > { %v4170_v56 = vpop.f32.mrb[38].mxu1 }
 0xd2a   : > { %4232 = vrot.lane.b32.xlu1 %v4170_v56, %s7991_s18  ;;  %v4172_v57 = vpop.f32.mrb[39].mxu1  ;;  %v4229_v62 = vmul.f32 %v8561_v60, %v4170_v56 }
 0xd2b   : > { %v4365_v50 = vmul.f32 %v8561_v60, %v4172_v57 }
 0xd2c   : > { %4222 = vrot.lane.b32.xlu0 %v4127_v49, %s7991_s18  ;;  %v4364_v49 = vmul.f32 %v8555_v27, %v4168_v55 }
 0xd2e   : > { %4220 = vrot.lane.b32.xlu1 %v4123_v47, %s7991_s18 }
 0xd9a   : > { %v4231_v58 = vpop.permute.xlu0 %4230 }
 0xd9b   : > { %v4234_v15 = vmul.f32 %v8549_v19, %v4231_v58 }
 0xd9c   : > { %v4233_v25 = vpop.permute.xlu1 %4232 }
 0xd9d   : > { %v4235_v28 = vmul.f32 %v8567_v26, %v4233_v25  ;;  %v4236_v32 = vadd.f32 %v4234_v15, %v4228_v16 }
 0xd9e   : > { %v4223_v2 = vpop.permute.xlu0 %4222 }
 0xd9f   : > { %v4237_v3 = vadd.f32 %v4235_v28, %v4229_v62  ;;  %v4225_v59 = vmul.f32 %v8567_v26, %v4223_v2 }
 0xda0   : > { %v4221_v4 = vpop.permute.xlu1 %4220 }
 0xda1   : > { %v4239_v5 = vpack.c.bf16 %v4237_v3, %v4236_v32  ;;  %v4224_v30 = vmul.f32 %v8549_v19, %v4221_v4  ;;  %v4227_v8 = vadd.f32 %v4225_v59, %v4219_v11  ;;  %v4354_v3 = vmul.f32 %v8555_v27, %v8532_v10 }
 0xda2   : > { %v4355_v59 = vmul.f32 %v8561_v60, %v8536_v14 }
 0xda3   : > { %v4226_v0 = vadd.f32 %v4224_v30, %v4218_v61  ;;  %6923 = vmatpush3.bf16.xpose.msra.mxu1 %v4239_v5 }
 0xda4   : > { %6928 = vmatprep.subr.bf16.mxu1 %v7990_v7 }
 0xda5   : > { %v4238_v12 = vpack.c.bf16 %v4227_v8, %v4226_v0 }
 0xdaa   : > { %6925 = vmatmul.mubr.bf16.vlgmr.msra.gmra.mrb[40].mxu1 %v4238_v12 }
 0xdab   : > { %6929 = vmatpush3.bf16.msra.mxu1 %v4308_v51  ;;  %6930 = vmatprep.mubr.msk.bf16.mxu1 %vm7992_vm0, %v7990_v7 }
 0xdac   : > { %6934 = vmatprep.subr.bf16.mxu1 %v7990_v7 }
 0xe7d   : > { %v4274_v13 = vpop.f32.mrb[40].mxu1 }
 0xe7e   : > { %v4281_v17 = vmul.f32 0.088388346, %v4274_v13  ;;  %v6926_v39 = vpop.f32.mrb[41].mxu1 }
 0xe7f   : > { %v4277_v40 = vpop.f32.mrb[42].mxu1 }
 0xe80   : > { %v4282_v41 = vmul.f32 0.088388346, %v4277_v40  ;;  %v6927_v42 = vpop.f32.mrb[43].mxu1  ;;  %v4283_v43 = vsel %vm423_vm1, %v4281_v17, -inf }
 0xe81   : > { %v4285_v9 = vsel %vm1461_vm2, %v4283_v43, -inf }
 0xe82   : > { %4286 = vmax.xlane.f32.xlu1 %v4285_v9  ;;  %v4284_v44 = vsel %vm424_vm3, %v4282_v41, -inf }
 0xe83   : > { %v4288_v22 = vsel %vm1461_vm2, %v4284_v44, -inf }
 0xe84   : > { %4289 = vmax.xlane.f32.xlu0 %v4288_v22 }
 0xe93   : > { %4368 = vrot.lane.b32.xlu1 %v4172_v57, %s7991_s18 }
 0xe9a   : > { %4366 = vrot.lane.b32.xlu0 %v4168_v55, %s7991_s18 }
 0xf0f   : > { %v4287_v24 = vpop.xlane.xlu1 %4286 }
 0xf10   : > { %v4291_v29 = vsub.f32 %v4283_v43, %v4287_v24 }
 0xf11   : > { %v4290_v35 = vpop.xlane.xlu0 %4289 }
 0xf12   : > { %v4293_v45 = vmul.f32 1.442695, %v4291_v29  ;;  %v4292_v36 = vsub.f32 %v4284_v44, %v4290_v35 }
 0xf13   : > { %v4369_v37 = vpop.permute.xlu1 %4368 }
 0xf14   : > { %7699 = vpow2.f32 %v4293_v45  ;;  %v4295_v46 = vmul.f32 1.442695, %v4292_v36  ;;  %v4371_v47 = vmul.f32 %v8567_v26, %v4369_v37  ;;  %v7500_v37 = vld [vmem:[#allocation7 + $0x194] ss:$8 sps:$4 sm:$0xff]  }
 0xf15   : > { %v4367_v48 = vpop.permute.xlu0 %4366  ;;  %4572 = vmatprep.subr.bf16.mxu0 %v7500_v37  ;;  %v3395_v37 = vld [vmem:[#allocation8 + $0x480] sm:$0xff] }
 0xf16   : > { %7701 = vpow2.f32 %v4295_v46  ;;  %v4370_v51 = vmul.f32 %v8549_v19, %v4367_v48  ;;  %v4373_v54 = vadd.f32 %v4371_v47, %v4365_v50  ;;  %v7498_v46 = vld [vmem:[#allocation7 + $0x190] ss:$8 sps:$4 sm:$0xff]   ;;  %v7503_v47 = vld [vmem:[#allocation7 + $0x1a4] ss:$8 sps:$4 sm:$0xff]   ;;  %v7501_v48 = vld [vmem:[#allocation7 + $0x1a0] ss:$8 sps:$4 sm:$0xff]  }
 0xf17   : > { %4573 = vmatpush1.bf16.msra.mxu0 %v7498_v46  ;;  %v7504_v50 = vld [vmem:[#allocation7 + $0x1b0] ss:$8 sps:$4 sm:$0xff]   ;;  %v6686_v46 = vcombine.high %v3388_v52, %v3392_v53 }
 0xf18   : > { %v4372_v56 = vadd.f32 %v4370_v51, %v4364_v49  ;;  %4574 = vmatprep.subr.bf16.mxu0 %v7503_v47  ;;  %v7506_v49 = vld [vmem:[#allocation7 + $0x1b4] ss:$8 sps:$4 sm:$0xff]   ;;  %v7509_v51 = vld [vmem:[#allocation7 + $0x1c4] ss:$8 sps:$4 sm:$0xff]  }
 0xf19   : > { %v3399_v47 = vld [vmem:[#allocation8 + $0x4a0] sm:$0xff] }
 0xf1a   : > { %v4375_v58 = vpack.c.bf16 %v4373_v54, %v4372_v56  ;;  %v7507_v54 = vld [vmem:[#allocation7 + $0x1c0] ss:$8 sps:$4 sm:$0xff]   ;;  %v7512_v56 = vld [vmem:[#allocation7 + $0x1d4] ss:$8 sps:$4 sm:$0xff]  }
 0xf1b   : > { %4575 = vmatpush1.bf16.msra.mxu0 %v7501_v48  ;;  %v3396_v48 = vld [vmem:[#allocation8 + $0x488] sm:$0xff] }
 0xf1c   : > { %4576 = vmatprep.subr.bf16.mxu0 %v7506_v49  ;;  %v6692_v49 = vcombine.high %v3395_v37, %v3399_v47 }
 0xf1e   : > { %v7700_v15 = vpop.eup %7699 }
 0xf1f   : > { %v4297_v25 = vsel %vm1461_vm2, %v7700_v15, 0.0  ;;  %4577 = vmatpush1.bf16.msra.mxu0 %v7504_v50 }
 0xf20   : > { %v7702_v16 = vpop.eup %7701  ;;  %4298 = vadd.xlane.f32.xlu0 %v4297_v25  ;;  %4578 = vmatprep.subr.bf16.mxu0 %v7509_v51  ;;  %v7513_v25 = vld [vmem:[#allocation7 + $0x1e0] ss:$8 sps:$4 sm:$0xff]  }
 0xf21   : > { %v4300_v62 = vsel %vm1461_vm2, %v7702_v16, 0.0  ;;  %v3403_v51 = vld [vmem:[#allocation8 + $0x4c0] sm:$0xff] }
 0xf22   : > { %4301 = vadd.xlane.f32.xlu1 %v4300_v62 }
 0xf23   : > { %4579 = vmatpush1.bf16.msra.mxu0 %v7507_v54  ;;  %v3407_v54 = vld [vmem:[#allocation8 + $0x4e0] sm:$0xff] }
 0xf24   : > { %4580 = vmatprep.subr.bf16.mxu0 %v7512_v56  ;;  %v3404_v56 = vld [vmem:[#allocation8 + $0x4c8] sm:$0xff] }
 0xf33   : > { %4356 = vrot.lane.b32.xlu1 %v8532_v10, %s7991_s18 }
 0xf36   : > { %4358 = vrot.lane.b32.xlu0 %v8536_v14, %s7991_s18 }
 0xfad   : > { %v4299_v55 = vpop.xlane.xlu0 %4298 }
 0xfae   : > { %7703 = vrcp.f32 %v4299_v55 }
 0xfaf   : > { %v4302_v57 = vpop.xlane.xlu1 %4301 }
 0xfb0   : > { %7705 = vrcp.f32 %v4302_v57 }
 0xfb1   : > { %v4359_v28 = vpop.permute.xlu0 %4358 }
 0xfb2   : > { %v4361_v2 = vmul.f32 %v8567_v26, %v4359_v28 }
 0xfb3   : > { %v4357_v32 = vpop.permute.xlu1 %4356 }
 0xfb4   : > { %v4360_v4 = vmul.f32 %v8549_v19, %v4357_v32  ;;  %v4363_v61 = vadd.f32 %v4361_v2, %v4355_v59  ;;  %v7516_v59 = vld [vmem:[#allocation7 + $0x1f0] ss:$8 sps:$4 sm:$0xff]  }
 0xfb6   : > { %v4362_v11 = vadd.f32 %v4360_v4, %v4354_v3  ;;  %v7518_v3 = vld [vmem:[#allocation7 + $0x1f4] ss:$8 sps:$4 sm:$0xff]   ;;  %v7521_v4 = vld [vmem:[#allocation7 + $0x104] ss:$8 sps:$4 sm:$0xff]  }
 0xfb8   : > { %v7704_v5 = vpop.eup %7703  ;;  %v4374_v30 = vpack.c.bf16 %v4363_v61, %v4362_v11 }
 0xfb9   : > { %v4305_v0 = vmul.f32 %v7704_v5, %v7700_v15  ;;  %v7515_v15 = vld [vmem:[#allocation7 + $0x1e4] ss:$8 sps:$4 sm:$0xff]  }
 0xfba   : > { %v7706_v8 = vpop.eup %7705 }
 0xfbb   : > { %v4306_v12 = vmul.f32 %v7706_v8, %v7702_v16 }
 0xfbd   : > { %v4307_v13 = vpack.c.bf16 %v4306_v12, %v4305_v0  ;;  %v7524_v12 = vld [vmem:[#allocation7 + $0x114] ss:$8 sps:$4 sm:$0xff]  }
 0xfbf   : > { %6931 = vmatmul.mubr.msk.bf16.vlgmr.msra.gmra.mrb[44].mxu1 %vm1461_vm2, %v4307_v13  ;;  %v7522_v13 = vld [vmem:[#allocation7 + $0x110] ss:$8 sps:$4 sm:$0xff]  }
 0xfc0   : > { %6935 = vmatpush3.bf16.xpose.msra.mxu1 %v4375_v58  ;;  %6936 = vmatprep.mubr.msk.bf16.mxu1 %vm7992_vm0, %v7990_v7  ;;  %v7510_v58 = vld [vmem:[#allocation7 + $0x1d0] ss:$8 sps:$4 sm:$0xff]  }
 0xfc1   : > { %6940 = vmatprep.subr.bf16.mxu1 %v7990_v7  ;;  %4581 = vmatpush1.bf16.msra.mxu0 %v7510_v58  ;;  %v3408_v58 = vld [vmem:[#allocation8 + $0x4e8] sm:$0xff] }
 0xfc2   : > { %4582 = vmatprep.subr.bf16.mxu0 %v7515_v15  ;;  %v6691_v15 = vcombine.low %v3395_v37, %v3399_v47  ;;  %v3455_v37 = vld [vmem:[#allocation8 + $0x660] sm:$0xff]  ;;  %v3456_v47 = vld [vmem:[#allocation8 + $0x668] sm:$0xff] }
 0xfc5   : > { %4583 = vmatpush1.bf16.msra.mxu0 %v7513_v25 }
 0xfc6   : > { %4584 = vmatprep.subr.bf16.mxu0 %v7518_v3  ;;  %v6701_v3 = vcombine.low %v3404_v56, %v3408_v58 }
 0xfc7   : > { %6937 = vmatmul.mubr.bf16.vlgmr.msra.gmra.mrb[48].mxu1 %v4374_v30  ;;  %v7519_v30 = vld [vmem:[#allocation7 + $0x100] ss:$8 sps:$4 sm:$0xff]  }
 0xfc8   : > { %6941 = vmatpush3.bf16.msra.mxu1 %v4444_v34  ;;  %6942 = vmatprep.mubr.msk.bf16.mxu1 %vm7992_vm0, %v7990_v7 }
 0xfc9   : > { %4585 = vmatpush1.bf16.msra.mxu0 %v7516_v59 }
 0xfca   : > { %4693 = vmatprep.subr.bf16.mxu0 %v7521_v4 }
0x1092   : > { %v8613_v10 = vpop.f32.mrb[44].mxu1 }
0x1093   : > { %v6932_v14 = vpop.f32.mrb[45].mxu1 }
0x1094   : > { %v8615_v19 = vpop.f32.mrb[46].mxu1  ;;  %v7527_v14 = vld [vmem:[#allocation7 + $0x124] ss:$8 sps:$4 sm:$0xff]  }
0x1095   : > { %v4353_v27 = vpack.c.bf16 %v8615_v19, %v8613_v10  ;;  %v6933_v60 = vpop.f32.mrb[47].mxu1  ;;  %v3400_v10 = vld [vmem:[#allocation8 + $0x4a8] sm:$0xff] }
0x1096   : > { %v7525_v60 = vld [vmem:[#allocation7 + $0x120] ss:$8 sps:$4 sm:$0xff]   ;;  %v6694_v50 = vcombine.high %v3396_v48, %v3400_v10  ;;  %v6693_v25 = vcombine.low %v3396_v48, %v3400_v10 }
0x109a   : > { %v4410_v26 = vpop.f32.mrb[48].mxu1 }
0x109b   : > { %v4417_v17 = vmul.f32 0.088388346, %v4410_v26  ;;  %v6938_v39 = vpop.f32.mrb[49].mxu1  ;;  %v7530_v26 = vld [vmem:[#allocation7 + $0x134] ss:$8 sps:$4 sm:$0xff]  }
0x109c   : > { %v4413_v40 = vpop.f32.mrb[50].mxu1  ;;  %v7533_v39 = vld [vmem:[#allocation7 + $0x144] ss:$8 sps:$4 sm:$0xff]  }
0x109d   : > { %v4418_v41 = vmul.f32 0.088388346, %v4413_v40  ;;  %v6939_v42 = vpop.f32.mrb[51].mxu1  ;;  %v4419_v38 = vsel %vm423_vm1, %v4417_v17, -inf  ;;  %v7528_v17 = vld [vmem:[#allocation7 + $0x130] ss:$8 sps:$4 sm:$0xff]  }
0x109e   : > { %v4421_v7 = vsel %vm1461_vm2, %v4419_v38, -inf  ;;  %v7531_v40 = vld [vmem:[#allocation7 + $0x140] ss:$8 sps:$4 sm:$0xff]   ;;  %v7534_v42 = vld [vmem:[#allocation7 + $0x150] ss:$8 sps:$4 sm:$0xff]  }
0x109f   : > { %4422 = vmax.xlane.f32.xlu1 %v4421_v7  ;;  %v4420_v33 = vsel %vm424_vm3, %v4418_v41, -inf  ;;  %v7536_v41 = vld [vmem:[#allocation7 + $0x154] ss:$8 sps:$4 sm:$0xff]  }
0x10a0   : > { %v4424_v34 = vsel %vm1461_vm2, %v4420_v33, -inf  ;;  %v7542_v7 = vld [vmem:[#allocation7 + $0x174] ss:$8 sps:$4 sm:$0xff]  }
0x10a1   : > { %4425 = vmax.xlane.f32.xlu0 %v4424_v34  ;;  %v3379_v34 = vld [vmem:[#allocation8 + $0x400] sm:$0xff] }
0x112c   : > { %v4423_v43 = vpop.xlane.xlu1 %4422 }
0x112d   : > { %v4427_v9 = vsub.f32 %v4419_v38, %v4423_v43  ;;  %v7539_v38 = vld [vmem:[#allocation7 + $0x164] ss:$8 sps:$4 sm:$0xff]  }
0x112e   : > { %v4426_v44 = vpop.xlane.xlu0 %4425  ;;  %v3383_v43 = vld [vmem:[#allocation8 + $0x420] sm:$0xff] }
0x112f   : > { %v4429_v22 = vmul.f32 1.442695, %v4427_v9  ;;  %v4428_v24 = vsub.f32 %v4420_v33, %v4426_v44  ;;  %v7540_v33 = vld [vmem:[#allocation7 + $0x170] ss:$8 sps:$4 sm:$0xff]   ;;  %v3380_v9 = vld [vmem:[#allocation8 + $0x408] sm:$0xff]  ;;  %v6675_v44 = vcombine.low %v3379_v34, %v3383_v43 }
0x1131   : > { %7707 = vpow2.f32 %v4429_v22  ;;  %v4431_v29 = vmul.f32 1.442695, %v4428_v24  ;;  %v6676_v22 = vcombine.high %v3379_v34, %v3383_v43  ;;  %v3384_v24 = vld [vmem:[#allocation8 + $0x428] sm:$0xff] }
0x1133   : > { %7709 = vpow2.f32 %v4431_v29  ;;  %v3387_v29 = vld [vmem:[#allocation8 + $0x440] sm:$0xff]  ;;  %5417 = vmatprep.subr.bf16.mxu1 %v6676_v22 }
0x1134   : > { %v3443_v22 = vld [vmem:[#allocation8 + $0x600] sm:$0xff] }
0x113b   : > { %v7708_v18 = vpop.eup %7707 }
0x113c   : > { %v4433_v35 = vsel %vm1461_vm2, %v7708_v18, 0.0 }
0x113d   : > { %v7710_v45 = vpop.eup %7709  ;;  %4434 = vadd.xlane.f32.xlu0 %v4433_v35  ;;  %v6677_v35 = vcombine.low %v3380_v9, %v3384_v24 }
0x113e   : > { %v4436_v36 = vsel %vm1461_vm2, %v7710_v45, 0.0 }
0x113f   : > { %4437 = vadd.xlane.f32.xlu1 %v4436_v36 }
0x11ca   : > { %v4435_v16 = vpop.xlane.xlu0 %4434 }
0x11cb   : > { %7711 = vrcp.f32 %v4435_v16  ;;  %v6700_v16 = vcombine.high %v3403_v51, %v3407_v54 }
0x11cc   : > { %v4438_v62 = vpop.xlane.xlu1 %4437 }
0x11cd   : > { %7713 = vrcp.f32 %v4438_v62  ;;  %v6702_v62 = vcombine.high %v3404_v56, %v3408_v58 }
0x11d5   : > { %v7712_v55 = vpop.eup %7711 }
0x11d6   : > { %v4441_v28 = vmul.f32 %v7712_v55, %v7708_v18  ;;  %v3391_v18 = vld [vmem:[#allocation8 + $0x460] sm:$0xff] }
0x11d7   : > { %v7714_v57 = vpop.eup %7713  ;;  %v6684_v36 = vcombine.high %v3387_v29, %v3391_v18  ;;  %v6683_v19 = vcombine.low %v3387_v29, %v3391_v18  ;;  %v3411_v55 = vld [vmem:[#allocation8 + $0x500] sm:$0xff]  ;;  %v3444_v29 = vld [vmem:[#allocation8 + $0x608] sm:$0xff] }
0x11d8   : > { %v4442_v2 = vmul.f32 %v7714_v57, %v7710_v45  ;;  %v6678_v45 = vcombine.high %v3380_v9, %v3384_v24  ;;  %v3415_v57 = vld [vmem:[#allocation8 + $0x520] sm:$0xff]  ;;  %v3448_v18 = vld [vmem:[#allocation8 + $0x628] sm:$0xff] }
0x11d9   : > { %v6708_v59 = vcombine.high %v3411_v55, %v3415_v57  ;;  %v3447_v24 = vld [vmem:[#allocation8 + $0x620] sm:$0xff]  ;;  %v6741_v10 = vcombine.low %v3444_v29, %v3448_v18 }
0x11da   : > { %v4443_v32 = vpack.c.bf16 %v4442_v2, %v4441_v28  ;;  %v3412_v28 = vld [vmem:[#allocation8 + $0x508] sm:$0xff]  ;;  %v6739_v48 = vcombine.low %v3443_v22, %v3447_v24 }
0x11db   : > { %v3416_v2 = vld [vmem:[#allocation8 + $0x528] sm:$0xff] }
0x11dc   : > { %6943 = vmatmul.mubr.msk.bf16.vlgmr.msra.gmra.mrb[52].mxu1 %vm1461_vm2, %v4443_v32  ;;  %v6699_v32 = vcombine.low %v3403_v51, %v3407_v54  ;;  %v6710_v4 = vcombine.high %v3412_v28, %v3416_v2  ;;  %v3460_v51 = vld [vmem:[#allocation8 + $0x688] sm:$0xff] }
0x11dd   : > { %5418 = vmatpush1.bf16.msra.mxu1 %v6675_v44  ;;  %v3464_v54 = vld [vmem:[#allocation8 + $0x6a8] sm:$0xff] }
0x11de   : > { %5419 = vmatprep.subr.bf16.mxu1 %v6684_v36  ;;  %v6740_v36 = vcombine.high %v3443_v22, %v3447_v24  ;;  %v3495_v22 = vld [vmem:[#allocation8 + $0x7a0] sm:$0xff] }
0x11e1   : > { %5420 = vmatpush1.bf16.msra.mxu1 %v6683_v19 }
0x11e2   : > { %5421 = vmatprep.subr.bf16.mxu1 %v6692_v49  ;;  %v3459_v49 = vld [vmem:[#allocation8 + $0x680] sm:$0xff] }
0x11e5   : > { %5422 = vmatpush1.bf16.msra.mxu1 %v6691_v15 }
0x11e6   : > { %5423 = vmatprep.subr.bf16.mxu1 %v6700_v16 }
0x11e9   : > { %5424 = vmatpush1.bf16.msra.mxu1 %v6699_v32 }
0x11ea   : > { %5425 = vmatprep.subr.bf16.mxu1 %v6708_v59 }
0x12af   : > { %v4482_v61 = vpop.f32.mrb[52].mxu1 }
0x12b0   : > { %v6944_v11 = vpop.f32.mrb[53].mxu1 }
0x12b1   : > { %v4485_v5 = vpop.f32.mrb[54].mxu1  ;;  %v3423_v11 = vld [vmem:[#allocation8 + $0x560] sm:$0xff] }
0x12b2   : > { %v4489_v8 = vpack.c.bf16 %v4485_v5, %v4482_v61  ;;  %v6945_v0 = vpop.f32.mrb[55].mxu1  ;;  %v3419_v61 = vld [vmem:[#allocation8 + $0x540] sm:$0xff]  ;;  %v3420_v5 = vld [vmem:[#allocation8 + $0x548] sm:$0xff] }
0x12b3   : > { %v6709_v0 = vcombine.low %v3412_v28, %v3416_v2 }
0x12b4   : > { %4603 = vmatmul.mubr.bf16.vlgmr.msra.gmra.mrb[28].mxu0 %v4489_v8  ;;  %v6707_v8 = vcombine.low %v3411_v55, %v3415_v57 }
0x12b5   : > { %4694 = vmatpush1.bf16.msra.mxu0 %v7519_v30  ;;  %4725 = vmatprep.mubr.bf16.mxu0 %v7993_v6  ;;  %v7537_v6 = vld [vmem:[#allocation7 + $0x160] ss:$8 sps:$4 sm:$0xff]  }
0x12b6   : > { %4695 = vmatprep.subr.bf16.mxu0 %v7524_v12  ;;  %v3424_v30 = vld [vmem:[#allocation8 + $0x568] sm:$0xff]  ;;  %v6716_v12 = vcombine.high %v3419_v61, %v3423_v11  ;;  %5426 = vmatpush1.bf16.msra.mxu1 %v6707_v8  ;;  %v3471_v8 = vld [vmem:[#allocation8 + $0x6e0] sm:$0xff] }
0x12b8   : > { %5427 = vmatprep.subr.bf16.mxu1 %v6716_v12 }
0x12b9   : > { %4696 = vmatpush1.bf16.msra.mxu0 %v7522_v13  ;;  %v6718_v13 = vcombine.high %v3420_v5, %v3424_v30 }
0x12ba   : > { %4697 = vmatprep.subr.bf16.mxu0 %v7527_v14  ;;  %v3427_v14 = vld [vmem:[#allocation8 + $0x580] sm:$0xff] }
0x12bd   : > { %4698 = vmatpush1.bf16.msra.mxu0 %v7525_v60  ;;  %v3431_v60 = vld [vmem:[#allocation8 + $0x5a0] sm:$0xff] }
0x12be   : > { %4699 = vmatprep.subr.bf16.mxu0 %v7530_v26  ;;  %v3428_v26 = vld [vmem:[#allocation8 + $0x588] sm:$0xff]  ;;  %v6723_v34 = vcombine.low %v3427_v14, %v3431_v60 }
0x12c1   : > { %4700 = vmatpush1.bf16.msra.mxu0 %v7528_v17  ;;  %v3432_v17 = vld [vmem:[#allocation8 + $0x5a8] sm:$0xff] }
0x12c2   : > { %4701 = vmatprep.subr.bf16.mxu0 %v7533_v39  ;;  %v6715_v39 = vcombine.low %v3419_v61, %v3423_v11  ;;  %v6725_v43 = vcombine.low %v3428_v26, %v3432_v17 }
0x12c4   : > { %5428 = vmatpush1.bf16.msra.mxu1 %v6715_v39  ;;  %v3476_v39 = vld [vmem:[#allocation8 + $0x708] sm:$0xff] }
0x12c5   : > { %4702 = vmatpush1.bf16.msra.mxu0 %v7531_v40  ;;  %v6717_v40 = vcombine.low %v3420_v5, %v3424_v30  ;;  %v3467_v30 = vld [vmem:[#allocation8 + $0x6c0] sm:$0xff] }
0x12c6   : > { %4703 = vmatprep.subr.bf16.mxu0 %v7536_v41  ;;  %v6724_v41 = vcombine.high %v3427_v14, %v3431_v60  ;;  %v6764_v12 = vcombine.high %v3467_v30, %v3471_v8 }
0x12c8   : > { %5429 = vmatprep.subr.bf16.mxu1 %v6724_v41  ;;  %v3480_v41 = vld [vmem:[#allocation8 + $0x728] sm:$0xff] }
0x12c9   : > { %4704 = vmatpush1.bf16.msra.mxu0 %v7534_v42  ;;  %v6726_v42 = vcombine.high %v3428_v26, %v3432_v17  ;;  %5430 = vmatpush1.bf16.msra.mxu1 %v6723_v34  ;;  %v3475_v26 = vld [vmem:[#allocation8 + $0x700] sm:$0xff]  ;;  %v3484_v34 = vld [vmem:[#allocation8 + $0x748] sm:$0xff] }
0x12ca   : > { %4705 = vmatprep.subr.bf16.mxu0 %v7539_v38  ;;  %v3435_v38 = vld [vmem:[#allocation8 + $0x5c0] sm:$0xff] }
0x12cb   : > { %v3479_v17 = vld [vmem:[#allocation8 + $0x720] sm:$0xff] }
0x12cd   : > { %4706 = vmatpush1.bf16.msra.mxu0 %v7537_v6  ;;  %v3439_v6 = vld [vmem:[#allocation8 + $0x5e0] sm:$0xff] }
0x12ce   : > { %4707 = vmatprep.subr.bf16.mxu0 %v7542_v7  ;;  %v3436_v7 = vld [vmem:[#allocation8 + $0x5c8] sm:$0xff]  ;;  %v6732_v9 = vcombine.high %v3435_v38, %v3439_v6 }
0x12d0   : > { %5431 = vmatprep.subr.bf16.mxu1 %v6732_v9  ;;  %v3488_v9 = vld [vmem:[#allocation8 + $0x768] sm:$0xff] }
0x12d1   : > { %4708 = vmatpush1.bf16.msra.mxu0 %v7540_v33  ;;  %v3440_v33 = vld [vmem:[#allocation8 + $0x5e8] sm:$0xff] }
0x12d2   : > { %5460 = vmatprep.subr.bf16.mxu0 %v6678_v45  ;;  %v6734_v44 = vcombine.high %v3436_v7, %v3440_v33  ;;  %v6733_v45 = vcombine.low %v3436_v7, %v3440_v33  ;;  %v3483_v7 = vld [vmem:[#allocation8 + $0x740] sm:$0xff] }
0x12d3   : > { %v3487_v33 = vld [vmem:[#allocation8 + $0x760] sm:$0xff] }
0x12d4   : > { %4726 = vmatmul.mubr.bf16.vlgmr.msra.gmra.mrb[28].mxu0 %v4353_v27  ;;  %v6685_v27 = vcombine.low %v3388_v52, %v3392_v53  ;;  %v6742_v52 = vcombine.high %v3444_v29, %v3448_v18  ;;  %v3451_v53 = vld [vmem:[#allocation8 + $0x640] sm:$0xff]  ;;  %v6779_v24 = vcombine.low %v3483_v7, %v3487_v33  ;;  %v6782_v29 = vcombine.high %v3484_v34, %v3488_v9  ;;  %v3492_v18 = vld [vmem:[#allocation8 + $0x788] sm:$0xff] }
0x12d5   : > { %5461 = vmatpush1.bf16.msra.mxu0 %v6677_v35  ;;  %v6731_v35 = vcombine.low %v3435_v38, %v3439_v6  ;;  %v6748_v19 = vcombine.high %v3451_v53, %v3455_v37  ;;  %v6747_v56 = vcombine.low %v3451_v53, %v3455_v37  ;;  %v6773_v38 = vcombine.low %v3476_v39, %v3480_v41  ;;  %v3499_v53 = vld [vmem:[#allocation8 + $0x7c0] sm:$0xff] }
0x12d6   : > { %5462 = vmatprep.subr.bf16.mxu0 %v6686_v46  ;;  %v3452_v46 = vld [vmem:[#allocation8 + $0x648] sm:$0xff]  ;;  %v6774_v6 = vcombine.high %v3476_v39, %v3480_v41  ;;  %v3503_v37 = vld [vmem:[#allocation8 + $0x7e0] sm:$0xff]  ;;  %v3393_v39 = vld [vmem:[#allocation8 + $0x470] sm:$0xff] }
0x12d7   : > { %5432 = vmatpush1.bf16.msra.mxu1 %v6731_v35  ;;  %v6749_v58 = vcombine.low %v3452_v46, %v3456_v47  ;;  %v3496_v35 = vld [vmem:[#allocation8 + $0x7a8] sm:$0xff]  ;;  %v3394_v41 = vld [vmem:[#allocation8 + $0x478] sm:$0xff] }
0x12d8   : > { %5433 = vmatprep.subr.bf16.mxu1 %v6740_v36 }
0x12d9   : > { %5463 = vmatpush1.bf16.msra.mxu0 %v6685_v27  ;;  %v6750_v27 = vcombine.high %v3452_v46, %v3456_v47  ;;  %v3500_v46 = vld [vmem:[#allocation8 + $0x7c8] sm:$0xff] }
0x12da   : > { %5464 = vmatprep.subr.bf16.mxu0 %v6694_v50  ;;  %v3463_v50 = vld [vmem:[#allocation8 + $0x6a0] sm:$0xff]  ;;  %v3504_v47 = vld [vmem:[#allocation8 + $0x7e8] sm:$0xff] }
0x12db   : > { %5434 = vmatpush1.bf16.msra.mxu1 %v6739_v48  ;;  %v6756_v15 = vcombine.high %v3459_v49, %v3463_v50  ;;  %v6755_v16 = vcombine.low %v3459_v49, %v3463_v50  ;;  %v6795_v49 = vcombine.low %v3499_v53, %v3503_v37  ;;  %v6797_v50 = vcombine.low %v3500_v46, %v3504_v47 }
0x12dc   : > { %5435 = vmatprep.subr.bf16.mxu1 %v6748_v19  ;;  %v6796_v19 = vcombine.high %v3499_v53, %v3503_v37  ;;  %v3413_v37 = vld [vmem:[#allocation8 + $0x510] sm:$0xff] }
0x12dd   : > { %5465 = vmatpush1.bf16.msra.mxu0 %v6693_v25  ;;  %v6758_v25 = vcombine.high %v3460_v51, %v3464_v54 }
0x12de   : > { %5466 = vmatprep.subr.bf16.mxu0 %v6702_v62  ;;  %v6757_v62 = vcombine.low %v3460_v51, %v3464_v54  ;;  %v3381_v51 = vld [vmem:[#allocation8 + $0x410] sm:$0xff] }
0x12df   : > { %5436 = vmatpush1.bf16.msra.mxu1 %v6747_v56  ;;  %v3385_v54 = vld [vmem:[#allocation8 + $0x430] sm:$0xff]  ;;  %v3382_v56 = vld [vmem:[#allocation8 + $0x418] sm:$0xff] }
0x12e0   : > { %5437 = vmatprep.subr.bf16.mxu1 %v6756_v15  ;;  %v3386_v15 = vld [vmem:[#allocation8 + $0x438] sm:$0xff] }
0x12e1   : > { %5467 = vmatpush1.bf16.msra.mxu0 %v6701_v3 }
0x12e2   : > { %5468 = vmatprep.subr.bf16.mxu0 %v6710_v4 }
0x12e3   : > { %5438 = vmatpush1.bf16.msra.mxu1 %v6755_v16  ;;  %v6681_v16 = vcombine.low %v3382_v56, %v3386_v15 }
0x12e4   : > { %5439 = vmatprep.subr.bf16.mxu1 %v6764_v12 }
0x12e5   : > { %5469 = vmatpush1.bf16.msra.mxu0 %v6709_v0  ;;  %v3468_v0 = vld [vmem:[#allocation8 + $0x6c8] sm:$0xff] }
0x12e6   : > { %5470 = vmatprep.subr.bf16.mxu0 %v6718_v13  ;;  %v3472_v13 = vld [vmem:[#allocation8 + $0x6e8] sm:$0xff] }
0x12e7   : > { %v6765_v14 = vcombine.low %v3468_v0, %v3472_v13  ;;  %v6766_v60 = vcombine.high %v3468_v0, %v3472_v13 }
0x12e9   : > { %5471 = vmatpush1.bf16.msra.mxu0 %v6717_v40  ;;  %v6772_v40 = vcombine.high %v3475_v26, %v3479_v17 }
0x12ea   : > { %5472 = vmatprep.subr.bf16.mxu0 %v6726_v42  ;;  %v6771_v42 = vcombine.low %v3475_v26, %v3479_v17  ;;  %v3389_v17 = vld [vmem:[#allocation8 + $0x450] sm:$0xff] }
0x12ed   : > { %5473 = vmatpush1.bf16.msra.mxu0 %v6725_v43  ;;  %v6780_v43 = vcombine.high %v3483_v7, %v3487_v33  ;;  %v3401_v7 = vld [vmem:[#allocation8 + $0x4b0] sm:$0xff]  ;;  %v3398_v33 = vld [vmem:[#allocation8 + $0x498] sm:$0xff] }
0x12ee   : > { %5474 = vmatprep.subr.bf16.mxu0 %v6734_v44  ;;  %v3491_v44 = vld [vmem:[#allocation8 + $0x780] sm:$0xff] }
0x12ef   : > { %v6788_v36 = vcombine.high %v3491_v44, %v3495_v22  ;;  %v6787_v48 = vcombine.low %v3491_v44, %v3495_v22 }
0x12f1   : > { %5475 = vmatpush1.bf16.msra.mxu0 %v6733_v45  ;;  %v6781_v45 = vcombine.low %v3484_v34, %v3488_v9  ;;  %v3402_v34 = vld [vmem:[#allocation8 + $0x4b8] sm:$0xff] }
0x12f2   : > { %5476 = vmatprep.subr.bf16.mxu0 %v6742_v52  ;;  %v6790_v52 = vcombine.high %v3492_v18, %v3496_v35  ;;  %v6698_v22 = vcombine.high %v3398_v33, %v3402_v34 }
0x12f5   : > { %5477 = vmatpush1.bf16.msra.mxu0 %v6741_v10  ;;  %v6789_v10 = vcombine.low %v3492_v18, %v3496_v35  ;;  %v3406_v18 = vld [vmem:[#allocation8 + $0x4d8] sm:$0xff] }
0x12f6   : > { %5478 = vmatprep.subr.bf16.mxu0 %v6750_v27  ;;  %v6798_v27 = vcombine.high %v3500_v46, %v3504_v47  ;;  %v3410_v35 = vld [vmem:[#allocation8 + $0x4f8] sm:$0xff]  ;;  %v3417_v46 = vld [vmem:[#allocation8 + $0x530] sm:$0xff] }
0x12f7   : > { %v6706_v53 = vcombine.high %v3406_v18, %v3410_v35  ;;  %v3414_v47 = vld [vmem:[#allocation8 + $0x518] sm:$0xff] }
0x12f9   : > { %5479 = vmatpush1.bf16.msra.mxu0 %v6749_v58  ;;  %v6680_v58 = vcombine.high %v3381_v51, %v3385_v54 }
0x12fa   : > { %5480 = vmatprep.subr.bf16.mxu0 %v6758_v25  ;;  %v6679_v25 = vcombine.low %v3381_v51, %v3385_v54  ;;  %v3425_v51 = vld [vmem:[#allocation8 + $0x570] sm:$0xff]  ;;  %v3422_v54 = vld [vmem:[#allocation8 + $0x558] sm:$0xff] }
0x12fd   : > { %5481 = vmatpush1.bf16.msra.mxu0 %v6757_v62  ;;  %v6682_v62 = vcombine.high %v3382_v56, %v3386_v15  ;;  %v3426_v56 = vld [vmem:[#allocation8 + $0x578] sm:$0xff] }
0x12fe   : > { %5482 = vmatprep.subr.bf16.mxu0 %v6766_v60 }
0x1301   : > { %5483 = vmatpush1.bf16.msra.mxu0 %v6765_v14 }
0x1302   : > { %5484 = vmatprep.subr.bf16.mxu0 %v6774_v6 }
0x1305   : > { %5485 = vmatpush1.bf16.msra.mxu0 %v6773_v38 }
0x1306   : > { %5486 = vmatprep.subr.bf16.mxu0 %v6782_v29  ;;  %v3409_v29 = vld [vmem:[#allocation8 + $0x4f0] sm:$0xff] }
0x1309   : > { %5487 = vmatpush1.bf16.msra.mxu0 %v6781_v45 }
0x130a   : > { %5488 = vmatprep.subr.bf16.mxu0 %v6790_v52 }
0x130d   : > { %5489 = vmatpush1.bf16.msra.mxu0 %v6789_v10 }
0x130e   : > { %5490 = vmatprep.subr.bf16.mxu0 %v6798_v27  ;;  %v6712_v27 = vcombine.high %v3413_v37, %v3417_v46 }
0x1311   : > { %5491 = vmatpush1.bf16.msra.mxu0 %v6797_v50  ;;  %v3421_v50 = vld [vmem:[#allocation8 + $0x550] sm:$0xff] }
0x1312   : > { %5546 = vmatprep.subr.bf16.mxu0 %v6682_v62  ;;  %v3429_v62 = vld [vmem:[#allocation8 + $0x590] sm:$0xff] }
0x13a7   : > { %v4727_v55 = vpop.f32.mrb[28].mxu0 }
0x13a8   : > { %v8635_v57 = vadd.f32 %v4727_v55, %v8495_v63  ;;  %v4729_v28 = vpop.f32.mrb[29].mxu0 }
0x13a9   : > { %v8638_v2 = vadd.f32 %v4729_v28, %v8498_v1  ;;  %v4731_v32 = vpop.f32.mrb[30].mxu0 }
0x13aa   : > { %v8641_v3 = vadd.f32 %v4731_v32, %v8501_v23  ;;  %v4733_v59 = vpop.f32.mrb[31].mxu0  ;;  %v4740_v4 = vmul.f32 %v8635_v57, %v8635_v57 }
0x13ab   : > { %v8646_v61 = vadd.f32 %v4733_v59, %v8506_v31  ;;  %v4741_v11 = vmul.f32 %v8638_v2, %v8638_v2  ;;  %v6763_v31 = vcombine.low %v3467_v30, %v3471_v8 }
0x13ac   : > { %v4742_v63 = vmul.f32 %v8641_v3, %v8641_v3 }
0x13ad   : > { %v4744_v5 = vadd.f32 %v4741_v11, %v4740_v4  ;;  %v4743_v1 = vmul.f32 %v8646_v61, %v8646_v61  ;;  %5440 = vmatpush1.bf16.msra.mxu1 %v6763_v31 }
0x13ae   : > { %5441 = vmatprep.subr.bf16.mxu1 %v6772_v40  ;;  %v3390_v40 = vld [vmem:[#allocation8 + $0x458] sm:$0xff] }
0x13af   : > { %4745 = vadd.xlane.f32.xlu0 %v4744_v5  ;;  %v4747_v23 = vadd.f32 %v4743_v1, %v4742_v63  ;;  %v6544_v63 = vld [vmem:[%s8740_s6 + $0x2] sm:$0x3]  ;;  %v6690_v6 = vcombine.high %v3390_v40, %v3394_v41  ;;  %v6689_v9 = vcombine.low %v3390_v40, %v3394_v41 }
0x13b0   : > { %v4764_v8 = vrot.slane %v6544_v63, %v8289_v21  ;;  %v6688_v21 = vcombine.high %v3389_v17, %v3393_v39 }
0x13b1   : > { %4748 = vadd.xlane.f32.xlu1 %v4747_v23  ;;  %5442 = vmatpush1.bf16.msra.mxu1 %v6771_v42  ;;  %v4768_v23 = vrot.slane %v6544_v63, %v8286_v20  ;;  %v3397_v20 = vld [vmem:[#allocation8 + $0x490] sm:$0xff] }
0x13b2   : > { %5443 = vmatprep.subr.bf16.mxu1 %v6780_v43  ;;  %v6687_v43 = vcombine.low %v3389_v17, %v3393_v39  ;;  %v6696_v44 = vcombine.high %v3397_v20, %v3401_v7  ;;  %v6695_v45 = vcombine.low %v3397_v20, %v3401_v7  ;;  %v3457_v20 = vld [vmem:[#allocation8 + $0x670] sm:$0xff] }
0x13b5   : > { %5444 = vmatpush1.bf16.msra.mxu1 %v6779_v24  ;;  %v3405_v24 = vld [vmem:[#allocation8 + $0x4d0] sm:$0xff] }
0x13b6   : > { %5445 = vmatprep.subr.bf16.mxu1 %v6788_v36  ;;  %v6697_v36 = vcombine.low %v3398_v33, %v3402_v34  ;;  %v6704_v52 = vcombine.high %v3405_v24, %v3409_v29  ;;  %v6703_v10 = vcombine.low %v3405_v24, %v3409_v29  ;;  %v3466_v24 = vld [vmem:[#allocation8 + $0x6b8] sm:$0xff] }
0x13b9   : > { %5446 = vmatpush1.bf16.msra.mxu1 %v6787_v48  ;;  %v3418_v48 = vld [vmem:[#allocation8 + $0x538] sm:$0xff] }
0x13ba   : > { %5447 = vmatprep.subr.bf16.mxu1 %v6796_v19  ;;  %v6705_v19 = vcombine.low %v3406_v18, %v3410_v35  ;;  %v6713_v15 = vcombine.low %v3414_v47, %v3418_v48 }
0x13bd   : > { %5448 = vmatpush1.bf16.msra.mxu1 %v6795_v49  ;;  %v6714_v49 = vcombine.high %v3414_v47, %v3418_v48 }
0x13be   : > { %5503 = vmatprep.subr.bf16.mxu1 %v6680_v58  ;;  %v6711_v58 = vcombine.low %v3413_v37, %v3417_v46  ;;  %v3474_v37 = vld [vmem:[#allocation8 + $0x6f8] sm:$0xff] }
0x143c   : > { %v4746_v55 = vpop.xlane.xlu0 %4745 }
0x143d   : > { %v4750_v28 = vmul.f32 0.00390625, %v4746_v55  ;;  %v3433_v55 = vld [vmem:[#allocation8 + $0x5b0] sm:$0xff] }
0x143e   : > { %v4749_v32 = vpop.xlane.xlu1 %4748 }
0x143f   : > { %v4752_v59 = vadd.f32 1e-06, %v4750_v28  ;;  %v4751_v4 = vmul.f32 0.00390625, %v4749_v32  ;;  %v3430_v28 = vld [vmem:[#allocation8 + $0x598] sm:$0xff] }
0x1440   : > { %v3434_v32 = vld [vmem:[#allocation8 + $0x5b8] sm:$0xff] }
0x1441   : > { %7715 = vrsqrt.f32 %v4752_v59  ;;  %v4753_v11 = vadd.f32 1e-06, %v4751_v4  ;;  %v6719_v59 = vcombine.low %v3421_v50, %v3425_v51  ;;  %v6721_v4 = vcombine.low %v3422_v54, %v3426_v56 }
0x1442   : > { %v6730_v63 = vcombine.high %v3430_v28, %v3434_v32 }
0x1443   : > { %7717 = vrsqrt.f32 %v4753_v11  ;;  %v6728_v11 = vcombine.high %v3429_v62, %v3433_v55 }
0x144b   : > { %v7716_v5 = vpop.eup %7715 }
0x144c   : > { %v4757_v1 = vmul.f32 %v7716_v5, %v8638_v2  ;;  %v4756_v30 = vmul.f32 %v7716_v5, %v8635_v57  ;;  %v3437_v5 = vld [vmem:[#allocation8 + $0x5d0] sm:$0xff] }
0x144d   : > { %v7718_v0 = vpop.eup %7717 }
0x144e   : > { %v4759_v12 = vmul.f32 %v7718_v0, %v8646_v61  ;;  %v4758_v13 = vmul.f32 %v7718_v0, %v8641_v3  ;;  %v4772_v31 = vmul.f32 %v4768_v23, %v4757_v1  ;;  %v4771_v60 = vmul.f32 %v4764_v8, %v4756_v30  ;;  %v3441_v1 = vld [vmem:[#allocation8 + $0x5f0] sm:$0xff]  ;;  %v3442_v30 = vld [vmem:[#allocation8 + $0x5f8] sm:$0xff] }
0x144f   : > { %v6729_v0 = vcombine.low %v3430_v28, %v3434_v32  ;;  %v6735_v17 = vcombine.low %v3437_v5, %v3441_v1 }
0x1450   : > { %v4774_v14 = vmul.f32 %v4768_v23, %v4759_v12  ;;  %v4773_v26 = vmul.f32 %v4764_v8, %v4758_v13  ;;  %v3438_v23 = vld [vmem:[#allocation8 + $0x5d8] sm:$0xff]  ;;  %v6727_v8 = vcombine.low %v3429_v62, %v3433_v55  ;;  %v6736_v12 = vcombine.high %v3437_v5, %v3441_v1 }
0x1451   : > { %v6738_v13 = vcombine.high %v3438_v23, %v3442_v30  ;;  %v6737_v39 = vcombine.low %v3438_v23, %v3442_v30  ;;  %v3490_v62 = vld [vmem:[#allocation8 + $0x778] sm:$0xff] }
0x1452   : > { %v4776_v42 = vpack.c.bf16 %v4774_v14, %v4772_v31  ;;  %v8663_v38 = vpack.c.bf16 %v4773_v26, %v4771_v60  ;;  %v3445_v31 = vld [vmem:[#allocation8 + $0x610] sm:$0xff]  ;;  %v3446_v60 = vld [vmem:[#allocation8 + $0x618] sm:$0xff] }
0x1453   : > { %v3449_v14 = vld [vmem:[#allocation8 + $0x630] sm:$0xff]  ;;  %v3450_v26 = vld [vmem:[#allocation8 + $0x638] sm:$0xff] }
0x1454   : > { %5449 = vmatprep.mubr.bf16.mxu1 %v4776_v42  ;;  %5492 = vmatprep.mubr.bf16.mxu0 %v4776_v42  ;;  %v6744_v40 = vcombine.high %v3445_v31, %v3449_v14  ;;  %v6746_v41 = vcombine.high %v3446_v60, %v3450_v26  ;;  %v6743_v7 = vcombine.low %v3445_v31, %v3449_v14  ;;  %v3498_v5 = vld [vmem:[#allocation8 + $0x7b8] sm:$0xff] }
0x1455   : > { %5450 = vmatmul.mubr.bf16.vlgmr.msra.gmra.mrb[56].mxu1 %v8663_v38  ;;  %5493 = vmatmul.mubr.bf16.vlgmr.msra.gmra.mrb[32].mxu0 %v8663_v38  ;;  %v6745_v33 = vcombine.low %v3446_v60, %v3450_v26  ;;  %v3506_v31 = vld [vmem:[#allocation8 + $0x7f8] sm:$0xff] }
0x1456   : > { %5504 = vmatpush1.bf16.msra.mxu1 %v6679_v25  ;;  %5547 = vmatpush1.bf16.msra.mxu0 %v6681_v16  ;;  %v6720_v25 = vcombine.high %v3421_v50, %v3425_v51  ;;  %v6722_v16 = vcombine.high %v3422_v54, %v3426_v56  ;;  %v3482_v50 = vld [vmem:[#allocation8 + $0x738] sm:$0xff] }
0x1457   : > { %5535 = vmatprep.mubr.bf16.mxu1 %v4776_v42  ;;  %5578 = vmatprep.mubr.bf16.mxu0 %v4776_v42  ;;  %v3453_v42 = vld [vmem:[#allocation8 + $0x650] sm:$0xff] }
0x1458   : > { %5505 = vmatprep.subr.bf16.mxu1 %v6688_v21  ;;  %5548 = vmatprep.subr.bf16.mxu0 %v6690_v6  ;;  %v3454_v21 = vld [vmem:[#allocation8 + $0x658] sm:$0xff]  ;;  %v6752_v34 = vcombine.high %v3453_v42, %v3457_v20  ;;  %v6751_v29 = vcombine.low %v3453_v42, %v3457_v20  ;;  %v7543_v42 = vld [vmem:[#allocation10 + $0x200] ss:$8 sps:$4 sm:$0xff]  }
0x1459   : > { %v3458_v6 = vld [vmem:[#allocation8 + $0x678] sm:$0xff] }
0x145a   : > { %5506 = vmatpush1.bf16.msra.mxu1 %v6687_v43  ;;  %5549 = vmatpush1.bf16.msra.mxu0 %v6689_v9  ;;  %v6754_v43 = vcombine.high %v3454_v21, %v3458_v6  ;;  %v3461_v9 = vld [vmem:[#allocation8 + $0x690] sm:$0xff]  ;;  %v6753_v18 = vcombine.low %v3454_v21, %v3458_v6  ;;  %v7551_v6 = vld [vmem:[#allocation10 + $0x224] ss:$8 sps:$4 sm:$0xff]  }
0x145b   : > { %5507 = vmatprep.subr.bf16.mxu1 %v6696_v44  ;;  %5550 = vmatprep.subr.bf16.mxu0 %v6698_v22  ;;  %v3465_v44 = vld [vmem:[#allocation8 + $0x6b0] sm:$0xff]  ;;  %v3462_v22 = vld [vmem:[#allocation8 + $0x698] sm:$0xff] }
0x145c   : > { %v6760_v35 = vcombine.high %v3461_v9, %v3465_v44  ;;  %v6759_v46 = vcombine.low %v3461_v9, %v3465_v44  ;;  %v6761_v47 = vcombine.low %v3462_v22, %v3466_v24  ;;  %v7548_v20 = vld [vmem:[#allocation10 + $0x214] ss:$8 sps:$4 sm:$0xff]   ;;  %v7546_v21 = vld [vmem:[#allocation10 + $0x210] ss:$8 sps:$4 sm:$0xff]   ;;  %v7555_v9 = vld [vmem:[#allocation10 + $0x240] ss:$8 sps:$4 sm:$0xff]  }
0x145d   : > { %v7558_v44 = vld [vmem:[#allocation10 + $0x250] ss:$8 sps:$4 sm:$0xff]  }
0x145e   : > { %5508 = vmatpush1.bf16.msra.mxu1 %v6695_v45  ;;  %5551 = vmatpush1.bf16.msra.mxu0 %v6697_v36  ;;  %v6762_v45 = vcombine.high %v3462_v22, %v3466_v24  ;;  %v3469_v36 = vld [vmem:[#allocation8 + $0x6d0] sm:$0xff]  ;;  %v7563_v22 = vld [vmem:[#allocation10 + $0x264] ss:$8 sps:$4 sm:$0xff]   ;;  %v7561_v24 = vld [vmem:[#allocation10 + $0x260] ss:$8 sps:$4 sm:$0xff]  }
0x145f   : > { %5509 = vmatprep.subr.bf16.mxu1 %v6704_v52  ;;  %5552 = vmatprep.subr.bf16.mxu0 %v6706_v53  ;;  %v3473_v52 = vld [vmem:[#allocation8 + $0x6f0] sm:$0xff]  ;;  %v3470_v53 = vld [vmem:[#allocation8 + $0x6d8] sm:$0xff] }
0x1460   : > { %v6768_v48 = vcombine.high %v3469_v36, %v3473_v52  ;;  %v6767_v51 = vcombine.low %v3469_v36, %v3473_v52  ;;  %v6769_v54 = vcombine.low %v3470_v53, %v3474_v37  ;;  %v7572_v36 = vld [vmem:[#allocation10 + $0x294] ss:$8 sps:$4 sm:$0xff]   ;;  %v7570_v52 = vld [vmem:[#allocation10 + $0x290] ss:$8 sps:$4 sm:$0xff]  }
0x1462   : > { %5510 = vmatpush1.bf16.msra.mxu1 %v6703_v10  ;;  %5553 = vmatpush1.bf16.msra.mxu0 %v6705_v19  ;;  %v6770_v10 = vcombine.high %v3470_v53, %v3474_v37  ;;  %v3477_v19 = vld [vmem:[#allocation8 + $0x710] sm:$0xff]  ;;  %v7575_v53 = vld [vmem:[#allocation10 + $0x2a4] ss:$8 sps:$4 sm:$0xff]   ;;  %v7573_v37 = vld [vmem:[#allocation10 + $0x2a0] ss:$8 sps:$4 sm:$0xff]  }
0x1463   : > { %5511 = vmatprep.subr.bf16.mxu1 %v6712_v27  ;;  %5554 = vmatprep.subr.bf16.mxu0 %v6714_v49  ;;  %v3481_v27 = vld [vmem:[#allocation8 + $0x730] sm:$0xff]  ;;  %v3478_v49 = vld [vmem:[#allocation8 + $0x718] sm:$0xff] }
0x1464   : > { %v6776_v56 = vcombine.high %v3477_v19, %v3481_v27  ;;  %v6775_v55 = vcombine.low %v3477_v19, %v3481_v27  ;;  %v6777_v28 = vcombine.low %v3478_v49, %v3482_v50  ;;  %v7584_v19 = vld [vmem:[#allocation10 + $0x2d4] ss:$8 sps:$4 sm:$0xff]   ;;  %v7582_v27 = vld [vmem:[#allocation10 + $0x2d0] ss:$8 sps:$4 sm:$0xff]  }
0x1466   : > { %5512 = vmatpush1.bf16.msra.mxu1 %v6711_v58  ;;  %5555 = vmatpush1.bf16.msra.mxu0 %v6713_v15  ;;  %v6778_v58 = vcombine.high %v3478_v49, %v3482_v50  ;;  %v3485_v15 = vld [vmem:[#allocation8 + $0x750] sm:$0xff]  ;;  %v7585_v49 = vld [vmem:[#allocation10 + $0x2e0] ss:$8 sps:$4 sm:$0xff]   ;;  %v7587_v50 = vld [vmem:[#allocation10 + $0x2e4] ss:$8 sps:$4 sm:$0xff]  }
0x1467   : > { %5513 = vmatprep.subr.bf16.mxu1 %v6720_v25  ;;  %5556 = vmatprep.subr.bf16.mxu0 %v6722_v16  ;;  %v3489_v25 = vld [vmem:[#allocation8 + $0x770] sm:$0xff]  ;;  %v3486_v16 = vld [vmem:[#allocation8 + $0x758] sm:$0xff] }
0x1468   : > { %v6784_v32 = vcombine.high %v3485_v15, %v3489_v25  ;;  %v6783_v1 = vcombine.low %v3485_v15, %v3489_v25  ;;  %v6785_v23 = vcombine.low %v3486_v16, %v3490_v62 }
0x146a   : > { %5514 = vmatpush1.bf16.msra.mxu1 %v6719_v59  ;;  %5557 = vmatpush1.bf16.msra.mxu0 %v6721_v4  ;;  %v6786_v59 = vcombine.high %v3486_v16, %v3490_v62  ;;  %v3493_v4 = vld [vmem:[#allocation8 + $0x790] sm:$0xff] }
0x146b   : > { %5515 = vmatprep.subr.bf16.mxu1 %v6728_v11  ;;  %5558 = vmatprep.subr.bf16.mxu0 %v6730_v63  ;;  %v3497_v11 = vld [vmem:[#allocation8 + $0x7b0] sm:$0xff]  ;;  %v3494_v63 = vld [vmem:[#allocation8 + $0x798] sm:$0xff] }
0x146c   : > { %v6792_v30 = vcombine.high %v3493_v4, %v3497_v11  ;;  %v6791_v14 = vcombine.low %v3493_v4, %v3497_v11  ;;  %v6793_v60 = vcombine.low %v3494_v63, %v3498_v5 }
0x146e   : > { %5516 = vmatpush1.bf16.msra.mxu1 %v6727_v8  ;;  %5559 = vmatpush1.bf16.msra.mxu0 %v6729_v0  ;;  %v6794_v8 = vcombine.high %v3494_v63, %v3498_v5  ;;  %v3501_v0 = vld [vmem:[#allocation8 + $0x7d0] sm:$0xff] }
0x146f   : > { %5517 = vmatprep.subr.bf16.mxu1 %v6736_v12  ;;  %5560 = vmatprep.subr.bf16.mxu0 %v6738_v13  ;;  %v3505_v12 = vld [vmem:[#allocation8 + $0x7f0] sm:$0xff]  ;;  %v3502_v13 = vld [vmem:[#allocation8 + $0x7d8] sm:$0xff] }
0x1470   : > { %v6800_v26 = vcombine.high %v3501_v0, %v3505_v12 }
0x1472   : > { %5518 = vmatpush1.bf16.msra.mxu1 %v6735_v17  ;;  %5561 = vmatpush1.bf16.msra.mxu0 %v6737_v39  ;;  %v6802_v17 = vcombine.high %v3502_v13, %v3506_v31  ;;  %v6799_v39 = vcombine.low %v3501_v0, %v3505_v12 }
0x1473   : > { %5519 = vmatprep.subr.bf16.mxu1 %v6744_v40  ;;  %5562 = vmatprep.subr.bf16.mxu0 %v6746_v41  ;;  %v6801_v40 = vcombine.low %v3502_v13, %v3506_v31  ;;  %v7545_v41 = vld [vmem:[#allocation10 + $0x204] ss:$8 sps:$4 sm:$0xff]  }
0x1476   : > { %5520 = vmatpush1.bf16.msra.mxu1 %v6743_v7  ;;  %5563 = vmatpush1.bf16.msra.mxu0 %v6745_v33  ;;  %v7549_v7 = vld [vmem:[#allocation10 + $0x220] ss:$8 sps:$4 sm:$0xff]   ;;  %v7554_v33 = vld [vmem:[#allocation10 + $0x234] ss:$8 sps:$4 sm:$0xff]  }
0x1477   : > { %5521 = vmatprep.subr.bf16.mxu1 %v6752_v34  ;;  %5564 = vmatprep.subr.bf16.mxu0 %v6754_v43  ;;  %v7552_v34 = vld [vmem:[#allocation10 + $0x230] ss:$8 sps:$4 sm:$0xff]   ;;  %v7557_v43 = vld [vmem:[#allocation10 + $0x244] ss:$8 sps:$4 sm:$0xff]  }
0x147a   : > { %5522 = vmatpush1.bf16.msra.mxu1 %v6751_v29  ;;  %5565 = vmatpush1.bf16.msra.mxu0 %v6753_v18  ;;  %v7566_v29 = vld [vmem:[#allocation10 + $0x274] ss:$8 sps:$4 sm:$0xff]   ;;  %v7564_v18 = vld [vmem:[#allocation10 + $0x270] ss:$8 sps:$4 sm:$0xff]  }
0x147b   : > { %5523 = vmatprep.subr.bf16.mxu1 %v6760_v35  ;;  %5566 = vmatprep.subr.bf16.mxu0 %v6762_v45  ;;  %v7569_v35 = vld [vmem:[#allocation10 + $0x284] ss:$8 sps:$4 sm:$0xff]   ;;  %v7567_v45 = vld [vmem:[#allocation10 + $0x280] ss:$8 sps:$4 sm:$0xff]  }
0x147e   : > { %5524 = vmatpush1.bf16.msra.mxu1 %v6759_v46  ;;  %5567 = vmatpush1.bf16.msra.mxu0 %v6761_v47  ;;  %v7578_v46 = vld [vmem:[#allocation10 + $0x2b4] ss:$8 sps:$4 sm:$0xff]   ;;  %v7576_v47 = vld [vmem:[#allocation10 + $0x2b0] ss:$8 sps:$4 sm:$0xff]  }
0x147f   : > { %5525 = vmatprep.subr.bf16.mxu1 %v6768_v48  ;;  %5568 = vmatprep.subr.bf16.mxu0 %v6770_v10  ;;  %v7581_v48 = vld [vmem:[#allocation10 + $0x2c4] ss:$8 sps:$4 sm:$0xff]   ;;  %v7579_v10 = vld [vmem:[#allocation10 + $0x2c0] ss:$8 sps:$4 sm:$0xff]  }
0x1482   : > { %5526 = vmatpush1.bf16.msra.mxu1 %v6767_v51  ;;  %5569 = vmatpush1.bf16.msra.mxu0 %v6769_v54  ;;  %v7590_v51 = vld [vmem:[#allocation10 + $0x2f4] ss:$8 sps:$4 sm:$0xff]   ;;  %v7588_v54 = vld [vmem:[#allocation10 + $0x2f0] ss:$8 sps:$4 sm:$0xff]  }
0x1483   : > { %5527 = vmatprep.subr.bf16.mxu1 %v6776_v56  ;;  %5570 = vmatprep.subr.bf16.mxu0 %v6778_v58  ;;  %v7593_v56 = vld [vmem:[#allocation10 + $0x304] ss:$8 sps:$4 sm:$0xff]  }
0x1486   : > { %5528 = vmatpush1.bf16.msra.mxu1 %v6775_v55  ;;  %5571 = vmatpush1.bf16.msra.mxu0 %v6777_v28 }
0x1487   : > { %5529 = vmatprep.subr.bf16.mxu1 %v6784_v32  ;;  %5572 = vmatprep.subr.bf16.mxu0 %v6786_v59 }
0x148a   : > { %5530 = vmatpush1.bf16.msra.mxu1 %v6783_v1  ;;  %5573 = vmatpush1.bf16.msra.mxu0 %v6785_v23 }
0x148b   : > { %5531 = vmatprep.subr.bf16.mxu1 %v6792_v30  ;;  %5574 = vmatprep.subr.bf16.mxu0 %v6794_v8 }
0x148e   : > { %5532 = vmatpush1.bf16.msra.mxu1 %v6791_v14  ;;  %5575 = vmatpush1.bf16.msra.mxu0 %v6793_v60 }
0x148f   : > { %5533 = vmatprep.subr.bf16.mxu1 %v6800_v26  ;;  %5576 = vmatprep.subr.bf16.mxu0 %v6802_v17 }
0x1492   : > { %5534 = vmatpush1.bf16.msra.mxu1 %v6799_v39  ;;  %5577 = vmatpush1.bf16.msra.mxu0 %v6801_v40 }
0x1493   : > { %5977 = vmatprep.subr.bf16.mxu1 %v7545_v41 }
0x1495   : > { %5536 = vmatmul.mubr.bf16.vlgmr.msra.gmra.mrb[60].mxu1 %v8663_v38  ;;  %5579 = vmatmul.mubr.bf16.vlgmr.msra.gmra.mrb[36].mxu0 %v8663_v38  ;;  %v7560_v38 = vld [vmem:[#allocation10 + $0x254] ss:$8 sps:$4 sm:$0xff]  }
0x1496   : > { %5978 = vmatpush1.bf16.msra.mxu1 %v7543_v42 }
0x1497   : > { %5979 = vmatprep.subr.bf16.mxu1 %v7548_v20 }
0x149a   : > { %5980 = vmatpush1.bf16.msra.mxu1 %v7546_v21 }
0x149b   : > { %5981 = vmatprep.subr.bf16.mxu1 %v7551_v6 }
0x149e   : > { %5982 = vmatpush1.bf16.msra.mxu1 %v7549_v7 }
0x149f   : > { %5983 = vmatprep.subr.bf16.mxu1 %v7554_v33 }
0x14a2   : > { %5984 = vmatpush1.bf16.msra.mxu1 %v7552_v34 }
0x14a3   : > { %5985 = vmatprep.subr.bf16.mxu1 %v7557_v43 }
0x14a6   : > { %5986 = vmatpush1.bf16.msra.mxu1 %v7555_v9 }
0x14a7   : > { %5987 = vmatprep.subr.bf16.mxu1 %v7560_v38 }
0x14aa   : > { %5988 = vmatpush1.bf16.msra.mxu1 %v7558_v44 }
0x14ab   : > { %5989 = vmatprep.subr.bf16.mxu1 %v7563_v22 }
0x14ae   : > { %5990 = vmatpush1.bf16.msra.mxu1 %v7561_v24 }
0x14af   : > { %5991 = vmatprep.subr.bf16.mxu1 %v7566_v29 }
0x14b2   : > { %5992 = vmatpush1.bf16.msra.mxu1 %v7564_v18 }
0x14b3   : > { %5993 = vmatprep.subr.bf16.mxu1 %v7569_v35 }
0x14b6   : > { %5994 = vmatpush1.bf16.msra.mxu1 %v7567_v45 }
0x14b7   : > { %5995 = vmatprep.subr.bf16.mxu1 %v7572_v36 }
0x14ba   : > { %5996 = vmatpush1.bf16.msra.mxu1 %v7570_v52 }
0x14bb   : > { %5997 = vmatprep.subr.bf16.mxu1 %v7575_v53 }
0x14be   : > { %5998 = vmatpush1.bf16.msra.mxu1 %v7573_v37 }
0x14bf   : > { %5999 = vmatprep.subr.bf16.mxu1 %v7578_v46 }
0x14c2   : > { %6000 = vmatpush1.bf16.msra.mxu1 %v7576_v47 }
0x14c3   : > { %6001 = vmatprep.subr.bf16.mxu1 %v7581_v48 }
0x14c6   : > { %6002 = vmatpush1.bf16.msra.mxu1 %v7579_v10 }
0x14c7   : > { %6003 = vmatprep.subr.bf16.mxu1 %v7584_v19 }
0x14ca   : > { %6004 = vmatpush1.bf16.msra.mxu1 %v7582_v27 }
0x14cb   : > { %6005 = vmatprep.subr.bf16.mxu1 %v7587_v50 }
0x14ce   : > { %6006 = vmatpush1.bf16.msra.mxu1 %v7585_v49 }
0x14cf   : > { %6007 = vmatprep.subr.bf16.mxu1 %v7590_v51 }
0x14d2   : > { %6008 = vmatpush1.bf16.msra.mxu1 %v7588_v54 }
0x14d3   : > { %6020 = vmatprep.subr.bf16.mxu1 %v7593_v56 }
0x1528   : > { %v5451_v58 = vpop.f32.mrb[56].mxu1  ;;  %v5494_v15 = vpop.f32.mrb[32].mxu0 }
0x1529   : > { %v5453_v25 = vpop.f32.mrb[57].mxu1  ;;  %v5496_v16 = vpop.f32.mrb[33].mxu0  ;;  %v6803_v59 = vmul.f32 -1.442695, %v5451_v58  ;;  %v6805_v4 = vmul.f32 -1.442695, %v5494_v15 }
0x152a   : > { %v5455_v62 = vpop.f32.mrb[58].mxu1  ;;  %v5498_v55 = vpop.f32.mrb[34].mxu0  ;;  %v6804_v11 = vmul.f32 -1.442695, %v5453_v25  ;;  %v6806_v63 = vmul.f32 -1.442695, %v5496_v16 }
0x152b   : > { %v5457_v28 = vpop.f32.mrb[59].mxu1  ;;  %v5500_v32 = vpop.f32.mrb[35].mxu0  ;;  %7719 = vpow2.f32 %v6803_v59  ;;  %v6807_v5 = vmul.f32 -1.442695, %v5455_v62  ;;  %v6809_v1 = vmul.f32 -1.442695, %v5498_v55 }
0x152c   : > { %7721 = vpow2.f32 %v6805_v4  ;;  %v6808_v23 = vmul.f32 -1.442695, %v5457_v28  ;;  %v6810_v30 = vmul.f32 -1.442695, %v5500_v32 }
0x152d   : > { %7723 = vpow2.f32 %v6804_v11  ;;  %v7591_v11 = vld [vmem:[#allocation10 + $0x300] ss:$8 sps:$4 sm:$0xff]  }
0x152e   : > { %7725 = vpow2.f32 %v6806_v63  ;;  %v7599_v63 = vld [vmem:[#allocation10 + $0x324] ss:$8 sps:$4 sm:$0xff]  }
0x152f   : > { %7727 = vpow2.f32 %v6807_v5  ;;  %v7597_v5 = vld [vmem:[#allocation10 + $0x320] ss:$8 sps:$4 sm:$0xff]  }
0x1530   : > { %7729 = vpow2.f32 %v6809_v1  ;;  %v7602_v1 = vld [vmem:[#allocation10 + $0x334] ss:$8 sps:$4 sm:$0xff]  }
0x1531   : > { %7731 = vpow2.f32 %v6808_v23  ;;  %v7600_v23 = vld [vmem:[#allocation10 + $0x330] ss:$8 sps:$4 sm:$0xff]  }
0x1532   : > { %7733 = vpow2.f32 %v6810_v30  ;;  %v7605_v30 = vld [vmem:[#allocation10 + $0x344] ss:$8 sps:$4 sm:$0xff]  }
0x1535   : > { %v7720_v8 = vpop.eup %7719 }
0x1536   : > { %v7722_v0 = vpop.eup %7721  ;;  %v5613_v31 = vadd.f32 1.0, %v7720_v8  ;;  %v7603_v8 = vld [vmem:[#allocation10 + $0x340] ss:$8 sps:$4 sm:$0xff]  }
0x1537   : > { %v7724_v12 = vpop.eup %7723  ;;  %v5615_v60 = vadd.f32 1.0, %v7722_v0  ;;  %v7608_v0 = vld [vmem:[#allocation10 + $0x354] ss:$8 sps:$4 sm:$0xff]  }
0x1538   : > { %v7726_v13 = vpop.eup %7725  ;;  %v5614_v17 = vadd.f32 1.0, %v7724_v12  ;;  %7735 = vrcp.f32 %v5613_v31  ;;  %v7606_v12 = vld [vmem:[#allocation10 + $0x350] ss:$8 sps:$4 sm:$0xff]   ;;  %v7609_v31 = vld [vmem:[#allocation10 + $0x360] ss:$8 sps:$4 sm:$0xff]  }
0x1539   : > { %v7728_v14 = vpop.eup %7727  ;;  %v5616_v40 = vadd.f32 1.0, %v7726_v13  ;;  %7737 = vrcp.f32 %v5615_v60  ;;  %v7611_v13 = vld [vmem:[#allocation10 + $0x364] ss:$8 sps:$4 sm:$0xff]   ;;  %v7612_v60 = vld [vmem:[#allocation10 + $0x370] ss:$8 sps:$4 sm:$0xff]  }
0x153a   : > { %v7730_v26 = vpop.eup %7729  ;;  %v5617_v42 = vadd.f32 1.0, %v7728_v14  ;;  %7739 = vrcp.f32 %v5614_v17  ;;  %v7614_v14 = vld [vmem:[#allocation10 + $0x374] ss:$8 sps:$4 sm:$0xff]   ;;  %v7615_v17 = vld [vmem:[#allocation10 + $0x380] ss:$8 sps:$4 sm:$0xff]  }
0x153b   : > { %v7732_v39 = vpop.eup %7731  ;;  %v5619_v20 = vadd.f32 1.0, %v7730_v26  ;;  %7741 = vrcp.f32 %v5616_v40  ;;  %v7617_v26 = vld [vmem:[#allocation10 + $0x384] ss:$8 sps:$4 sm:$0xff]   ;;  %v7618_v40 = vld [vmem:[#allocation10 + $0x390] ss:$8 sps:$4 sm:$0xff]  }
0x153c   : > { %v7734_v41 = vpop.eup %7733  ;;  %v5618_v21 = vadd.f32 1.0, %v7732_v39  ;;  %7743 = vrcp.f32 %v5617_v42  ;;  %v7620_v39 = vld [vmem:[#allocation10 + $0x394] ss:$8 sps:$4 sm:$0xff]   ;;  %v7621_v42 = vld [vmem:[#allocation10 + $0x3a0] ss:$8 sps:$4 sm:$0xff]  }
0x153d   : > { %v5620_v6 = vadd.f32 1.0, %v7734_v41  ;;  %7745 = vrcp.f32 %v5619_v20  ;;  %v7623_v41 = vld [vmem:[#allocation10 + $0x3a4] ss:$8 sps:$4 sm:$0xff]   ;;  %v7626_v20 = vld [vmem:[#allocation10 + $0x3b4] ss:$8 sps:$4 sm:$0xff]  }
0x153e   : > { %7747 = vrcp.f32 %v5618_v21  ;;  %v7624_v21 = vld [vmem:[#allocation10 + $0x3b0] ss:$8 sps:$4 sm:$0xff]  }
0x153f   : > { %7749 = vrcp.f32 %v5620_v6  ;;  %v7629_v6 = vld [vmem:[#allocation10 + $0x3c4] ss:$8 sps:$4 sm:$0xff]  }
0x1542   : > { %v7736_v7 = vpop.eup %7735 }
0x1543   : > { %v7738_v33 = vpop.eup %7737  ;;  %v5637_v24 = vmul.f32 %v7736_v7, %v5451_v58  ;;  %v7627_v7 = vld [vmem:[#allocation10 + $0x3c0] ss:$8 sps:$4 sm:$0xff]  }
0x1544   : > { %v7740_v34 = vpop.eup %7739  ;;  %v5639_v29 = vmul.f32 %v7738_v33, %v5494_v15  ;;  %v7632_v33 = vld [vmem:[#allocation10 + $0x3d4] ss:$8 sps:$4 sm:$0xff]  }
0x1545   : > { %v7742_v43 = vpop.eup %7741  ;;  %v5638_v18 = vmul.f32 %v7740_v34, %v5453_v25  ;;  %v7630_v34 = vld [vmem:[#allocation10 + $0x3d0] ss:$8 sps:$4 sm:$0xff]  }
0x1546   : > { %v7744_v9 = vpop.eup %7743  ;;  %v5640_v35 = vmul.f32 %v7742_v43, %v5496_v16  ;;  %v7635_v43 = vld [vmem:[#allocation10 + $0x3e4] ss:$8 sps:$4 sm:$0xff]  }
0x1547   : > { %v7746_v38 = vpop.eup %7745  ;;  %v5641_v52 = vmul.f32 %v7744_v9, %v5455_v62  ;;  %v7633_v9 = vld [vmem:[#allocation10 + $0x3e0] ss:$8 sps:$4 sm:$0xff]  }
0x1548   : > { %v7748_v44 = vpop.eup %7747  ;;  %v5643_v53 = vmul.f32 %v7746_v38, %v5498_v55  ;;  %v7638_v38 = vld [vmem:[#allocation10 + $0x3f4] ss:$8 sps:$4 sm:$0xff]  }
0x1549   : > { %v7750_v22 = vpop.eup %7749  ;;  %v5642_v10 = vmul.f32 %v7748_v44, %v5457_v28  ;;  %v7596_v28 = vld [vmem:[#allocation10 + $0x314] ss:$8 sps:$4 sm:$0xff]   ;;  %v7636_v44 = vld [vmem:[#allocation10 + $0x3f0] ss:$8 sps:$4 sm:$0xff]  }
0x154a   : > { %v5644_v19 = vmul.f32 %v7750_v22, %v5500_v32  ;;  %v7594_v32 = vld [vmem:[#allocation10 + $0x310] ss:$8 sps:$4 sm:$0xff]  }
0x1568   : > { %v5537_v45 = vpop.f32.mrb[60].mxu1  ;;  %v5580_v36 = vpop.f32.mrb[36].mxu0 }
0x1569   : > { %v5645_v37 = vmul.f32 %v5637_v24, %v5537_v45  ;;  %v8669_v46 = vmul.f32 %v5639_v29, %v5580_v36  ;;  %v5539_v47 = vpop.f32.mrb[61].mxu1  ;;  %v5582_v48 = vpop.f32.mrb[37].mxu0 }
0x156a   : > { %v5646_v27 = vmul.f32 %v5638_v18, %v5539_v47  ;;  %v5648_v49 = vmul.f32 %v5640_v35, %v5582_v48  ;;  %v5541_v50 = vpop.f32.mrb[62].mxu1  ;;  %v5584_v51 = vpop.f32.mrb[38].mxu0 }
0x156b   : > { %v5649_v54 = vmul.f32 %v5641_v52, %v5541_v50  ;;  %v8671_v56 = vmul.f32 %v5643_v53, %v5584_v51  ;;  %v5543_v58 = vpop.f32.mrb[63].mxu1  ;;  %v5586_v15 = vpop.f32.mrb[39].mxu0 }
0x156c   : > { %v5650_v25 = vmul.f32 %v5642_v10, %v5543_v58  ;;  %v5652_v16 = vmul.f32 %v5644_v19, %v5586_v15 }
0x156d   : > { %v5653_v62 = vpack.c.bf16 %v5649_v54, %v5645_v37  ;;  %v5655_v55 = vpack.c.bf16 %v8671_v56, %v8669_v46 }
0x156e   : > { %v5654_v59 = vpack.c.bf16 %v5650_v25, %v5646_v27  ;;  %v5656_v4 = vpack.c.bf16 %v5652_v16, %v5648_v49 }
0x1570   : > { %6009 = vmatprep.mubr.bf16.mxu1 %v5654_v59 }
0x1571   : > { %6010 = vmatmul.mubr.bf16.vlgmr.msra.gmra.mrb[64].mxu1 %v5653_v62 }
0x1572   : > { %6021 = vmatpush1.bf16.msra.mxu1 %v7591_v11  ;;  %6052 = vmatprep.mubr.bf16.mxu1 %v5656_v4 }
0x1573   : > { %6022 = vmatprep.subr.bf16.mxu1 %v7596_v28 }
0x1576   : > { %6023 = vmatpush1.bf16.msra.mxu1 %v7594_v32 }
0x1577   : > { %6024 = vmatprep.subr.bf16.mxu1 %v7599_v63 }
0x157a   : > { %6025 = vmatpush1.bf16.msra.mxu1 %v7597_v5 }
0x157b   : > { %6026 = vmatprep.subr.bf16.mxu1 %v7602_v1 }
0x157e   : > { %6027 = vmatpush1.bf16.msra.mxu1 %v7600_v23 }
0x157f   : > { %6028 = vmatprep.subr.bf16.mxu1 %v7605_v30 }
0x1582   : > { %6029 = vmatpush1.bf16.msra.mxu1 %v7603_v8 }
0x1583   : > { %6030 = vmatprep.subr.bf16.mxu1 %v7608_v0 }
0x1586   : > { %6031 = vmatpush1.bf16.msra.mxu1 %v7606_v12 }
0x1587   : > { %6032 = vmatprep.subr.bf16.mxu1 %v7611_v13 }
0x158a   : > { %6033 = vmatpush1.bf16.msra.mxu1 %v7609_v31 }
0x158b   : > { %6034 = vmatprep.subr.bf16.mxu1 %v7614_v14 }
0x158e   : > { %6035 = vmatpush1.bf16.msra.mxu1 %v7612_v60 }
0x158f   : > { %6036 = vmatprep.subr.bf16.mxu1 %v7617_v26 }
0x1592   : > { %6037 = vmatpush1.bf16.msra.mxu1 %v7615_v17 }
0x1593   : > { %6038 = vmatprep.subr.bf16.mxu1 %v7620_v39 }
0x1596   : > { %6039 = vmatpush1.bf16.msra.mxu1 %v7618_v40 }
0x1597   : > { %6040 = vmatprep.subr.bf16.mxu1 %v7623_v41 }
0x159a   : > { %6041 = vmatpush1.bf16.msra.mxu1 %v7621_v42 }
0x159b   : > { %6042 = vmatprep.subr.bf16.mxu1 %v7626_v20 }
0x159e   : > { %6043 = vmatpush1.bf16.msra.mxu1 %v7624_v21 }
0x159f   : > { %6044 = vmatprep.subr.bf16.mxu1 %v7629_v6 }
0x15a2   : > { %6045 = vmatpush1.bf16.msra.mxu1 %v7627_v7 }
0x15a3   : > { %6046 = vmatprep.subr.bf16.mxu1 %v7632_v33 }
0x15a6   : > { %6047 = vmatpush1.bf16.msra.mxu1 %v7630_v34 }
0x15a7   : > { %6048 = vmatprep.subr.bf16.mxu1 %v7635_v43 }
0x15aa   : > { %6049 = vmatpush1.bf16.msra.mxu1 %v7633_v9 }
0x15ab   : > { %6050 = vmatprep.subr.bf16.mxu1 %v7638_v38 }
0x15ae   : > { %6051 = vmatpush1.bf16.msra.mxu1 %v7636_v44 }
0x15b1   : > { %6053 = vmatmul.mubr.bf16.vlgmr.msra.gmra.mrb[64].mxu1 %v5655_v55 }
0x1684   : > { %v6054_v22 = vpop.f32.mrb[64].mxu1 }
0x1685   : > { %v6063_v24 = vadd.f32 %v6054_v22, %v8635_v57  ;;  %v6056_v29 = vpop.f32.mrb[65].mxu1 }
0x1686   : > { %v6064_v18 = vadd.f32 %v6056_v29, %v8638_v2  ;;  %v6058_v35 = vpop.f32.mrb[66].mxu1 }
0x1687   : > { %6067 = vst [vmem:[%s408_s29] sm:$0xff] %v6063_v24  ;;  %v6065_v45 = vadd.f32 %v6058_v35, %v8641_v3  ;;  %v6060_v36 = vpop.f32.mrb[67].mxu1 }
0x1688   : > { %6068 = vst [vmem:[%s408_s29 + $0x8] sm:$0xff] %v6064_v18  ;;  %v6066_v57 = vadd.f32 %v6060_v36, %v8646_v61 }
0x1689   : > { %6069 = vst [vmem:[%s408_s29 + $0x10] sm:$0xff] %v6065_v45 }
0x168a   : > { %6070 = vst [vmem:[%s408_s29 + $0x18] sm:$0xff] %v6066_v57 }
0x168b   : > { %7914 = shalt.err (!%p7911_p13)
}
0x168c   : > { %s7915_s21 = scalar_lea.hbm %s8689_s13, 512  ;;  %s7919_s30 = scalar_lea.hbm %s8743_s9, 1024 }
0x168d   : > { %p7916_p9 = scmp.ne.s32.totalorder %s8689_s13, %s7915_s21  ;;  %p7920_p4 = scmp.lt.u32.totalorder %s8689_s13, %s8743_s9 }
0x168e   : > { %p7921_p8 = scmp.lt.u32.totalorder %s7919_s30, %s7915_s21  ;;  %p7923_p3 = scmp.lt.u32.totalorder %s7915_s21, %s8689_s13 }
0x168f   : > { %p7917_p0 = pnand %p7916_p9, %p8203_p10 }
0x1690   : > { %p7922_p6 = por %p7921_p8, %p7920_p4 }
0x1691   : > { %p7918_p11 = pneg %p7917_p0 }
0x1692   : > { %p7924_p5 = por %p7923_p3, %p7922_p6 }
0x1694   : > { %p7925_p7 = pnand %p7924_p5, %p7918_p11 }
0x1696   : > { %7928 = shalt.err (!%p7925_p7)
}
0x1697   : > { %s7995_s16 = smov 256   ;;  %s7996_s22 = smov 16  }
0x1698   : > { %6980 = dma.vmem_to_hbm [thread:$0]  (%p8203_p10), %s8682_s15, 512, %s8689_s13, %s6072_s25, %s7995_s16, %s7995_s16, %s7996_s22  }
0x1699 PF: > { %s8767_s4 = sld [smem:[#allocation16_spill]]  ;;  %s8768_s24 = sld [smem:[#allocation17_spill]] }
0x169a   : > { %p8770_p2 = scmp.ge.s32.totalorder %s7975_s12, 2 }
0x169f   : > { %s6100_s19 = sand.u32 1, %s8767_s4   ;;  %p8769_p12 = scmp.ne.s32.totalorder %s8768_s24, 0 }
0x16a0   : > { %s6101_s23 = scalar_lea.sflag [#allocation4], %s6100_s19 }
0x16a1   : > { %p7000_p1 = pnand %p8770_p2, %p8769_p12 }
0x16a3   : > { %7958 = dma.done.wait (!%p7000_p1), %s6101_s23, 512  }
0x16a4   : > { %7960 = vsyncadd (!%p7000_p1), %s6101_s23, 4294966784  ;;  %p24_p13 = scmp.ge.s32.totalorder %s8193_s28, 4   ;;  %s8771_s30 = smov %s7967_s10 }
0x16a5   : > { %s8772_s10 = smov %s7971_s11  ;;  %s8773_s11 = smov %s8209_s27 }
0x16a6   : > { %s8774_s12 = smov %s8193_s28  ;;  %26 = sbr.rel (!%p24_p13) target bundleno = 9 (0x9), region = 123 }
0x16ad   :  { %6106 = vsyncpa [#allocation3], 1 }
0x16ae   :  { %6108 = vsyncpa [#allocation3 + $0x1], 1 }
0x16af   :  { %6109 = vsyncpa [#allocation6], 1 }
0x16b0   :  { %6110 = vsyncpa [#allocation9], 1 }
0x16b1   :  { %6111 = vsyncpa [#allocation4], 1 }
0x16b2   :  { %6113 = vsyncpa [#allocation4 + $0x1], 1 }

</bundles_post_ra>
